<compile_context>
chip_gen: v5e
topology: v5e:2x2
jax: 0.10.0
libtpu: 0.0.40
codegen_flags: <defaults>
</compile_context>

<pallas_src>
import functools

import jax
import jax.numpy as jnp
from jax import lax
from jax.experimental import pallas as pl
from jax.experimental.pallas import tpu as pltpu

EPS = 1e-5
NEG_SLOPE = 0.1

# Tap order matches the (kh, kw) flattening of an HWIO (3,3,Ci,Co) weight.
_TAPS = tuple((dh, dw) for dh in (-1, 0, 1) for dw in (-1, 0, 1))
_CENTER = 4  # tap index of (0, 0)


# ------------------------------- the kernel -------------------------------

def _paraphraser_kernel(x_ref, w_ref, g_ref, b_ref, mask_ref, zo_ref,
                        *, spatial_w):
    """6 x [3x3 conv -> BN(train) -> LeakyReLU]; activations as (Cmax, N*H*W).

    x_ref:    (cmax, M)           input activations (padded channel rows = 0)
    w_ref:    (6*9, cmax, cmax)   per-layer, per-tap (Co, Ci) weight blocks
    g_ref:    (6, cmax, 1)        BN gamma (padded rows = 0)
    b_ref:    (6, cmax, 1)        BN beta  (padded rows = 0)
    mask_ref: (9, M)              per-tap border masks (NOT channel-replicated)
    zo_ref:   (2*cmax, M)         rows [0:cmax) = z, rows [cmax:2cmax) = out
    """
    cmax, M = x_ref.shape
    inv_m = 1.0 / M

    # Hoisted MXU-reduction column (JAX does not CSE broadcasts -> build once).
    ones_m = jnp.ones((M, 1), jnp.float32)

    h = x_ref[...]                                    # (cmax, M) f32

    for layer in range(6):
        # ---- 3x3 conv as 9 accumulating per-tap MXU matmuls (no im2col slab) ----
        y = jnp.dot(w_ref[layer * 9 + _CENTER], h,    # center tap: no roll/mask
                    preferred_element_type=jnp.float32)
        for t, (dh, dw) in enumerate(_TAPS):
            off = dh * spatial_w + dw
            if off == 0:
                continue
            mask = mask_ref[pl.ds(t, 1), :]           # (1, M), loaded in-loop
            block = pltpu.roll(h, (-off) % M, axis=1) * mask   # sublane-broadcast
            y = y + jnp.dot(w_ref[layer * 9 + t], block,
                            preferred_element_type=jnp.float32)

        # ---- single-pass BN (batch stats, biased var) fused with LeakyReLU ----
        # Lane reductions on the (otherwise idle) MXU instead of the loaded XLU.
        s = jnp.dot(y, ones_m, preferred_element_type=jnp.float32)       # (cmax,1)
        ss = jnp.dot(y * y, ones_m, preferred_element_type=jnp.float32)  # (cmax,1)
        mean = s * inv_m
        var = ss * inv_m - mean * mean
        # TODO(synk): single-pass E[y^2]-E[y]^2 is fine at these magnitudes; use a
        # two-pass/shifted variance in the tiled production rewrite.
        scale = g_ref[layer] * lax.rsqrt(var + EPS)   # gamma * inv_std
        shift = b_ref[layer] - mean * scale
        y = y * scale + shift
        h = jnp.maximum(y, NEG_SLOPE * y)             # LeakyReLU; padded rows stay 0

        if layer == 2:                                # end of encoder -> z
            zo_ref[pl.ds(0, cmax), :] = h

    zo_ref[pl.ds(cmax, cmax), :] = h                  # decoder output


# ------------------------------ python wrapper -----------------------------

def _pack_params(weights_hwio, gammas, betas, chans, cmax):
    """Pack 6 HWIO weights + BN params into channel-padded, per-tap tensors."""
    w_list, g_list, b_list = [], [], []
    for i in range(6):
        ci, co = chans[i], chans[i + 1]
        w = weights_hwio[i].astype(jnp.float32)                       # (3,3,ci,co)
        w = jnp.pad(w, ((0, 0), (0, 0), (0, cmax - ci), (0, cmax - co)))
        # (3,3,cmax,cmax) -> (9, ci, co) -> (9, co, ci) per-tap blocks
        w_list.append(jnp.transpose(w.reshape(9, cmax, cmax), (0, 2, 1)))
        g = jnp.zeros((cmax,), jnp.float32).at[:co].set(
            gammas[i].reshape(-1).astype(jnp.float32))
        b = jnp.zeros((cmax,), jnp.float32).at[:co].set(
            betas[i].reshape(-1).astype(jnp.float32))
        g_list.append(g.reshape(cmax, 1))
        b_list.append(b.reshape(cmax, 1))
    w_all = jnp.concatenate(w_list, axis=0)           # (6*9, cmax, cmax)
    return w_all, jnp.stack(g_list), jnp.stack(b_list)


def _make_tap_masks(N, H, W):
    """(9, N*H*W) f32; 1.0 where the shifted source pixel is in-bounds."""
    hh = jnp.arange(H)
    ww = jnp.arange(W)
    masks = []
    for dh, dw in _TAPS:
        row_ok = (hh + dh >= 0) & (hh + dh < H)
        col_ok = (ww + dw >= 0) & (ww + dw < W)
        m2d = (row_ok[:, None] & col_ok[None, :]).astype(jnp.float32)  # (H, W)
        masks.append(jnp.tile(m2d.reshape(-1), (N,)))                  # (N*H*W,)
    return jnp.stack(masks, axis=0)                                    # (9, M)


def paraphraser_forward(x_nchw, weights_hwio, gammas, betas):
    """x_nchw: (N, Cin, H, W). Returns (z, out) in NCHW, like the torch module."""
    N, Cin, H, W = x_nchw.shape
    Cf = weights_hwio[1].shape[-1]              # factor channels
    chans = (Cin, Cin, Cf, Cf, Cf, Cin, Cin)    # per-layer Ci -> Co
    cmax = max(chans)
    M = N * H * W

    w_all, g_all, b_all = _pack_params(weights_hwio, gammas, betas, chans, cmax)
    mask_all = _make_tap_masks(N, H, W)

    # channels on sublanes (padded to cmax), batch*spatial on lanes (lane-dense).
    x_cm = jnp.transpose(x_nchw, (1, 0, 2, 3)).reshape(Cin, M).astype(jnp.float32)
    x_cm = jnp.pad(x_cm, ((0, cmax - Cin), (0, 0)))

    kernel = functools.partial(_paraphraser_kernel, spatial_w=W)
    vmem = pl.BlockSpec(memory_space=pltpu.MemorySpace.VMEM)

    zo = pl.pallas_call(
        kernel,
        out_shape=jax.ShapeDtypeStruct((2 * cmax, M), jnp.float32),
        in_specs=[vmem] * 5,
        out_specs=vmem,
    )(x_cm, w_all, g_all, b_all, mask_all)

    z_cm, out_cm = zo[:cmax], zo[cmax:]
    z = jnp.transpose(z_cm[:Cf].reshape(Cf, N, H, W), (1, 0, 2, 3))
    out = jnp.transpose(out_cm[:Cin].reshape(Cin, N, H, W), (1, 0, 2, 3))
    return z, out


# ----------------------- deterministic parameter init ----------------------

def init_params(key, in_channels_t, k):
    cf = int(in_channels_t * k)
    enc_io = [(in_channels_t, in_channels_t), (in_channels_t, cf), (cf, cf)]
    dec_io = [(cf, cf), (cf, in_channels_t), (in_channels_t, in_channels_t)]

    weights_hwio, gammas, betas = [], [], []
    keys = jax.random.split(key, 6)

    # encoder Conv2d: kaiming_normal_(mode='fan_out', nonlinearity='relu')
    for idx, (ci, co) in enumerate(enc_io):
        std = (2.0 / (co * 9)) ** 0.5
        w_oihw = std * jax.random.normal(keys[idx], (co, ci, 3, 3), jnp.float32)
        weights_hwio.append(jnp.transpose(w_oihw, (2, 3, 1, 0)))       # -> HWIO
        gammas.append(jnp.ones((1, co), jnp.float32))
        betas.append(jnp.zeros((1, co), jnp.float32))

    # decoder ConvTranspose2d: default torch init, converted to an equivalent
    # forward-conv weight (flip spatially + swap in/out channels).
    for idx, (ci, co) in enumerate(dec_io):
        bound = 1.0 / ((co * 9) ** 0.5)
        w_iohw = jax.random.uniform(keys[3 + idx], (ci, co, 3, 3), jnp.float32,
                                    minval=-bound, maxval=bound)
        w_conv = jnp.transpose(jnp.flip(w_iohw, axis=(2, 3)), (2, 3, 0, 1))  # HWIO
        weights_hwio.append(w_conv)
        gammas.append(jnp.ones((1, co), jnp.float32))
        betas.append(jnp.zeros((1, co), jnp.float32))

    return weights_hwio, gammas, betas


# ------------------------------ plain-JAX reference ------------------------

def _ref_forward(x_nchw, weights_hwio, gammas, betas):
    x = jnp.transpose(x_nchw, (0, 2, 3, 1)).astype(jnp.float32)
    dn = lax.conv_dimension_numbers(x.shape, weights_hwio[0].shape,
                                    ('NHWC', 'HWIO', 'NHWC'))
    h, z = x, None
    for i in range(6):
        h = lax.conv_general_dilated(h, weights_hwio[i], (1, 1), 'SAME',
                                     dimension_numbers=dn)
        mean = jnp.mean(h, axis=(0, 1, 2), keepdims=True)
        var = jnp.mean(jnp.square(h - mean), axis=(0, 1, 2), keepdims=True)
        h = (h - mean) * lax.rsqrt(var + EPS)
        h = h * gammas[i].reshape(1, 1, 1, -1) + betas[i].reshape(1, 1, 1, -1)
        h = jnp.where(h > 0, h, NEG_SLOPE * h)
        if i == 2:
            z = h
    return jnp.transpose(z, (0, 3, 1, 2)), jnp.transpose(h, (0, 3, 1, 2))


# ---------------------------------- main -----------------------------------

if __name__ == "__main__":
    key = jax.random.PRNGKey(0)
    kx, kp = jax.random.split(key)

    in_channels_t = 8
    k_factor = 0.5               # factor_channels = 4
    N, H, W = 2, 16, 16

    x = jax.random.normal(kx, (N, in_channels_t, H, W), jnp.float32)
    weights_hwio, gammas, betas = init_params(kp, in_channels_t, k_factor)

    z, out = paraphraser_forward(x, weights_hwio, gammas, betas)
    jax.block_until_ready((z, out))

    z_want, out_want = _ref_forward(x, weights_hwio, gammas, betas)
    assert z.shape == (N, int(in_channels_t * k_factor), H, W)
    assert out.shape == (N, in_channels_t, H, W)
    assert jnp.allclose(z, z_want, rtol=2e-4, atol=2e-4), \
        float(jnp.max(jnp.abs(z - z_want)))
    assert jnp.allclose(out, out_want, rtol=2e-4, atol=2e-4), \
        float(jnp.max(jnp.abs(out - out_want)))

    print("KERNEL_OK")
</pallas_src>

<mosaic_0001>
module attributes {stable_mosaic.version = 11 : i64} {
  func.func @_paraphraser_kernel(%arg0: memref<8x512xf32, #tpu.memory_space<vmem>>, %arg1: memref<54x8x8xf32, #tpu.memory_space<vmem>>, %arg2: memref<6x8x1xf32, #tpu.memory_space<vmem>>, %arg3: memref<6x8x1xf32, #tpu.memory_space<vmem>>, %arg4: memref<9x512xf32, #tpu.memory_space<vmem>>, %arg5: memref<16x512xf32, #tpu.memory_space<vmem>>) attributes {dimension_semantics = [], scalar_prefetch = 0 : i64, scratch_operands = 0 : i64, tpu.core_type = #tpu.core_type<tc>} {
    %cst = arith.constant 1.000000e+00 : f32
    %0 = vector.broadcast %cst : f32 to vector<512x1xf32>
    %c0 = arith.constant 0 : index
    %c0_0 = arith.constant 0 : index
    %1 = vector.load %arg0[%c0, %c0_0] : memref<8x512xf32, #tpu.memory_space<vmem>>, vector<8x512xf32>
    %c4 = arith.constant 4 : index
    %c0_1 = arith.constant 0 : index
    %c0_2 = arith.constant 0 : index
    %2 = vector.load %arg1[%c4, %c0_1, %c0_2] : memref<54x8x8xf32, #tpu.memory_space<vmem>>, vector<1x8x8xf32>
    %3 = vector.shape_cast %2 : vector<1x8x8xf32> to vector<8x8xf32>
    %cst_3 = arith.constant dense<0.000000e+00> : vector<8x512xf32>
    %4 = tpu.matmul %3, %1, %cst_3 {dimension_numbers = #tpu.dot_dimension_numbers<[1], [0], [0], [1], [0, 0, 1, 1], [], []>} : vector<8x8xf32>, vector<8x512xf32>, vector<8x512xf32> -> vector<8x512xf32>
    %c0_4 = arith.constant 0 : index
    %c0_5 = arith.constant 0 : index
    %5 = vector.load %arg4[%c0_4, %c0_5] : memref<9x512xf32, #tpu.memory_space<vmem>>, vector<1x512xf32>
    %c17_i32 = arith.constant 17 : i32
    %6 = tpu.dynamic_rotate %1 by %c17_i32 dim 1 : vector<8x512xf32>, i32 -> vector<8x512xf32>
    %7 = vector.broadcast %5 : vector<1x512xf32> to vector<8x512xf32>
    %8 = arith.mulf %6, %7 : vector<8x512xf32>
    %c0_6 = arith.constant 0 : index
    %c0_7 = arith.constant 0 : index
    %c0_8 = arith.constant 0 : index
    %9 = vector.load %arg1[%c0_6, %c0_7, %c0_8] : memref<54x8x8xf32, #tpu.memory_space<vmem>>, vector<1x8x8xf32>
    %10 = vector.shape_cast %9 : vector<1x8x8xf32> to vector<8x8xf32>
    %cst_9 = arith.constant dense<0.000000e+00> : vector<8x512xf32>
    %11 = tpu.matmul %10, %8, %cst_9 {dimension_numbers = #tpu.dot_dimension_numbers<[1], [0], [0], [1], [0, 0, 1, 1], [], []>} : vector<8x8xf32>, vector<8x512xf32>, vector<8x512xf32> -> vector<8x512xf32>
    %12 = arith.addf %4, %11 : vector<8x512xf32>
    %c1 = arith.constant 1 : index
    %c0_10 = arith.constant 0 : index
    %13 = vector.load %arg4[%c1, %c0_10] : memref<9x512xf32, #tpu.memory_space<vmem>>, vector<1x512xf32>
    %c16_i32 = arith.constant 16 : i32
    %14 = tpu.dynamic_rotate %1 by %c16_i32 dim 1 : vector<8x512xf32>, i32 -> vector<8x512xf32>
    %15 = vector.broadcast %13 : vector<1x512xf32> to vector<8x512xf32>
    %16 = arith.mulf %14, %15 : vector<8x512xf32>
    %c1_11 = arith.constant 1 : index
    %c0_12 = arith.constant 0 : index
    %c0_13 = arith.constant 0 : index
    %17 = vector.load %arg1[%c1_11, %c0_12, %c0_13] : memref<54x8x8xf32, #tpu.memory_space<vmem>>, vector<1x8x8xf32>
    %18 = vector.shape_cast %17 : vector<1x8x8xf32> to vector<8x8xf32>
    %cst_14 = arith.constant dense<0.000000e+00> : vector<8x512xf32>
    %19 = tpu.matmul %18, %16, %cst_14 {dimension_numbers = #tpu.dot_dimension_numbers<[1], [0], [0], [1], [0, 0, 1, 1], [], []>} : vector<8x8xf32>, vector<8x512xf32>, vector<8x512xf32> -> vector<8x512xf32>
    %20 = arith.addf %12, %19 : vector<8x512xf32>
    %c2 = arith.constant 2 : index
    %c0_15 = arith.constant 0 : index
    %21 = vector.load %arg4[%c2, %c0_15] : memref<9x512xf32, #tpu.memory_space<vmem>>, vector<1x512xf32>
    %c15_i32 = arith.constant 15 : i32
    %22 = tpu.dynamic_rotate %1 by %c15_i32 dim 1 : vector<8x512xf32>, i32 -> vector<8x512xf32>
    %23 = vector.broadcast %21 : vector<1x512xf32> to vector<8x512xf32>
    %24 = arith.mulf %22, %23 : vector<8x512xf32>
    %c2_16 = arith.constant 2 : index
    %c0_17 = arith.constant 0 : index
    %c0_18 = arith.constant 0 : index
    %25 = vector.load %arg1[%c2_16, %c0_17, %c0_18] : memref<54x8x8xf32, #tpu.memory_space<vmem>>, vector<1x8x8xf32>
    %26 = vector.shape_cast %25 : vector<1x8x8xf32> to vector<8x8xf32>
    %cst_19 = arith.constant dense<0.000000e+00> : vector<8x512xf32>
    %27 = tpu.matmul %26, %24, %cst_19 {dimension_numbers = #tpu.dot_dimension_numbers<[1], [0], [0], [1], [0, 0, 1, 1], [], []>} : vector<8x8xf32>, vector<8x512xf32>, vector<8x512xf32> -> vector<8x512xf32>
    %28 = arith.addf %20, %27 : vector<8x512xf32>
    %c3 = arith.constant 3 : index
    %c0_20 = arith.constant 0 : index
    %29 = vector.load %arg4[%c3, %c0_20] : memref<9x512xf32, #tpu.memory_space<vmem>>, vector<1x512xf32>
    %c1_i32 = arith.constant 1 : i32
    %30 = tpu.dynamic_rotate %1 by %c1_i32 dim 1 : vector<8x512xf32>, i32 -> vector<8x512xf32>
    %31 = vector.broadcast %29 : vector<1x512xf32> to vector<8x512xf32>
    %32 = arith.mulf %30, %31 : vector<8x512xf32>
    %c3_21 = arith.constant 3 : index
    %c0_22 = arith.constant 0 : index
    %c0_23 = arith.constant 0 : index
    %33 = vector.load %arg1[%c3_21, %c0_22, %c0_23] : memref<54x8x8xf32, #tpu.memory_space<vmem>>, vector<1x8x8xf32>
    %34 = vector.shape_cast %33 : vector<1x8x8xf32> to vector<8x8xf32>
    %cst_24 = arith.constant dense<0.000000e+00> : vector<8x512xf32>
    %35 = tpu.matmul %34, %32, %cst_24 {dimension_numbers = #tpu.dot_dimension_numbers<[1], [0], [0], [1], [0, 0, 1, 1], [], []>} : vector<8x8xf32>, vector<8x512xf32>, vector<8x512xf32> -> vector<8x512xf32>
    %36 = arith.addf %28, %35 : vector<8x512xf32>
    %c5 = arith.constant 5 : index
    %c0_25 = arith.constant 0 : index
    %37 = vector.load %arg4[%c5, %c0_25] : memref<9x512xf32, #tpu.memory_space<vmem>>, vector<1x512xf32>
    %c511_i32 = arith.constant 511 : i32
    %38 = tpu.dynamic_rotate %1 by %c511_i32 dim 1 : vector<8x512xf32>, i32 -> vector<8x512xf32>
    %39 = vector.broadcast %37 : vector<1x512xf32> to vector<8x512xf32>
    %40 = arith.mulf %38, %39 : vector<8x512xf32>
    %c5_26 = arith.constant 5 : index
    %c0_27 = arith.constant 0 : index
    %c0_28 = arith.constant 0 : index
    %41 = vector.load %arg1[%c5_26, %c0_27, %c0_28] : memref<54x8x8xf32, #tpu.memory_space<vmem>>, vector<1x8x8xf32>
    %42 = vector.shape_cast %41 : vector<1x8x8xf32> to vector<8x8xf32>
    %cst_29 = arith.constant dense<0.000000e+00> : vector<8x512xf32>
    %43 = tpu.matmul %42, %40, %cst_29 {dimension_numbers = #tpu.dot_dimension_numbers<[1], [0], [0], [1], [0, 0, 1, 1], [], []>} : vector<8x8xf32>, vector<8x512xf32>, vector<8x512xf32> -> vector<8x512xf32>
    %44 = arith.addf %36, %43 : vector<8x512xf32>
    %c6 = arith.constant 6 : index
    %c0_30 = arith.constant 0 : index
    %45 = vector.load %arg4[%c6, %c0_30] : memref<9x512xf32, #tpu.memory_space<vmem>>, vector<1x512xf32>
    %c497_i32 = arith.constant 497 : i32
    %46 = tpu.dynamic_rotate %1 by %c497_i32 dim 1 : vector<8x512xf32>, i32 -> vector<8x512xf32>
    %47 = vector.broadcast %45 : vector<1x512xf32> to vector<8x512xf32>
    %48 = arith.mulf %46, %47 : vector<8x512xf32>
    %c6_31 = arith.constant 6 : index
    %c0_32 = arith.constant 0 : index
    %c0_33 = arith.constant 0 : index
    %49 = vector.load %arg1[%c6_31, %c0_32, %c0_33] : memref<54x8x8xf32, #tpu.memory_space<vmem>>, vector<1x8x8xf32>
    %50 = vector.shape_cast %49 : vector<1x8x8xf32> to vector<8x8xf32>
    %cst_34 = arith.constant dense<0.000000e+00> : vector<8x512xf32>
    %51 = tpu.matmul %50, %48, %cst_34 {dimension_numbers = #tpu.dot_dimension_numbers<[1], [0], [0], [1], [0, 0, 1, 1], [], []>} : vector<8x8xf32>, vector<8x512xf32>, vector<8x512xf32> -> vector<8x512xf32>
    %52 = arith.addf %44, %51 : vector<8x512xf32>
    %c7 = arith.constant 7 : index
    %c0_35 = arith.constant 0 : index
    %53 = vector.load %arg4[%c7, %c0_35] : memref<9x512xf32, #tpu.memory_space<vmem>>, vector<1x512xf32>
    %c496_i32 = arith.constant 496 : i32
    %54 = tpu.dynamic_rotate %1 by %c496_i32 dim 1 : vector<8x512xf32>, i32 -> vector<8x512xf32>
    %55 = vector.broadcast %53 : vector<1x512xf32> to vector<8x512xf32>
    %56 = arith.mulf %54, %55 : vector<8x512xf32>
    %c7_36 = arith.constant 7 : index
    %c0_37 = arith.constant 0 : index
    %c0_38 = arith.constant 0 : index
    %57 = vector.load %arg1[%c7_36, %c0_37, %c0_38] : memref<54x8x8xf32, #tpu.memory_space<vmem>>, vector<1x8x8xf32>
    %58 = vector.shape_cast %57 : vector<1x8x8xf32> to vector<8x8xf32>
    %cst_39 = arith.constant dense<0.000000e+00> : vector<8x512xf32>
    %59 = tpu.matmul %58, %56, %cst_39 {dimension_numbers = #tpu.dot_dimension_numbers<[1], [0], [0], [1], [0, 0, 1, 1], [], []>} : vector<8x8xf32>, vector<8x512xf32>, vector<8x512xf32> -> vector<8x512xf32>
    %60 = arith.addf %52, %59 : vector<8x512xf32>
    %c8 = arith.constant 8 : index
    %c0_40 = arith.constant 0 : index
    %61 = vector.load %arg4[%c8, %c0_40] : memref<9x512xf32, #tpu.memory_space<vmem>>, vector<1x512xf32>
    %c495_i32 = arith.constant 495 : i32
    %62 = tpu.dynamic_rotate %1 by %c495_i32 dim 1 : vector<8x512xf32>, i32 -> vector<8x512xf32>
    %63 = vector.broadcast %61 : vector<1x512xf32> to vector<8x512xf32>
    %64 = arith.mulf %62, %63 : vector<8x512xf32>
    %c8_41 = arith.constant 8 : index
    %c0_42 = arith.constant 0 : index
    %c0_43 = arith.constant 0 : index
    %65 = vector.load %arg1[%c8_41, %c0_42, %c0_43] : memref<54x8x8xf32, #tpu.memory_space<vmem>>, vector<1x8x8xf32>
    %66 = vector.shape_cast %65 : vector<1x8x8xf32> to vector<8x8xf32>
    %cst_44 = arith.constant dense<0.000000e+00> : vector<8x512xf32>
    %67 = tpu.matmul %66, %64, %cst_44 {dimension_numbers = #tpu.dot_dimension_numbers<[1], [0], [0], [1], [0, 0, 1, 1], [], []>} : vector<8x8xf32>, vector<8x512xf32>, vector<8x512xf32> -> vector<8x512xf32>
    %68 = arith.addf %60, %67 : vector<8x512xf32>
    %cst_45 = arith.constant dense<0.000000e+00> : vector<8x1xf32>
    %69 = tpu.matmul %68, %0, %cst_45 {dimension_numbers = #tpu.dot_dimension_numbers<[1], [0], [0], [1], [0, 0, 1, 1], [], []>} : vector<8x512xf32>, vector<512x1xf32>, vector<8x1xf32> -> vector<8x1xf32>
    %70 = arith.mulf %68, %68 : vector<8x512xf32>
    %cst_46 = arith.constant dense<0.000000e+00> : vector<8x1xf32>
    %71 = tpu.matmul %70, %0, %cst_46 {dimension_numbers = #tpu.dot_dimension_numbers<[1], [0], [0], [1], [0, 0, 1, 1], [], []>} : vector<8x512xf32>, vector<512x1xf32>, vector<8x1xf32> -> vector<8x1xf32>
    %cst_47 = arith.constant 0.001953125 : f32
    %72 = vector.broadcast %cst_47 : f32 to vector<8x1xf32>
    %73 = arith.mulf %69, %72 : vector<8x1xf32>
    %cst_48 = arith.constant 0.001953125 : f32
    %74 = vector.broadcast %cst_48 : f32 to vector<8x1xf32>
    %75 = arith.mulf %71, %74 : vector<8x1xf32>
    %76 = arith.mulf %73, %73 : vector<8x1xf32>
    %77 = arith.subf %75, %76 : vector<8x1xf32>
    %c0_49 = arith.constant 0 : index
    %c0_50 = arith.constant 0 : index
    %c0_51 = arith.constant 0 : index
    %78 = vector.load %arg2[%c0_49, %c0_50, %c0_51] : memref<6x8x1xf32, #tpu.memory_space<vmem>>, vector<1x8x1xf32>
    %79 = vector.shape_cast %78 : vector<1x8x1xf32> to vector<8x1xf32>
    %cst_52 = arith.constant 9.99999974E-6 : f32
    %80 = vector.broadcast %cst_52 : f32 to vector<8x1xf32>
    %81 = arith.addf %77, %80 : vector<8x1xf32>
    %82 = math.rsqrt %81 : vector<8x1xf32>
    %83 = arith.mulf %79, %82 : vector<8x1xf32>
    %c0_53 = arith.constant 0 : index
    %c0_54 = arith.constant 0 : index
    %c0_55 = arith.constant 0 : index
    %84 = vector.load %arg3[%c0_53, %c0_54, %c0_55] : memref<6x8x1xf32, #tpu.memory_space<vmem>>, vector<1x8x1xf32>
    %85 = vector.shape_cast %84 : vector<1x8x1xf32> to vector<8x1xf32>
    %86 = arith.mulf %73, %83 : vector<8x1xf32>
    %87 = arith.subf %85, %86 : vector<8x1xf32>
    %88 = vector.broadcast %83 : vector<8x1xf32> to vector<8x512xf32>
    %89 = arith.mulf %68, %88 : vector<8x512xf32>
    %90 = vector.broadcast %87 : vector<8x1xf32> to vector<8x512xf32>
    %91 = arith.addf %89, %90 : vector<8x512xf32>
    %cst_56 = arith.constant 1.000000e-01 : f32
    %92 = vector.broadcast %cst_56 : f32 to vector<8x512xf32>
    %93 = arith.mulf %92, %91 : vector<8x512xf32>
    %94 = arith.maximumf %91, %93 : vector<8x512xf32>
    %c13 = arith.constant 13 : index
    %c0_57 = arith.constant 0 : index
    %c0_58 = arith.constant 0 : index
    %95 = vector.load %arg1[%c13, %c0_57, %c0_58] : memref<54x8x8xf32, #tpu.memory_space<vmem>>, vector<1x8x8xf32>
    %96 = vector.shape_cast %95 : vector<1x8x8xf32> to vector<8x8xf32>
    %cst_59 = arith.constant dense<0.000000e+00> : vector<8x512xf32>
    %97 = tpu.matmul %96, %94, %cst_59 {dimension_numbers = #tpu.dot_dimension_numbers<[1], [0], [0], [1], [0, 0, 1, 1], [], []>} : vector<8x8xf32>, vector<8x512xf32>, vector<8x512xf32> -> vector<8x512xf32>
    %c0_60 = arith.constant 0 : index
    %c0_61 = arith.constant 0 : index
    %98 = vector.load %arg4[%c0_60, %c0_61] : memref<9x512xf32, #tpu.memory_space<vmem>>, vector<1x512xf32>
    %c17_i32_62 = arith.constant 17 : i32
    %99 = tpu.dynamic_rotate %94 by %c17_i32_62 dim 1 : vector<8x512xf32>, i32 -> vector<8x512xf32>
    %100 = vector.broadcast %98 : vector<1x512xf32> to vector<8x512xf32>
    %101 = arith.mulf %99, %100 : vector<8x512xf32>
    %c9 = arith.constant 9 : index
    %c0_63 = arith.constant 0 : index
    %c0_64 = arith.constant 0 : index
    %102 = vector.load %arg1[%c9, %c0_63, %c0_64] : memref<54x8x8xf32, #tpu.memory_space<vmem>>, vector<1x8x8xf32>
    %103 = vector.shape_cast %102 : vector<1x8x8xf32> to vector<8x8xf32>
    %cst_65 = arith.constant dense<0.000000e+00> : vector<8x512xf32>
    %104 = tpu.matmul %103, %101, %cst_65 {dimension_numbers = #tpu.dot_dimension_numbers<[1], [0], [0], [1], [0, 0, 1, 1], [], []>} : vector<8x8xf32>, vector<8x512xf32>, vector<8x512xf32> -> vector<8x512xf32>
    %105 = arith.addf %97, %104 : vector<8x512xf32>
    %c1_66 = arith.constant 1 : index
    %c0_67 = arith.constant 0 : index
    %106 = vector.load %arg4[%c1_66, %c0_67] : memref<9x512xf32, #tpu.memory_space<vmem>>, vector<1x512xf32>
    %c16_i32_68 = arith.constant 16 : i32
    %107 = tpu.dynamic_rotate %94 by %c16_i32_68 dim 1 : vector<8x512xf32>, i32 -> vector<8x512xf32>
    %108 = vector.broadcast %106 : vector<1x512xf32> to vector<8x512xf32>
    %109 = arith.mulf %107, %108 : vector<8x512xf32>
    %c10 = arith.constant 10 : index
    %c0_69 = arith.constant 0 : index
    %c0_70 = arith.constant 0 : index
    %110 = vector.load %arg1[%c10, %c0_69, %c0_70] : memref<54x8x8xf32, #tpu.memory_space<vmem>>, vector<1x8x8xf32>
    %111 = vector.shape_cast %110 : vector<1x8x8xf32> to vector<8x8xf32>
    %cst_71 = arith.constant dense<0.000000e+00> : vector<8x512xf32>
    %112 = tpu.matmul %111, %109, %cst_71 {dimension_numbers = #tpu.dot_dimension_numbers<[1], [0], [0], [1], [0, 0, 1, 1], [], []>} : vector<8x8xf32>, vector<8x512xf32>, vector<8x512xf32> -> vector<8x512xf32>
    %113 = arith.addf %105, %112 : vector<8x512xf32>
    %c2_72 = arith.constant 2 : index
    %c0_73 = arith.constant 0 : index
    %114 = vector.load %arg4[%c2_72, %c0_73] : memref<9x512xf32, #tpu.memory_space<vmem>>, vector<1x512xf32>
    %c15_i32_74 = arith.constant 15 : i32
    %115 = tpu.dynamic_rotate %94 by %c15_i32_74 dim 1 : vector<8x512xf32>, i32 -> vector<8x512xf32>
    %116 = vector.broadcast %114 : vector<1x512xf32> to vector<8x512xf32>
    %117 = arith.mulf %115, %116 : vector<8x512xf32>
    %c11 = arith.constant 11 : index
    %c0_75 = arith.constant 0 : index
    %c0_76 = arith.constant 0 : index
    %118 = vector.load %arg1[%c11, %c0_75, %c0_76] : memref<54x8x8xf32, #tpu.memory_space<vmem>>, vector<1x8x8xf32>
    %119 = vector.shape_cast %118 : vector<1x8x8xf32> to vector<8x8xf32>
    %cst_77 = arith.constant dense<0.000000e+00> : vector<8x512xf32>
    %120 = tpu.matmul %119, %117, %cst_77 {dimension_numbers = #tpu.dot_dimension_numbers<[1], [0], [0], [1], [0, 0, 1, 1], [], []>} : vector<8x8xf32>, vector<8x512xf32>, vector<8x512xf32> -> vector<8x512xf32>
    %121 = arith.addf %113, %120 : vector<8x512xf32>
    %c3_78 = arith.constant 3 : index
    %c0_79 = arith.constant 0 : index
    %122 = vector.load %arg4[%c3_78, %c0_79] : memref<9x512xf32, #tpu.memory_space<vmem>>, vector<1x512xf32>
    %c1_i32_80 = arith.constant 1 : i32
    %123 = tpu.dynamic_rotate %94 by %c1_i32_80 dim 1 : vector<8x512xf32>, i32 -> vector<8x512xf32>
    %124 = vector.broadcast %122 : vector<1x512xf32> to vector<8x512xf32>
    %125 = arith.mulf %123, %124 : vector<8x512xf32>
    %c12 = arith.constant 12 : index
    %c0_81 = arith.constant 0 : index
    %c0_82 = arith.constant 0 : index
    %126 = vector.load %arg1[%c12, %c0_81, %c0_82] : memref<54x8x8xf32, #tpu.memory_space<vmem>>, vector<1x8x8xf32>
    %127 = vector.shape_cast %126 : vector<1x8x8xf32> to vector<8x8xf32>
    %cst_83 = arith.constant dense<0.000000e+00> : vector<8x512xf32>
    %128 = tpu.matmul %127, %125, %cst_83 {dimension_numbers = #tpu.dot_dimension_numbers<[1], [0], [0], [1], [0, 0, 1, 1], [], []>} : vector<8x8xf32>, vector<8x512xf32>, vector<8x512xf32> -> vector<8x512xf32>
    %129 = arith.addf %121, %128 : vector<8x512xf32>
    %c5_84 = arith.constant 5 : index
    %c0_85 = arith.constant 0 : index
    %130 = vector.load %arg4[%c5_84, %c0_85] : memref<9x512xf32, #tpu.memory_space<vmem>>, vector<1x512xf32>
    %c511_i32_86 = arith.constant 511 : i32
    %131 = tpu.dynamic_rotate %94 by %c511_i32_86 dim 1 : vector<8x512xf32>, i32 -> vector<8x512xf32>
    %132 = vector.broadcast %130 : vector<1x512xf32> to vector<8x512xf32>
    %133 = arith.mulf %131, %132 : vector<8x512xf32>
    %c14 = arith.constant 14 : index
    %c0_87 = arith.constant 0 : index
    %c0_88 = arith.constant 0 : index
    %134 = vector.load %arg1[%c14, %c0_87, %c0_88] : memref<54x8x8xf32, #tpu.memory_space<vmem>>, vector<1x8x8xf32>
    %135 = vector.shape_cast %134 : vector<1x8x8xf32> to vector<8x8xf32>
    %cst_89 = arith.constant dense<0.000000e+00> : vector<8x512xf32>
    %136 = tpu.matmul %135, %133, %cst_89 {dimension_numbers = #tpu.dot_dimension_numbers<[1], [0], [0], [1], [0, 0, 1, 1], [], []>} : vector<8x8xf32>, vector<8x512xf32>, vector<8x512xf32> -> vector<8x512xf32>
    %137 = arith.addf %129, %136 : vector<8x512xf32>
    %c6_90 = arith.constant 6 : index
    %c0_91 = arith.constant 0 : index
    %138 = vector.load %arg4[%c6_90, %c0_91] : memref<9x512xf32, #tpu.memory_space<vmem>>, vector<1x512xf32>
    %c497_i32_92 = arith.constant 497 : i32
    %139 = tpu.dynamic_rotate %94 by %c497_i32_92 dim 1 : vector<8x512xf32>, i32 -> vector<8x512xf32>
    %140 = vector.broadcast %138 : vector<1x512xf32> to vector<8x512xf32>
    %141 = arith.mulf %139, %140 : vector<8x512xf32>
    %c15 = arith.constant 15 : index
    %c0_93 = arith.constant 0 : index
    %c0_94 = arith.constant 0 : index
    %142 = vector.load %arg1[%c15, %c0_93, %c0_94] : memref<54x8x8xf32, #tpu.memory_space<vmem>>, vector<1x8x8xf32>
    %143 = vector.shape_cast %142 : vector<1x8x8xf32> to vector<8x8xf32>
    %cst_95 = arith.constant dense<0.000000e+00> : vector<8x512xf32>
    %144 = tpu.matmul %143, %141, %cst_95 {dimension_numbers = #tpu.dot_dimension_numbers<[1], [0], [0], [1], [0, 0, 1, 1], [], []>} : vector<8x8xf32>, vector<8x512xf32>, vector<8x512xf32> -> vector<8x512xf32>
    %145 = arith.addf %137, %144 : vector<8x512xf32>
    %c7_96 = arith.constant 7 : index
    %c0_97 = arith.constant 0 : index
    %146 = vector.load %arg4[%c7_96, %c0_97] : memref<9x512xf32, #tpu.memory_space<vmem>>, vector<1x512xf32>
    %c496_i32_98 = arith.constant 496 : i32
    %147 = tpu.dynamic_rotate %94 by %c496_i32_98 dim 1 : vector<8x512xf32>, i32 -> vector<8x512xf32>
    %148 = vector.broadcast %146 : vector<1x512xf32> to vector<8x512xf32>
    %149 = arith.mulf %147, %148 : vector<8x512xf32>
    %c16 = arith.constant 16 : index
    %c0_99 = arith.constant 0 : index
    %c0_100 = arith.constant 0 : index
    %150 = vector.load %arg1[%c16, %c0_99, %c0_100] : memref<54x8x8xf32, #tpu.memory_space<vmem>>, vector<1x8x8xf32>
    %151 = vector.shape_cast %150 : vector<1x8x8xf32> to vector<8x8xf32>
    %cst_101 = arith.constant dense<0.000000e+00> : vector<8x512xf32>
    %152 = tpu.matmul %151, %149, %cst_101 {dimension_numbers = #tpu.dot_dimension_numbers<[1], [0], [0], [1], [0, 0, 1, 1], [], []>} : vector<8x8xf32>, vector<8x512xf32>, vector<8x512xf32> -> vector<8x512xf32>
    %153 = arith.addf %145, %152 : vector<8x512xf32>
    %c8_102 = arith.constant 8 : index
    %c0_103 = arith.constant 0 : index
    %154 = vector.load %arg4[%c8_102, %c0_103] : memref<9x512xf32, #tpu.memory_space<vmem>>, vector<1x512xf32>
    %c495_i32_104 = arith.constant 495 : i32
    %155 = tpu.dynamic_rotate %94 by %c495_i32_104 dim 1 : vector<8x512xf32>, i32 -> vector<8x512xf32>
    %156 = vector.broadcast %154 : vector<1x512xf32> to vector<8x512xf32>
    %157 = arith.mulf %155, %156 : vector<8x512xf32>
    %c17 = arith.constant 17 : index
    %c0_105 = arith.constant 0 : index
    %c0_106 = arith.constant 0 : index
    %158 = vector.load %arg1[%c17, %c0_105, %c0_106] : memref<54x8x8xf32, #tpu.memory_space<vmem>>, vector<1x8x8xf32>
    %159 = vector.shape_cast %158 : vector<1x8x8xf32> to vector<8x8xf32>
    %cst_107 = arith.constant dense<0.000000e+00> : vector<8x512xf32>
    %160 = tpu.matmul %159, %157, %cst_107 {dimension_numbers = #tpu.dot_dimension_numbers<[1], [0], [0], [1], [0, 0, 1, 1], [], []>} : vector<8x8xf32>, vector<8x512xf32>, vector<8x512xf32> -> vector<8x512xf32>
    %161 = arith.addf %153, %160 : vector<8x512xf32>
    %cst_108 = arith.constant dense<0.000000e+00> : vector<8x1xf32>
    %162 = tpu.matmul %161, %0, %cst_108 {dimension_numbers = #tpu.dot_dimension_numbers<[1], [0], [0], [1], [0, 0, 1, 1], [], []>} : vector<8x512xf32>, vector<512x1xf32>, vector<8x1xf32> -> vector<8x1xf32>
    %163 = arith.mulf %161, %161 : vector<8x512xf32>
    %cst_109 = arith.constant dense<0.000000e+00> : vector<8x1xf32>
    %164 = tpu.matmul %163, %0, %cst_109 {dimension_numbers = #tpu.dot_dimension_numbers<[1], [0], [0], [1], [0, 0, 1, 1], [], []>} : vector<8x512xf32>, vector<512x1xf32>, vector<8x1xf32> -> vector<8x1xf32>
    %cst_110 = arith.constant 0.001953125 : f32
    %165 = vector.broadcast %cst_110 : f32 to vector<8x1xf32>
    %166 = arith.mulf %162, %165 : vector<8x1xf32>
    %cst_111 = arith.constant 0.001953125 : f32
    %167 = vector.broadcast %cst_111 : f32 to vector<8x1xf32>
    %168 = arith.mulf %164, %167 : vector<8x1xf32>
    %169 = arith.mulf %166, %166 : vector<8x1xf32>
    %170 = arith.subf %168, %169 : vector<8x1xf32>
    %c1_112 = arith.constant 1 : index
    %c0_113 = arith.constant 0 : index
    %c0_114 = arith.constant 0 : index
    %171 = vector.load %arg2[%c1_112, %c0_113, %c0_114] : memref<6x8x1xf32, #tpu.memory_space<vmem>>, vector<1x8x1xf32>
    %172 = vector.shape_cast %171 : vector<1x8x1xf32> to vector<8x1xf32>
    %cst_115 = arith.constant 9.99999974E-6 : f32
    %173 = vector.broadcast %cst_115 : f32 to vector<8x1xf32>
    %174 = arith.addf %170, %173 : vector<8x1xf32>
    %175 = math.rsqrt %174 : vector<8x1xf32>
    %176 = arith.mulf %172, %175 : vector<8x1xf32>
    %c1_116 = arith.constant 1 : index
    %c0_117 = arith.constant 0 : index
    %c0_118 = arith.constant 0 : index
    %177 = vector.load %arg3[%c1_116, %c0_117, %c0_118] : memref<6x8x1xf32, #tpu.memory_space<vmem>>, vector<1x8x1xf32>
    %178 = vector.shape_cast %177 : vector<1x8x1xf32> to vector<8x1xf32>
    %179 = arith.mulf %166, %176 : vector<8x1xf32>
    %180 = arith.subf %178, %179 : vector<8x1xf32>
    %181 = vector.broadcast %176 : vector<8x1xf32> to vector<8x512xf32>
    %182 = arith.mulf %161, %181 : vector<8x512xf32>
    %183 = vector.broadcast %180 : vector<8x1xf32> to vector<8x512xf32>
    %184 = arith.addf %182, %183 : vector<8x512xf32>
    %cst_119 = arith.constant 1.000000e-01 : f32
    %185 = vector.broadcast %cst_119 : f32 to vector<8x512xf32>
    %186 = arith.mulf %185, %184 : vector<8x512xf32>
    %187 = arith.maximumf %184, %186 : vector<8x512xf32>
    %c22 = arith.constant 22 : index
    %c0_120 = arith.constant 0 : index
    %c0_121 = arith.constant 0 : index
    %188 = vector.load %arg1[%c22, %c0_120, %c0_121] : memref<54x8x8xf32, #tpu.memory_space<vmem>>, vector<1x8x8xf32>
    %189 = vector.shape_cast %188 : vector<1x8x8xf32> to vector<8x8xf32>
    %cst_122 = arith.constant dense<0.000000e+00> : vector<8x512xf32>
    %190 = tpu.matmul %189, %187, %cst_122 {dimension_numbers = #tpu.dot_dimension_numbers<[1], [0], [0], [1], [0, 0, 1, 1], [], []>} : vector<8x8xf32>, vector<8x512xf32>, vector<8x512xf32> -> vector<8x512xf32>
    %c0_123 = arith.constant 0 : index
    %c0_124 = arith.constant 0 : index
    %191 = vector.load %arg4[%c0_123, %c0_124] : memref<9x512xf32, #tpu.memory_space<vmem>>, vector<1x512xf32>
    %c17_i32_125 = arith.constant 17 : i32
    %192 = tpu.dynamic_rotate %187 by %c17_i32_125 dim 1 : vector<8x512xf32>, i32 -> vector<8x512xf32>
    %193 = vector.broadcast %191 : vector<1x512xf32> to vector<8x512xf32>
    %194 = arith.mulf %192, %193 : vector<8x512xf32>
    %c18 = arith.constant 18 : index
    %c0_126 = arith.constant 0 : index
    %c0_127 = arith.constant 0 : index
    %195 = vector.load %arg1[%c18, %c0_126, %c0_127] : memref<54x8x8xf32, #tpu.memory_space<vmem>>, vector<1x8x8xf32>
    %196 = vector.shape_cast %195 : vector<1x8x8xf32> to vector<8x8xf32>
    %cst_128 = arith.constant dense<0.000000e+00> : vector<8x512xf32>
    %197 = tpu.matmul %196, %194, %cst_128 {dimension_numbers = #tpu.dot_dimension_numbers<[1], [0], [0], [1], [0, 0, 1, 1], [], []>} : vector<8x8xf32>, vector<8x512xf32>, vector<8x512xf32> -> vector<8x512xf32>
    %198 = arith.addf %190, %197 : vector<8x512xf32>
    %c1_129 = arith.constant 1 : index
    %c0_130 = arith.constant 0 : index
    %199 = vector.load %arg4[%c1_129, %c0_130] : memref<9x512xf32, #tpu.memory_space<vmem>>, vector<1x512xf32>
    %c16_i32_131 = arith.constant 16 : i32
    %200 = tpu.dynamic_rotate %187 by %c16_i32_131 dim 1 : vector<8x512xf32>, i32 -> vector<8x512xf32>
    %201 = vector.broadcast %199 : vector<1x512xf32> to vector<8x512xf32>
    %202 = arith.mulf %200, %201 : vector<8x512xf32>
    %c19 = arith.constant 19 : index
    %c0_132 = arith.constant 0 : index
    %c0_133 = arith.constant 0 : index
    %203 = vector.load %arg1[%c19, %c0_132, %c0_133] : memref<54x8x8xf32, #tpu.memory_space<vmem>>, vector<1x8x8xf32>
    %204 = vector.shape_cast %203 : vector<1x8x8xf32> to vector<8x8xf32>
    %cst_134 = arith.constant dense<0.000000e+00> : vector<8x512xf32>
    %205 = tpu.matmul %204, %202, %cst_134 {dimension_numbers = #tpu.dot_dimension_numbers<[1], [0], [0], [1], [0, 0, 1, 1], [], []>} : vector<8x8xf32>, vector<8x512xf32>, vector<8x512xf32> -> vector<8x512xf32>
    %206 = arith.addf %198, %205 : vector<8x512xf32>
    %c2_135 = arith.constant 2 : index
    %c0_136 = arith.constant 0 : index
    %207 = vector.load %arg4[%c2_135, %c0_136] : memref<9x512xf32, #tpu.memory_space<vmem>>, vector<1x512xf32>
    %c15_i32_137 = arith.constant 15 : i32
    %208 = tpu.dynamic_rotate %187 by %c15_i32_137 dim 1 : vector<8x512xf32>, i32 -> vector<8x512xf32>
    %209 = vector.broadcast %207 : vector<1x512xf32> to vector<8x512xf32>
    %210 = arith.mulf %208, %209 : vector<8x512xf32>
    %c20 = arith.constant 20 : index
    %c0_138 = arith.constant 0 : index
    %c0_139 = arith.constant 0 : index
    %211 = vector.load %arg1[%c20, %c0_138, %c0_139] : memref<54x8x8xf32, #tpu.memory_space<vmem>>, vector<1x8x8xf32>
    %212 = vector.shape_cast %211 : vector<1x8x8xf32> to vector<8x8xf32>
    %cst_140 = arith.constant dense<0.000000e+00> : vector<8x512xf32>
    %213 = tpu.matmul %212, %210, %cst_140 {dimension_numbers = #tpu.dot_dimension_numbers<[1], [0], [0], [1], [0, 0, 1, 1], [], []>} : vector<8x8xf32>, vector<8x512xf32>, vector<8x512xf32> -> vector<8x512xf32>
    %214 = arith.addf %206, %213 : vector<8x512xf32>
    %c3_141 = arith.constant 3 : index
    %c0_142 = arith.constant 0 : index
    %215 = vector.load %arg4[%c3_141, %c0_142] : memref<9x512xf32, #tpu.memory_space<vmem>>, vector<1x512xf32>
    %c1_i32_143 = arith.constant 1 : i32
    %216 = tpu.dynamic_rotate %187 by %c1_i32_143 dim 1 : vector<8x512xf32>, i32 -> vector<8x512xf32>
    %217 = vector.broadcast %215 : vector<1x512xf32> to vector<8x512xf32>
    %218 = arith.mulf %216, %217 : vector<8x512xf32>
    %c21 = arith.constant 21 : index
    %c0_144 = arith.constant 0 : index
    %c0_145 = arith.constant 0 : index
    %219 = vector.load %arg1[%c21, %c0_144, %c0_145] : memref<54x8x8xf32, #tpu.memory_space<vmem>>, vector<1x8x8xf32>
    %220 = vector.shape_cast %219 : vector<1x8x8xf32> to vector<8x8xf32>
    %cst_146 = arith.constant dense<0.000000e+00> : vector<8x512xf32>
    %221 = tpu.matmul %220, %218, %cst_146 {dimension_numbers = #tpu.dot_dimension_numbers<[1], [0], [0], [1], [0, 0, 1, 1], [], []>} : vector<8x8xf32>, vector<8x512xf32>, vector<8x512xf32> -> vector<8x512xf32>
    %222 = arith.addf %214, %221 : vector<8x512xf32>
    %c5_147 = arith.constant 5 : index
    %c0_148 = arith.constant 0 : index
    %223 = vector.load %arg4[%c5_147, %c0_148] : memref<9x512xf32, #tpu.memory_space<vmem>>, vector<1x512xf32>
    %c511_i32_149 = arith.constant 511 : i32
    %224 = tpu.dynamic_rotate %187 by %c511_i32_149 dim 1 : vector<8x512xf32>, i32 -> vector<8x512xf32>
    %225 = vector.broadcast %223 : vector<1x512xf32> to vector<8x512xf32>
    %226 = arith.mulf %224, %225 : vector<8x512xf32>
    %c23 = arith.constant 23 : index
    %c0_150 = arith.constant 0 : index
    %c0_151 = arith.constant 0 : index
    %227 = vector.load %arg1[%c23, %c0_150, %c0_151] : memref<54x8x8xf32, #tpu.memory_space<vmem>>, vector<1x8x8xf32>
    %228 = vector.shape_cast %227 : vector<1x8x8xf32> to vector<8x8xf32>
    %cst_152 = arith.constant dense<0.000000e+00> : vector<8x512xf32>
    %229 = tpu.matmul %228, %226, %cst_152 {dimension_numbers = #tpu.dot_dimension_numbers<[1], [0], [0], [1], [0, 0, 1, 1], [], []>} : vector<8x8xf32>, vector<8x512xf32>, vector<8x512xf32> -> vector<8x512xf32>
    %230 = arith.addf %222, %229 : vector<8x512xf32>
    %c6_153 = arith.constant 6 : index
    %c0_154 = arith.constant 0 : index
    %231 = vector.load %arg4[%c6_153, %c0_154] : memref<9x512xf32, #tpu.memory_space<vmem>>, vector<1x512xf32>
    %c497_i32_155 = arith.constant 497 : i32
    %232 = tpu.dynamic_rotate %187 by %c497_i32_155 dim 1 : vector<8x512xf32>, i32 -> vector<8x512xf32>
    %233 = vector.broadcast %231 : vector<1x512xf32> to vector<8x512xf32>
    %234 = arith.mulf %232, %233 : vector<8x512xf32>
    %c24 = arith.constant 24 : index
    %c0_156 = arith.constant 0 : index
    %c0_157 = arith.constant 0 : index
    %235 = vector.load %arg1[%c24, %c0_156, %c0_157] : memref<54x8x8xf32, #tpu.memory_space<vmem>>, vector<1x8x8xf32>
    %236 = vector.shape_cast %235 : vector<1x8x8xf32> to vector<8x8xf32>
    %cst_158 = arith.constant dense<0.000000e+00> : vector<8x512xf32>
    %237 = tpu.matmul %236, %234, %cst_158 {dimension_numbers = #tpu.dot_dimension_numbers<[1], [0], [0], [1], [0, 0, 1, 1], [], []>} : vector<8x8xf32>, vector<8x512xf32>, vector<8x512xf32> -> vector<8x512xf32>
    %238 = arith.addf %230, %237 : vector<8x512xf32>
    %c7_159 = arith.constant 7 : index
    %c0_160 = arith.constant 0 : index
    %239 = vector.load %arg4[%c7_159, %c0_160] : memref<9x512xf32, #tpu.memory_space<vmem>>, vector<1x512xf32>
    %c496_i32_161 = arith.constant 496 : i32
    %240 = tpu.dynamic_rotate %187 by %c496_i32_161 dim 1 : vector<8x512xf32>, i32 -> vector<8x512xf32>
    %241 = vector.broadcast %239 : vector<1x512xf32> to vector<8x512xf32>
    %242 = arith.mulf %240, %241 : vector<8x512xf32>
    %c25 = arith.constant 25 : index
    %c0_162 = arith.constant 0 : index
    %c0_163 = arith.constant 0 : index
    %243 = vector.load %arg1[%c25, %c0_162, %c0_163] : memref<54x8x8xf32, #tpu.memory_space<vmem>>, vector<1x8x8xf32>
    %244 = vector.shape_cast %243 : vector<1x8x8xf32> to vector<8x8xf32>
    %cst_164 = arith.constant dense<0.000000e+00> : vector<8x512xf32>
    %245 = tpu.matmul %244, %242, %cst_164 {dimension_numbers = #tpu.dot_dimension_numbers<[1], [0], [0], [1], [0, 0, 1, 1], [], []>} : vector<8x8xf32>, vector<8x512xf32>, vector<8x512xf32> -> vector<8x512xf32>
    %246 = arith.addf %238, %245 : vector<8x512xf32>
    %c8_165 = arith.constant 8 : index
    %c0_166 = arith.constant 0 : index
    %247 = vector.load %arg4[%c8_165, %c0_166] : memref<9x512xf32, #tpu.memory_space<vmem>>, vector<1x512xf32>
    %c495_i32_167 = arith.constant 495 : i32
    %248 = tpu.dynamic_rotate %187 by %c495_i32_167 dim 1 : vector<8x512xf32>, i32 -> vector<8x512xf32>
    %249 = vector.broadcast %247 : vector<1x512xf32> to vector<8x512xf32>
    %250 = arith.mulf %248, %249 : vector<8x512xf32>
    %c26 = arith.constant 26 : index
    %c0_168 = arith.constant 0 : index
    %c0_169 = arith.constant 0 : index
    %251 = vector.load %arg1[%c26, %c0_168, %c0_169] : memref<54x8x8xf32, #tpu.memory_space<vmem>>, vector<1x8x8xf32>
    %252 = vector.shape_cast %251 : vector<1x8x8xf32> to vector<8x8xf32>
    %cst_170 = arith.constant dense<0.000000e+00> : vector<8x512xf32>
    %253 = tpu.matmul %252, %250, %cst_170 {dimension_numbers = #tpu.dot_dimension_numbers<[1], [0], [0], [1], [0, 0, 1, 1], [], []>} : vector<8x8xf32>, vector<8x512xf32>, vector<8x512xf32> -> vector<8x512xf32>
    %254 = arith.addf %246, %253 : vector<8x512xf32>
    %cst_171 = arith.constant dense<0.000000e+00> : vector<8x1xf32>
    %255 = tpu.matmul %254, %0, %cst_171 {dimension_numbers = #tpu.dot_dimension_numbers<[1], [0], [0], [1], [0, 0, 1, 1], [], []>} : vector<8x512xf32>, vector<512x1xf32>, vector<8x1xf32> -> vector<8x1xf32>
    %256 = arith.mulf %254, %254 : vector<8x512xf32>
    %cst_172 = arith.constant dense<0.000000e+00> : vector<8x1xf32>
    %257 = tpu.matmul %256, %0, %cst_172 {dimension_numbers = #tpu.dot_dimension_numbers<[1], [0], [0], [1], [0, 0, 1, 1], [], []>} : vector<8x512xf32>, vector<512x1xf32>, vector<8x1xf32> -> vector<8x1xf32>
    %cst_173 = arith.constant 0.001953125 : f32
    %258 = vector.broadcast %cst_173 : f32 to vector<8x1xf32>
    %259 = arith.mulf %255, %258 : vector<8x1xf32>
    %cst_174 = arith.constant 0.001953125 : f32
    %260 = vector.broadcast %cst_174 : f32 to vector<8x1xf32>
    %261 = arith.mulf %257, %260 : vector<8x1xf32>
    %262 = arith.mulf %259, %259 : vector<8x1xf32>
    %263 = arith.subf %261, %262 : vector<8x1xf32>
    %c2_175 = arith.constant 2 : index
    %c0_176 = arith.constant 0 : index
    %c0_177 = arith.constant 0 : index
    %264 = vector.load %arg2[%c2_175, %c0_176, %c0_177] : memref<6x8x1xf32, #tpu.memory_space<vmem>>, vector<1x8x1xf32>
    %265 = vector.shape_cast %264 : vector<1x8x1xf32> to vector<8x1xf32>
    %cst_178 = arith.constant 9.99999974E-6 : f32
    %266 = vector.broadcast %cst_178 : f32 to vector<8x1xf32>
    %267 = arith.addf %263, %266 : vector<8x1xf32>
    %268 = math.rsqrt %267 : vector<8x1xf32>
    %269 = arith.mulf %265, %268 : vector<8x1xf32>
    %c2_179 = arith.constant 2 : index
    %c0_180 = arith.constant 0 : index
    %c0_181 = arith.constant 0 : index
    %270 = vector.load %arg3[%c2_179, %c0_180, %c0_181] : memref<6x8x1xf32, #tpu.memory_space<vmem>>, vector<1x8x1xf32>
    %271 = vector.shape_cast %270 : vector<1x8x1xf32> to vector<8x1xf32>
    %272 = arith.mulf %259, %269 : vector<8x1xf32>
    %273 = arith.subf %271, %272 : vector<8x1xf32>
    %274 = vector.broadcast %269 : vector<8x1xf32> to vector<8x512xf32>
    %275 = arith.mulf %254, %274 : vector<8x512xf32>
    %276 = vector.broadcast %273 : vector<8x1xf32> to vector<8x512xf32>
    %277 = arith.addf %275, %276 : vector<8x512xf32>
    %cst_182 = arith.constant 1.000000e-01 : f32
    %278 = vector.broadcast %cst_182 : f32 to vector<8x512xf32>
    %279 = arith.mulf %278, %277 : vector<8x512xf32>
    %280 = arith.maximumf %277, %279 : vector<8x512xf32>
    %c0_183 = arith.constant 0 : index
    %c0_184 = arith.constant 0 : index
    %281 = vector.load %arg5[%c0_183, %c0_184] : memref<16x512xf32, #tpu.memory_space<vmem>>, vector<8x512xf32>
    tpu.vector_store %arg5[%c0_183, %c0_184], %280 {strides = array<i32>} : memref<16x512xf32, #tpu.memory_space<vmem>>, vector<8x512xf32>,
    %c31 = arith.constant 31 : index
    %c0_185 = arith.constant 0 : index
    %c0_186 = arith.constant 0 : index
    %282 = vector.load %arg1[%c31, %c0_185, %c0_186] : memref<54x8x8xf32, #tpu.memory_space<vmem>>, vector<1x8x8xf32>
    %283 = vector.shape_cast %282 : vector<1x8x8xf32> to vector<8x8xf32>
    %cst_187 = arith.constant dense<0.000000e+00> : vector<8x512xf32>
    %284 = tpu.matmul %283, %280, %cst_187 {dimension_numbers = #tpu.dot_dimension_numbers<[1], [0], [0], [1], [0, 0, 1, 1], [], []>} : vector<8x8xf32>, vector<8x512xf32>, vector<8x512xf32> -> vector<8x512xf32>
    %c0_188 = arith.constant 0 : index
    %c0_189 = arith.constant 0 : index
    %285 = vector.load %arg4[%c0_188, %c0_189] : memref<9x512xf32, #tpu.memory_space<vmem>>, vector<1x512xf32>
    %c17_i32_190 = arith.constant 17 : i32
    %286 = tpu.dynamic_rotate %280 by %c17_i32_190 dim 1 : vector<8x512xf32>, i32 -> vector<8x512xf32>
    %287 = vector.broadcast %285 : vector<1x512xf32> to vector<8x512xf32>
    %288 = arith.mulf %286, %287 : vector<8x512xf32>
    %c27 = arith.constant 27 : index
    %c0_191 = arith.constant 0 : index
    %c0_192 = arith.constant 0 : index
    %289 = vector.load %arg1[%c27, %c0_191, %c0_192] : memref<54x8x8xf32, #tpu.memory_space<vmem>>, vector<1x8x8xf32>
    %290 = vector.shape_cast %289 : vector<1x8x8xf32> to vector<8x8xf32>
    %cst_193 = arith.constant dense<0.000000e+00> : vector<8x512xf32>
    %291 = tpu.matmul %290, %288, %cst_193 {dimension_numbers = #tpu.dot_dimension_numbers<[1], [0], [0], [1], [0, 0, 1, 1], [], []>} : vector<8x8xf32>, vector<8x512xf32>, vector<8x512xf32> -> vector<8x512xf32>
    %292 = arith.addf %284, %291 : vector<8x512xf32>
    %c1_194 = arith.constant 1 : index
    %c0_195 = arith.constant 0 : index
    %293 = vector.load %arg4[%c1_194, %c0_195] : memref<9x512xf32, #tpu.memory_space<vmem>>, vector<1x512xf32>
    %c16_i32_196 = arith.constant 16 : i32
    %294 = tpu.dynamic_rotate %280 by %c16_i32_196 dim 1 : vector<8x512xf32>, i32 -> vector<8x512xf32>
    %295 = vector.broadcast %293 : vector<1x512xf32> to vector<8x512xf32>
    %296 = arith.mulf %294, %295 : vector<8x512xf32>
    %c28 = arith.constant 28 : index
    %c0_197 = arith.constant 0 : index
    %c0_198 = arith.constant 0 : index
    %297 = vector.load %arg1[%c28, %c0_197, %c0_198] : memref<54x8x8xf32, #tpu.memory_space<vmem>>, vector<1x8x8xf32>
    %298 = vector.shape_cast %297 : vector<1x8x8xf32> to vector<8x8xf32>
    %cst_199 = arith.constant dense<0.000000e+00> : vector<8x512xf32>
    %299 = tpu.matmul %298, %296, %cst_199 {dimension_numbers = #tpu.dot_dimension_numbers<[1], [0], [0], [1], [0, 0, 1, 1], [], []>} : vector<8x8xf32>, vector<8x512xf32>, vector<8x512xf32> -> vector<8x512xf32>
    %300 = arith.addf %292, %299 : vector<8x512xf32>
    %c2_200 = arith.constant 2 : index
    %c0_201 = arith.constant 0 : index
    %301 = vector.load %arg4[%c2_200, %c0_201] : memref<9x512xf32, #tpu.memory_space<vmem>>, vector<1x512xf32>
    %c15_i32_202 = arith.constant 15 : i32
    %302 = tpu.dynamic_rotate %280 by %c15_i32_202 dim 1 : vector<8x512xf32>, i32 -> vector<8x512xf32>
    %303 = vector.broadcast %301 : vector<1x512xf32> to vector<8x512xf32>
    %304 = arith.mulf %302, %303 : vector<8x512xf32>
    %c29 = arith.constant 29 : index
    %c0_203 = arith.constant 0 : index
    %c0_204 = arith.constant 0 : index
    %305 = vector.load %arg1[%c29, %c0_203, %c0_204] : memref<54x8x8xf32, #tpu.memory_space<vmem>>, vector<1x8x8xf32>
    %306 = vector.shape_cast %305 : vector<1x8x8xf32> to vector<8x8xf32>
    %cst_205 = arith.constant dense<0.000000e+00> : vector<8x512xf32>
    %307 = tpu.matmul %306, %304, %cst_205 {dimension_numbers = #tpu.dot_dimension_numbers<[1], [0], [0], [1], [0, 0, 1, 1], [], []>} : vector<8x8xf32>, vector<8x512xf32>, vector<8x512xf32> -> vector<8x512xf32>
    %308 = arith.addf %300, %307 : vector<8x512xf32>
    %c3_206 = arith.constant 3 : index
    %c0_207 = arith.constant 0 : index
    %309 = vector.load %arg4[%c3_206, %c0_207] : memref<9x512xf32, #tpu.memory_space<vmem>>, vector<1x512xf32>
    %c1_i32_208 = arith.constant 1 : i32
    %310 = tpu.dynamic_rotate %280 by %c1_i32_208 dim 1 : vector<8x512xf32>, i32 -> vector<8x512xf32>
    %311 = vector.broadcast %309 : vector<1x512xf32> to vector<8x512xf32>
    %312 = arith.mulf %310, %311 : vector<8x512xf32>
    %c30 = arith.constant 30 : index
    %c0_209 = arith.constant 0 : index
    %c0_210 = arith.constant 0 : index
    %313 = vector.load %arg1[%c30, %c0_209, %c0_210] : memref<54x8x8xf32, #tpu.memory_space<vmem>>, vector<1x8x8xf32>
    %314 = vector.shape_cast %313 : vector<1x8x8xf32> to vector<8x8xf32>
    %cst_211 = arith.constant dense<0.000000e+00> : vector<8x512xf32>
    %315 = tpu.matmul %314, %312, %cst_211 {dimension_numbers = #tpu.dot_dimension_numbers<[1], [0], [0], [1], [0, 0, 1, 1], [], []>} : vector<8x8xf32>, vector<8x512xf32>, vector<8x512xf32> -> vector<8x512xf32>
    %316 = arith.addf %308, %315 : vector<8x512xf32>
    %c5_212 = arith.constant 5 : index
    %c0_213 = arith.constant 0 : index
    %317 = vector.load %arg4[%c5_212, %c0_213] : memref<9x512xf32, #tpu.memory_space<vmem>>, vector<1x512xf32>
    %c511_i32_214 = arith.constant 511 : i32
    %318 = tpu.dynamic_rotate %280 by %c511_i32_214 dim 1 : vector<8x512xf32>, i32 -> vector<8x512xf32>
    %319 = vector.broadcast %317 : vector<1x512xf32> to vector<8x512xf32>
    %320 = arith.mulf %318, %319 : vector<8x512xf32>
    %c32 = arith.constant 32 : index
    %c0_215 = arith.constant 0 : index
    %c0_216 = arith.constant 0 : index
    %321 = vector.load %arg1[%c32, %c0_215, %c0_216] : memref<54x8x8xf32, #tpu.memory_space<vmem>>, vector<1x8x8xf32>
    %322 = vector.shape_cast %321 : vector<1x8x8xf32> to vector<8x8xf32>
    %cst_217 = arith.constant dense<0.000000e+00> : vector<8x512xf32>
    %323 = tpu.matmul %322, %320, %cst_217 {dimension_numbers = #tpu.dot_dimension_numbers<[1], [0], [0], [1], [0, 0, 1, 1], [], []>} : vector<8x8xf32>, vector<8x512xf32>, vector<8x512xf32> -> vector<8x512xf32>
    %324 = arith.addf %316, %323 : vector<8x512xf32>
    %c6_218 = arith.constant 6 : index
    %c0_219 = arith.constant 0 : index
    %325 = vector.load %arg4[%c6_218, %c0_219] : memref<9x512xf32, #tpu.memory_space<vmem>>, vector<1x512xf32>
    %c497_i32_220 = arith.constant 497 : i32
    %326 = tpu.dynamic_rotate %280 by %c497_i32_220 dim 1 : vector<8x512xf32>, i32 -> vector<8x512xf32>
    %327 = vector.broadcast %325 : vector<1x512xf32> to vector<8x512xf32>
    %328 = arith.mulf %326, %327 : vector<8x512xf32>
    %c33 = arith.constant 33 : index
    %c0_221 = arith.constant 0 : index
    %c0_222 = arith.constant 0 : index
    %329 = vector.load %arg1[%c33, %c0_221, %c0_222] : memref<54x8x8xf32, #tpu.memory_space<vmem>>, vector<1x8x8xf32>
    %330 = vector.shape_cast %329 : vector<1x8x8xf32> to vector<8x8xf32>
    %cst_223 = arith.constant dense<0.000000e+00> : vector<8x512xf32>
    %331 = tpu.matmul %330, %328, %cst_223 {dimension_numbers = #tpu.dot_dimension_numbers<[1], [0], [0], [1], [0, 0, 1, 1], [], []>} : vector<8x8xf32>, vector<8x512xf32>, vector<8x512xf32> -> vector<8x512xf32>
    %332 = arith.addf %324, %331 : vector<8x512xf32>
    %c7_224 = arith.constant 7 : index
    %c0_225 = arith.constant 0 : index
    %333 = vector.load %arg4[%c7_224, %c0_225] : memref<9x512xf32, #tpu.memory_space<vmem>>, vector<1x512xf32>
    %c496_i32_226 = arith.constant 496 : i32
    %334 = tpu.dynamic_rotate %280 by %c496_i32_226 dim 1 : vector<8x512xf32>, i32 -> vector<8x512xf32>
    %335 = vector.broadcast %333 : vector<1x512xf32> to vector<8x512xf32>
    %336 = arith.mulf %334, %335 : vector<8x512xf32>
    %c34 = arith.constant 34 : index
    %c0_227 = arith.constant 0 : index
    %c0_228 = arith.constant 0 : index
    %337 = vector.load %arg1[%c34, %c0_227, %c0_228] : memref<54x8x8xf32, #tpu.memory_space<vmem>>, vector<1x8x8xf32>
    %338 = vector.shape_cast %337 : vector<1x8x8xf32> to vector<8x8xf32>
    %cst_229 = arith.constant dense<0.000000e+00> : vector<8x512xf32>
    %339 = tpu.matmul %338, %336, %cst_229 {dimension_numbers = #tpu.dot_dimension_numbers<[1], [0], [0], [1], [0, 0, 1, 1], [], []>} : vector<8x8xf32>, vector<8x512xf32>, vector<8x512xf32> -> vector<8x512xf32>
    %340 = arith.addf %332, %339 : vector<8x512xf32>
    %c8_230 = arith.constant 8 : index
    %c0_231 = arith.constant 0 : index
    %341 = vector.load %arg4[%c8_230, %c0_231] : memref<9x512xf32, #tpu.memory_space<vmem>>, vector<1x512xf32>
    %c495_i32_232 = arith.constant 495 : i32
    %342 = tpu.dynamic_rotate %280 by %c495_i32_232 dim 1 : vector<8x512xf32>, i32 -> vector<8x512xf32>
    %343 = vector.broadcast %341 : vector<1x512xf32> to vector<8x512xf32>
    %344 = arith.mulf %342, %343 : vector<8x512xf32>
    %c35 = arith.constant 35 : index
    %c0_233 = arith.constant 0 : index
    %c0_234 = arith.constant 0 : index
    %345 = vector.load %arg1[%c35, %c0_233, %c0_234] : memref<54x8x8xf32, #tpu.memory_space<vmem>>, vector<1x8x8xf32>
    %346 = vector.shape_cast %345 : vector<1x8x8xf32> to vector<8x8xf32>
    %cst_235 = arith.constant dense<0.000000e+00> : vector<8x512xf32>
    %347 = tpu.matmul %346, %344, %cst_235 {dimension_numbers = #tpu.dot_dimension_numbers<[1], [0], [0], [1], [0, 0, 1, 1], [], []>} : vector<8x8xf32>, vector<8x512xf32>, vector<8x512xf32> -> vector<8x512xf32>
    %348 = arith.addf %340, %347 : vector<8x512xf32>
    %cst_236 = arith.constant dense<0.000000e+00> : vector<8x1xf32>
    %349 = tpu.matmul %348, %0, %cst_236 {dimension_numbers = #tpu.dot_dimension_numbers<[1], [0], [0], [1], [0, 0, 1, 1], [], []>} : vector<8x512xf32>, vector<512x1xf32>, vector<8x1xf32> -> vector<8x1xf32>
    %350 = arith.mulf %348, %348 : vector<8x512xf32>
    %cst_237 = arith.constant dense<0.000000e+00> : vector<8x1xf32>
    %351 = tpu.matmul %350, %0, %cst_237 {dimension_numbers = #tpu.dot_dimension_numbers<[1], [0], [0], [1], [0, 0, 1, 1], [], []>} : vector<8x512xf32>, vector<512x1xf32>, vector<8x1xf32> -> vector<8x1xf32>
    %cst_238 = arith.constant 0.001953125 : f32
    %352 = vector.broadcast %cst_238 : f32 to vector<8x1xf32>
    %353 = arith.mulf %349, %352 : vector<8x1xf32>
    %cst_239 = arith.constant 0.001953125 : f32
    %354 = vector.broadcast %cst_239 : f32 to vector<8x1xf32>
    %355 = arith.mulf %351, %354 : vector<8x1xf32>
    %356 = arith.mulf %353, %353 : vector<8x1xf32>
    %357 = arith.subf %355, %356 : vector<8x1xf32>
    %c3_240 = arith.constant 3 : index
    %c0_241 = arith.constant 0 : index
    %c0_242 = arith.constant 0 : index
    %358 = vector.load %arg2[%c3_240, %c0_241, %c0_242] : memref<6x8x1xf32, #tpu.memory_space<vmem>>, vector<1x8x1xf32>
    %359 = vector.shape_cast %358 : vector<1x8x1xf32> to vector<8x1xf32>
    %cst_243 = arith.constant 9.99999974E-6 : f32
    %360 = vector.broadcast %cst_243 : f32 to vector<8x1xf32>
    %361 = arith.addf %357, %360 : vector<8x1xf32>
    %362 = math.rsqrt %361 : vector<8x1xf32>
    %363 = arith.mulf %359, %362 : vector<8x1xf32>
    %c3_244 = arith.constant 3 : index
    %c0_245 = arith.constant 0 : index
    %c0_246 = arith.constant 0 : index
    %364 = vector.load %arg3[%c3_244, %c0_245, %c0_246] : memref<6x8x1xf32, #tpu.memory_space<vmem>>, vector<1x8x1xf32>
    %365 = vector.shape_cast %364 : vector<1x8x1xf32> to vector<8x1xf32>
    %366 = arith.mulf %353, %363 : vector<8x1xf32>
    %367 = arith.subf %365, %366 : vector<8x1xf32>
    %368 = vector.broadcast %363 : vector<8x1xf32> to vector<8x512xf32>
    %369 = arith.mulf %348, %368 : vector<8x512xf32>
    %370 = vector.broadcast %367 : vector<8x1xf32> to vector<8x512xf32>
    %371 = arith.addf %369, %370 : vector<8x512xf32>
    %cst_247 = arith.constant 1.000000e-01 : f32
    %372 = vector.broadcast %cst_247 : f32 to vector<8x512xf32>
    %373 = arith.mulf %372, %371 : vector<8x512xf32>
    %374 = arith.maximumf %371, %373 : vector<8x512xf32>
    %c40 = arith.constant 40 : index
    %c0_248 = arith.constant 0 : index
    %c0_249 = arith.constant 0 : index
    %375 = vector.load %arg1[%c40, %c0_248, %c0_249] : memref<54x8x8xf32, #tpu.memory_space<vmem>>, vector<1x8x8xf32>
    %376 = vector.shape_cast %375 : vector<1x8x8xf32> to vector<8x8xf32>
    %cst_250 = arith.constant dense<0.000000e+00> : vector<8x512xf32>
    %377 = tpu.matmul %376, %374, %cst_250 {dimension_numbers = #tpu.dot_dimension_numbers<[1], [0], [0], [1], [0, 0, 1, 1], [], []>} : vector<8x8xf32>, vector<8x512xf32>, vector<8x512xf32> -> vector<8x512xf32>
    %c0_251 = arith.constant 0 : index
    %c0_252 = arith.constant 0 : index
    %378 = vector.load %arg4[%c0_251, %c0_252] : memref<9x512xf32, #tpu.memory_space<vmem>>, vector<1x512xf32>
    %c17_i32_253 = arith.constant 17 : i32
    %379 = tpu.dynamic_rotate %374 by %c17_i32_253 dim 1 : vector<8x512xf32>, i32 -> vector<8x512xf32>
    %380 = vector.broadcast %378 : vector<1x512xf32> to vector<8x512xf32>
    %381 = arith.mulf %379, %380 : vector<8x512xf32>
    %c36 = arith.constant 36 : index
    %c0_254 = arith.constant 0 : index
    %c0_255 = arith.constant 0 : index
    %382 = vector.load %arg1[%c36, %c0_254, %c0_255] : memref<54x8x8xf32, #tpu.memory_space<vmem>>, vector<1x8x8xf32>
    %383 = vector.shape_cast %382 : vector<1x8x8xf32> to vector<8x8xf32>
    %cst_256 = arith.constant dense<0.000000e+00> : vector<8x512xf32>
    %384 = tpu.matmul %383, %381, %cst_256 {dimension_numbers = #tpu.dot_dimension_numbers<[1], [0], [0], [1], [0, 0, 1, 1], [], []>} : vector<8x8xf32>, vector<8x512xf32>, vector<8x512xf32> -> vector<8x512xf32>
    %385 = arith.addf %377, %384 : vector<8x512xf32>
    %c1_257 = arith.constant 1 : index
    %c0_258 = arith.constant 0 : index
    %386 = vector.load %arg4[%c1_257, %c0_258] : memref<9x512xf32, #tpu.memory_space<vmem>>, vector<1x512xf32>
    %c16_i32_259 = arith.constant 16 : i32
    %387 = tpu.dynamic_rotate %374 by %c16_i32_259 dim 1 : vector<8x512xf32>, i32 -> vector<8x512xf32>
    %388 = vector.broadcast %386 : vector<1x512xf32> to vector<8x512xf32>
    %389 = arith.mulf %387, %388 : vector<8x512xf32>
    %c37 = arith.constant 37 : index
    %c0_260 = arith.constant 0 : index
    %c0_261 = arith.constant 0 : index
    %390 = vector.load %arg1[%c37, %c0_260, %c0_261] : memref<54x8x8xf32, #tpu.memory_space<vmem>>, vector<1x8x8xf32>
    %391 = vector.shape_cast %390 : vector<1x8x8xf32> to vector<8x8xf32>
    %cst_262 = arith.constant dense<0.000000e+00> : vector<8x512xf32>
    %392 = tpu.matmul %391, %389, %cst_262 {dimension_numbers = #tpu.dot_dimension_numbers<[1], [0], [0], [1], [0, 0, 1, 1], [], []>} : vector<8x8xf32>, vector<8x512xf32>, vector<8x512xf32> -> vector<8x512xf32>
    %393 = arith.addf %385, %392 : vector<8x512xf32>
    %c2_263 = arith.constant 2 : index
    %c0_264 = arith.constant 0 : index
    %394 = vector.load %arg4[%c2_263, %c0_264] : memref<9x512xf32, #tpu.memory_space<vmem>>, vector<1x512xf32>
    %c15_i32_265 = arith.constant 15 : i32
    %395 = tpu.dynamic_rotate %374 by %c15_i32_265 dim 1 : vector<8x512xf32>, i32 -> vector<8x512xf32>
    %396 = vector.broadcast %394 : vector<1x512xf32> to vector<8x512xf32>
    %397 = arith.mulf %395, %396 : vector<8x512xf32>
    %c38 = arith.constant 38 : index
    %c0_266 = arith.constant 0 : index
    %c0_267 = arith.constant 0 : index
    %398 = vector.load %arg1[%c38, %c0_266, %c0_267] : memref<54x8x8xf32, #tpu.memory_space<vmem>>, vector<1x8x8xf32>
    %399 = vector.shape_cast %398 : vector<1x8x8xf32> to vector<8x8xf32>
    %cst_268 = arith.constant dense<0.000000e+00> : vector<8x512xf32>
    %400 = tpu.matmul %399, %397, %cst_268 {dimension_numbers = #tpu.dot_dimension_numbers<[1], [0], [0], [1], [0, 0, 1, 1], [], []>} : vector<8x8xf32>, vector<8x512xf32>, vector<8x512xf32> -> vector<8x512xf32>
    %401 = arith.addf %393, %400 : vector<8x512xf32>
    %c3_269 = arith.constant 3 : index
    %c0_270 = arith.constant 0 : index
    %402 = vector.load %arg4[%c3_269, %c0_270] : memref<9x512xf32, #tpu.memory_space<vmem>>, vector<1x512xf32>
    %c1_i32_271 = arith.constant 1 : i32
    %403 = tpu.dynamic_rotate %374 by %c1_i32_271 dim 1 : vector<8x512xf32>, i32 -> vector<8x512xf32>
    %404 = vector.broadcast %402 : vector<1x512xf32> to vector<8x512xf32>
    %405 = arith.mulf %403, %404 : vector<8x512xf32>
    %c39 = arith.constant 39 : index
    %c0_272 = arith.constant 0 : index
    %c0_273 = arith.constant 0 : index
    %406 = vector.load %arg1[%c39, %c0_272, %c0_273] : memref<54x8x8xf32, #tpu.memory_space<vmem>>, vector<1x8x8xf32>
    %407 = vector.shape_cast %406 : vector<1x8x8xf32> to vector<8x8xf32>
    %cst_274 = arith.constant dense<0.000000e+00> : vector<8x512xf32>
    %408 = tpu.matmul %407, %405, %cst_274 {dimension_numbers = #tpu.dot_dimension_numbers<[1], [0], [0], [1], [0, 0, 1, 1], [], []>} : vector<8x8xf32>, vector<8x512xf32>, vector<8x512xf32> -> vector<8x512xf32>
    %409 = arith.addf %401, %408 : vector<8x512xf32>
    %c5_275 = arith.constant 5 : index
    %c0_276 = arith.constant 0 : index
    %410 = vector.load %arg4[%c5_275, %c0_276] : memref<9x512xf32, #tpu.memory_space<vmem>>, vector<1x512xf32>
    %c511_i32_277 = arith.constant 511 : i32
    %411 = tpu.dynamic_rotate %374 by %c511_i32_277 dim 1 : vector<8x512xf32>, i32 -> vector<8x512xf32>
    %412 = vector.broadcast %410 : vector<1x512xf32> to vector<8x512xf32>
    %413 = arith.mulf %411, %412 : vector<8x512xf32>
    %c41 = arith.constant 41 : index
    %c0_278 = arith.constant 0 : index
    %c0_279 = arith.constant 0 : index
    %414 = vector.load %arg1[%c41, %c0_278, %c0_279] : memref<54x8x8xf32, #tpu.memory_space<vmem>>, vector<1x8x8xf32>
    %415 = vector.shape_cast %414 : vector<1x8x8xf32> to vector<8x8xf32>
    %cst_280 = arith.constant dense<0.000000e+00> : vector<8x512xf32>
    %416 = tpu.matmul %415, %413, %cst_280 {dimension_numbers = #tpu.dot_dimension_numbers<[1], [0], [0], [1], [0, 0, 1, 1], [], []>} : vector<8x8xf32>, vector<8x512xf32>, vector<8x512xf32> -> vector<8x512xf32>
    %417 = arith.addf %409, %416 : vector<8x512xf32>
    %c6_281 = arith.constant 6 : index
    %c0_282 = arith.constant 0 : index
    %418 = vector.load %arg4[%c6_281, %c0_282] : memref<9x512xf32, #tpu.memory_space<vmem>>, vector<1x512xf32>
    %c497_i32_283 = arith.constant 497 : i32
    %419 = tpu.dynamic_rotate %374 by %c497_i32_283 dim 1 : vector<8x512xf32>, i32 -> vector<8x512xf32>
    %420 = vector.broadcast %418 : vector<1x512xf32> to vector<8x512xf32>
    %421 = arith.mulf %419, %420 : vector<8x512xf32>
    %c42 = arith.constant 42 : index
    %c0_284 = arith.constant 0 : index
    %c0_285 = arith.constant 0 : index
    %422 = vector.load %arg1[%c42, %c0_284, %c0_285] : memref<54x8x8xf32, #tpu.memory_space<vmem>>, vector<1x8x8xf32>
    %423 = vector.shape_cast %422 : vector<1x8x8xf32> to vector<8x8xf32>
    %cst_286 = arith.constant dense<0.000000e+00> : vector<8x512xf32>
    %424 = tpu.matmul %423, %421, %cst_286 {dimension_numbers = #tpu.dot_dimension_numbers<[1], [0], [0], [1], [0, 0, 1, 1], [], []>} : vector<8x8xf32>, vector<8x512xf32>, vector<8x512xf32> -> vector<8x512xf32>
    %425 = arith.addf %417, %424 : vector<8x512xf32>
    %c7_287 = arith.constant 7 : index
    %c0_288 = arith.constant 0 : index
    %426 = vector.load %arg4[%c7_287, %c0_288] : memref<9x512xf32, #tpu.memory_space<vmem>>, vector<1x512xf32>
    %c496_i32_289 = arith.constant 496 : i32
    %427 = tpu.dynamic_rotate %374 by %c496_i32_289 dim 1 : vector<8x512xf32>, i32 -> vector<8x512xf32>
    %428 = vector.broadcast %426 : vector<1x512xf32> to vector<8x512xf32>
    %429 = arith.mulf %427, %428 : vector<8x512xf32>
    %c43 = arith.constant 43 : index
    %c0_290 = arith.constant 0 : index
    %c0_291 = arith.constant 0 : index
    %430 = vector.load %arg1[%c43, %c0_290, %c0_291] : memref<54x8x8xf32, #tpu.memory_space<vmem>>, vector<1x8x8xf32>
    %431 = vector.shape_cast %430 : vector<1x8x8xf32> to vector<8x8xf32>
    %cst_292 = arith.constant dense<0.000000e+00> : vector<8x512xf32>
    %432 = tpu.matmul %431, %429, %cst_292 {dimension_numbers = #tpu.dot_dimension_numbers<[1], [0], [0], [1], [0, 0, 1, 1], [], []>} : vector<8x8xf32>, vector<8x512xf32>, vector<8x512xf32> -> vector<8x512xf32>
    %433 = arith.addf %425, %432 : vector<8x512xf32>
    %c8_293 = arith.constant 8 : index
    %c0_294 = arith.constant 0 : index
    %434 = vector.load %arg4[%c8_293, %c0_294] : memref<9x512xf32, #tpu.memory_space<vmem>>, vector<1x512xf32>
    %c495_i32_295 = arith.constant 495 : i32
    %435 = tpu.dynamic_rotate %374 by %c495_i32_295 dim 1 : vector<8x512xf32>, i32 -> vector<8x512xf32>
    %436 = vector.broadcast %434 : vector<1x512xf32> to vector<8x512xf32>
    %437 = arith.mulf %435, %436 : vector<8x512xf32>
    %c44 = arith.constant 44 : index
    %c0_296 = arith.constant 0 : index
    %c0_297 = arith.constant 0 : index
    %438 = vector.load %arg1[%c44, %c0_296, %c0_297] : memref<54x8x8xf32, #tpu.memory_space<vmem>>, vector<1x8x8xf32>
    %439 = vector.shape_cast %438 : vector<1x8x8xf32> to vector<8x8xf32>
    %cst_298 = arith.constant dense<0.000000e+00> : vector<8x512xf32>
    %440 = tpu.matmul %439, %437, %cst_298 {dimension_numbers = #tpu.dot_dimension_numbers<[1], [0], [0], [1], [0, 0, 1, 1], [], []>} : vector<8x8xf32>, vector<8x512xf32>, vector<8x512xf32> -> vector<8x512xf32>
    %441 = arith.addf %433, %440 : vector<8x512xf32>
    %cst_299 = arith.constant dense<0.000000e+00> : vector<8x1xf32>
    %442 = tpu.matmul %441, %0, %cst_299 {dimension_numbers = #tpu.dot_dimension_numbers<[1], [0], [0], [1], [0, 0, 1, 1], [], []>} : vector<8x512xf32>, vector<512x1xf32>, vector<8x1xf32> -> vector<8x1xf32>
    %443 = arith.mulf %441, %441 : vector<8x512xf32>
    %cst_300 = arith.constant dense<0.000000e+00> : vector<8x1xf32>
    %444 = tpu.matmul %443, %0, %cst_300 {dimension_numbers = #tpu.dot_dimension_numbers<[1], [0], [0], [1], [0, 0, 1, 1], [], []>} : vector<8x512xf32>, vector<512x1xf32>, vector<8x1xf32> -> vector<8x1xf32>
    %cst_301 = arith.constant 0.001953125 : f32
    %445 = vector.broadcast %cst_301 : f32 to vector<8x1xf32>
    %446 = arith.mulf %442, %445 : vector<8x1xf32>
    %cst_302 = arith.constant 0.001953125 : f32
    %447 = vector.broadcast %cst_302 : f32 to vector<8x1xf32>
    %448 = arith.mulf %444, %447 : vector<8x1xf32>
    %449 = arith.mulf %446, %446 : vector<8x1xf32>
    %450 = arith.subf %448, %449 : vector<8x1xf32>
    %c4_303 = arith.constant 4 : index
    %c0_304 = arith.constant 0 : index
    %c0_305 = arith.constant 0 : index
    %451 = vector.load %arg2[%c4_303, %c0_304, %c0_305] : memref<6x8x1xf32, #tpu.memory_space<vmem>>, vector<1x8x1xf32>
    %452 = vector.shape_cast %451 : vector<1x8x1xf32> to vector<8x1xf32>
    %cst_306 = arith.constant 9.99999974E-6 : f32
    %453 = vector.broadcast %cst_306 : f32 to vector<8x1xf32>
    %454 = arith.addf %450, %453 : vector<8x1xf32>
    %455 = math.rsqrt %454 : vector<8x1xf32>
    %456 = arith.mulf %452, %455 : vector<8x1xf32>
    %c4_307 = arith.constant 4 : index
    %c0_308 = arith.constant 0 : index
    %c0_309 = arith.constant 0 : index
    %457 = vector.load %arg3[%c4_307, %c0_308, %c0_309] : memref<6x8x1xf32, #tpu.memory_space<vmem>>, vector<1x8x1xf32>
    %458 = vector.shape_cast %457 : vector<1x8x1xf32> to vector<8x1xf32>
    %459 = arith.mulf %446, %456 : vector<8x1xf32>
    %460 = arith.subf %458, %459 : vector<8x1xf32>
    %461 = vector.broadcast %456 : vector<8x1xf32> to vector<8x512xf32>
    %462 = arith.mulf %441, %461 : vector<8x512xf32>
    %463 = vector.broadcast %460 : vector<8x1xf32> to vector<8x512xf32>
    %464 = arith.addf %462, %463 : vector<8x512xf32>
    %cst_310 = arith.constant 1.000000e-01 : f32
    %465 = vector.broadcast %cst_310 : f32 to vector<8x512xf32>
    %466 = arith.mulf %465, %464 : vector<8x512xf32>
    %467 = arith.maximumf %464, %466 : vector<8x512xf32>
    %c49 = arith.constant 49 : index
    %c0_311 = arith.constant 0 : index
    %c0_312 = arith.constant 0 : index
    %468 = vector.load %arg1[%c49, %c0_311, %c0_312] : memref<54x8x8xf32, #tpu.memory_space<vmem>>, vector<1x8x8xf32>
    %469 = vector.shape_cast %468 : vector<1x8x8xf32> to vector<8x8xf32>
    %cst_313 = arith.constant dense<0.000000e+00> : vector<8x512xf32>
    %470 = tpu.matmul %469, %467, %cst_313 {dimension_numbers = #tpu.dot_dimension_numbers<[1], [0], [0], [1], [0, 0, 1, 1], [], []>} : vector<8x8xf32>, vector<8x512xf32>, vector<8x512xf32> -> vector<8x512xf32>
    %c0_314 = arith.constant 0 : index
    %c0_315 = arith.constant 0 : index
    %471 = vector.load %arg4[%c0_314, %c0_315] : memref<9x512xf32, #tpu.memory_space<vmem>>, vector<1x512xf32>
    %c17_i32_316 = arith.constant 17 : i32
    %472 = tpu.dynamic_rotate %467 by %c17_i32_316 dim 1 : vector<8x512xf32>, i32 -> vector<8x512xf32>
    %473 = vector.broadcast %471 : vector<1x512xf32> to vector<8x512xf32>
    %474 = arith.mulf %472, %473 : vector<8x512xf32>
    %c45 = arith.constant 45 : index
    %c0_317 = arith.constant 0 : index
    %c0_318 = arith.constant 0 : index
    %475 = vector.load %arg1[%c45, %c0_317, %c0_318] : memref<54x8x8xf32, #tpu.memory_space<vmem>>, vector<1x8x8xf32>
    %476 = vector.shape_cast %475 : vector<1x8x8xf32> to vector<8x8xf32>
    %cst_319 = arith.constant dense<0.000000e+00> : vector<8x512xf32>
    %477 = tpu.matmul %476, %474, %cst_319 {dimension_numbers = #tpu.dot_dimension_numbers<[1], [0], [0], [1], [0, 0, 1, 1], [], []>} : vector<8x8xf32>, vector<8x512xf32>, vector<8x512xf32> -> vector<8x512xf32>
    %478 = arith.addf %470, %477 : vector<8x512xf32>
    %c1_320 = arith.constant 1 : index
    %c0_321 = arith.constant 0 : index
    %479 = vector.load %arg4[%c1_320, %c0_321] : memref<9x512xf32, #tpu.memory_space<vmem>>, vector<1x512xf32>
    %c16_i32_322 = arith.constant 16 : i32
    %480 = tpu.dynamic_rotate %467 by %c16_i32_322 dim 1 : vector<8x512xf32>, i32 -> vector<8x512xf32>
    %481 = vector.broadcast %479 : vector<1x512xf32> to vector<8x512xf32>
    %482 = arith.mulf %480, %481 : vector<8x512xf32>
    %c46 = arith.constant 46 : index
    %c0_323 = arith.constant 0 : index
    %c0_324 = arith.constant 0 : index
    %483 = vector.load %arg1[%c46, %c0_323, %c0_324] : memref<54x8x8xf32, #tpu.memory_space<vmem>>, vector<1x8x8xf32>
    %484 = vector.shape_cast %483 : vector<1x8x8xf32> to vector<8x8xf32>
    %cst_325 = arith.constant dense<0.000000e+00> : vector<8x512xf32>
    %485 = tpu.matmul %484, %482, %cst_325 {dimension_numbers = #tpu.dot_dimension_numbers<[1], [0], [0], [1], [0, 0, 1, 1], [], []>} : vector<8x8xf32>, vector<8x512xf32>, vector<8x512xf32> -> vector<8x512xf32>
    %486 = arith.addf %478, %485 : vector<8x512xf32>
    %c2_326 = arith.constant 2 : index
    %c0_327 = arith.constant 0 : index
    %487 = vector.load %arg4[%c2_326, %c0_327] : memref<9x512xf32, #tpu.memory_space<vmem>>, vector<1x512xf32>
    %c15_i32_328 = arith.constant 15 : i32
    %488 = tpu.dynamic_rotate %467 by %c15_i32_328 dim 1 : vector<8x512xf32>, i32 -> vector<8x512xf32>
    %489 = vector.broadcast %487 : vector<1x512xf32> to vector<8x512xf32>
    %490 = arith.mulf %488, %489 : vector<8x512xf32>
    %c47 = arith.constant 47 : index
    %c0_329 = arith.constant 0 : index
    %c0_330 = arith.constant 0 : index
    %491 = vector.load %arg1[%c47, %c0_329, %c0_330] : memref<54x8x8xf32, #tpu.memory_space<vmem>>, vector<1x8x8xf32>
    %492 = vector.shape_cast %491 : vector<1x8x8xf32> to vector<8x8xf32>
    %cst_331 = arith.constant dense<0.000000e+00> : vector<8x512xf32>
    %493 = tpu.matmul %492, %490, %cst_331 {dimension_numbers = #tpu.dot_dimension_numbers<[1], [0], [0], [1], [0, 0, 1, 1], [], []>} : vector<8x8xf32>, vector<8x512xf32>, vector<8x512xf32> -> vector<8x512xf32>
    %494 = arith.addf %486, %493 : vector<8x512xf32>
    %c3_332 = arith.constant 3 : index
    %c0_333 = arith.constant 0 : index
    %495 = vector.load %arg4[%c3_332, %c0_333] : memref<9x512xf32, #tpu.memory_space<vmem>>, vector<1x512xf32>
    %c1_i32_334 = arith.constant 1 : i32
    %496 = tpu.dynamic_rotate %467 by %c1_i32_334 dim 1 : vector<8x512xf32>, i32 -> vector<8x512xf32>
    %497 = vector.broadcast %495 : vector<1x512xf32> to vector<8x512xf32>
    %498 = arith.mulf %496, %497 : vector<8x512xf32>
    %c48 = arith.constant 48 : index
    %c0_335 = arith.constant 0 : index
    %c0_336 = arith.constant 0 : index
    %499 = vector.load %arg1[%c48, %c0_335, %c0_336] : memref<54x8x8xf32, #tpu.memory_space<vmem>>, vector<1x8x8xf32>
    %500 = vector.shape_cast %499 : vector<1x8x8xf32> to vector<8x8xf32>
    %cst_337 = arith.constant dense<0.000000e+00> : vector<8x512xf32>
    %501 = tpu.matmul %500, %498, %cst_337 {dimension_numbers = #tpu.dot_dimension_numbers<[1], [0], [0], [1], [0, 0, 1, 1], [], []>} : vector<8x8xf32>, vector<8x512xf32>, vector<8x512xf32> -> vector<8x512xf32>
    %502 = arith.addf %494, %501 : vector<8x512xf32>
    %c5_338 = arith.constant 5 : index
    %c0_339 = arith.constant 0 : index
    %503 = vector.load %arg4[%c5_338, %c0_339] : memref<9x512xf32, #tpu.memory_space<vmem>>, vector<1x512xf32>
    %c511_i32_340 = arith.constant 511 : i32
    %504 = tpu.dynamic_rotate %467 by %c511_i32_340 dim 1 : vector<8x512xf32>, i32 -> vector<8x512xf32>
    %505 = vector.broadcast %503 : vector<1x512xf32> to vector<8x512xf32>
    %506 = arith.mulf %504, %505 : vector<8x512xf32>
    %c50 = arith.constant 50 : index
    %c0_341 = arith.constant 0 : index
    %c0_342 = arith.constant 0 : index
    %507 = vector.load %arg1[%c50, %c0_341, %c0_342] : memref<54x8x8xf32, #tpu.memory_space<vmem>>, vector<1x8x8xf32>
    %508 = vector.shape_cast %507 : vector<1x8x8xf32> to vector<8x8xf32>
    %cst_343 = arith.constant dense<0.000000e+00> : vector<8x512xf32>
    %509 = tpu.matmul %508, %506, %cst_343 {dimension_numbers = #tpu.dot_dimension_numbers<[1], [0], [0], [1], [0, 0, 1, 1], [], []>} : vector<8x8xf32>, vector<8x512xf32>, vector<8x512xf32> -> vector<8x512xf32>
    %510 = arith.addf %502, %509 : vector<8x512xf32>
    %c6_344 = arith.constant 6 : index
    %c0_345 = arith.constant 0 : index
    %511 = vector.load %arg4[%c6_344, %c0_345] : memref<9x512xf32, #tpu.memory_space<vmem>>, vector<1x512xf32>
    %c497_i32_346 = arith.constant 497 : i32
    %512 = tpu.dynamic_rotate %467 by %c497_i32_346 dim 1 : vector<8x512xf32>, i32 -> vector<8x512xf32>
    %513 = vector.broadcast %511 : vector<1x512xf32> to vector<8x512xf32>
    %514 = arith.mulf %512, %513 : vector<8x512xf32>
    %c51 = arith.constant 51 : index
    %c0_347 = arith.constant 0 : index
    %c0_348 = arith.constant 0 : index
    %515 = vector.load %arg1[%c51, %c0_347, %c0_348] : memref<54x8x8xf32, #tpu.memory_space<vmem>>, vector<1x8x8xf32>
    %516 = vector.shape_cast %515 : vector<1x8x8xf32> to vector<8x8xf32>
    %cst_349 = arith.constant dense<0.000000e+00> : vector<8x512xf32>
    %517 = tpu.matmul %516, %514, %cst_349 {dimension_numbers = #tpu.dot_dimension_numbers<[1], [0], [0], [1], [0, 0, 1, 1], [], []>} : vector<8x8xf32>, vector<8x512xf32>, vector<8x512xf32> -> vector<8x512xf32>
    %518 = arith.addf %510, %517 : vector<8x512xf32>
    %c7_350 = arith.constant 7 : index
    %c0_351 = arith.constant 0 : index
    %519 = vector.load %arg4[%c7_350, %c0_351] : memref<9x512xf32, #tpu.memory_space<vmem>>, vector<1x512xf32>
    %c496_i32_352 = arith.constant 496 : i32
    %520 = tpu.dynamic_rotate %467 by %c496_i32_352 dim 1 : vector<8x512xf32>, i32 -> vector<8x512xf32>
    %521 = vector.broadcast %519 : vector<1x512xf32> to vector<8x512xf32>
    %522 = arith.mulf %520, %521 : vector<8x512xf32>
    %c52 = arith.constant 52 : index
    %c0_353 = arith.constant 0 : index
    %c0_354 = arith.constant 0 : index
    %523 = vector.load %arg1[%c52, %c0_353, %c0_354] : memref<54x8x8xf32, #tpu.memory_space<vmem>>, vector<1x8x8xf32>
    %524 = vector.shape_cast %523 : vector<1x8x8xf32> to vector<8x8xf32>
    %cst_355 = arith.constant dense<0.000000e+00> : vector<8x512xf32>
    %525 = tpu.matmul %524, %522, %cst_355 {dimension_numbers = #tpu.dot_dimension_numbers<[1], [0], [0], [1], [0, 0, 1, 1], [], []>} : vector<8x8xf32>, vector<8x512xf32>, vector<8x512xf32> -> vector<8x512xf32>
    %526 = arith.addf %518, %525 : vector<8x512xf32>
    %c8_356 = arith.constant 8 : index
    %c0_357 = arith.constant 0 : index
    %527 = vector.load %arg4[%c8_356, %c0_357] : memref<9x512xf32, #tpu.memory_space<vmem>>, vector<1x512xf32>
    %c495_i32_358 = arith.constant 495 : i32
    %528 = tpu.dynamic_rotate %467 by %c495_i32_358 dim 1 : vector<8x512xf32>, i32 -> vector<8x512xf32>
    %529 = vector.broadcast %527 : vector<1x512xf32> to vector<8x512xf32>
    %530 = arith.mulf %528, %529 : vector<8x512xf32>
    %c53 = arith.constant 53 : index
    %c0_359 = arith.constant 0 : index
    %c0_360 = arith.constant 0 : index
    %531 = vector.load %arg1[%c53, %c0_359, %c0_360] : memref<54x8x8xf32, #tpu.memory_space<vmem>>, vector<1x8x8xf32>
    %532 = vector.shape_cast %531 : vector<1x8x8xf32> to vector<8x8xf32>
    %cst_361 = arith.constant dense<0.000000e+00> : vector<8x512xf32>
    %533 = tpu.matmul %532, %530, %cst_361 {dimension_numbers = #tpu.dot_dimension_numbers<[1], [0], [0], [1], [0, 0, 1, 1], [], []>} : vector<8x8xf32>, vector<8x512xf32>, vector<8x512xf32> -> vector<8x512xf32>
    %534 = arith.addf %526, %533 : vector<8x512xf32>
    %cst_362 = arith.constant dense<0.000000e+00> : vector<8x1xf32>
    %535 = tpu.matmul %534, %0, %cst_362 {dimension_numbers = #tpu.dot_dimension_numbers<[1], [0], [0], [1], [0, 0, 1, 1], [], []>} : vector<8x512xf32>, vector<512x1xf32>, vector<8x1xf32> -> vector<8x1xf32>
    %536 = arith.mulf %534, %534 : vector<8x512xf32>
    %cst_363 = arith.constant dense<0.000000e+00> : vector<8x1xf32>
    %537 = tpu.matmul %536, %0, %cst_363 {dimension_numbers = #tpu.dot_dimension_numbers<[1], [0], [0], [1], [0, 0, 1, 1], [], []>} : vector<8x512xf32>, vector<512x1xf32>, vector<8x1xf32> -> vector<8x1xf32>
    %cst_364 = arith.constant 0.001953125 : f32
    %538 = vector.broadcast %cst_364 : f32 to vector<8x1xf32>
    %539 = arith.mulf %535, %538 : vector<8x1xf32>
    %cst_365 = arith.constant 0.001953125 : f32
    %540 = vector.broadcast %cst_365 : f32 to vector<8x1xf32>
    %541 = arith.mulf %537, %540 : vector<8x1xf32>
    %542 = arith.mulf %539, %539 : vector<8x1xf32>
    %543 = arith.subf %541, %542 : vector<8x1xf32>
    %c5_366 = arith.constant 5 : index
    %c0_367 = arith.constant 0 : index
    %c0_368 = arith.constant 0 : index
    %544 = vector.load %arg2[%c5_366, %c0_367, %c0_368] : memref<6x8x1xf32, #tpu.memory_space<vmem>>, vector<1x8x1xf32>
    %545 = vector.shape_cast %544 : vector<1x8x1xf32> to vector<8x1xf32>
    %cst_369 = arith.constant 9.99999974E-6 : f32
    %546 = vector.broadcast %cst_369 : f32 to vector<8x1xf32>
    %547 = arith.addf %543, %546 : vector<8x1xf32>
    %548 = math.rsqrt %547 : vector<8x1xf32>
    %549 = arith.mulf %545, %548 : vector<8x1xf32>
    %c5_370 = arith.constant 5 : index
    %c0_371 = arith.constant 0 : index
    %c0_372 = arith.constant 0 : index
    %550 = vector.load %arg3[%c5_370, %c0_371, %c0_372] : memref<6x8x1xf32, #tpu.memory_space<vmem>>, vector<1x8x1xf32>
    %551 = vector.shape_cast %550 : vector<1x8x1xf32> to vector<8x1xf32>
    %552 = arith.mulf %539, %549 : vector<8x1xf32>
    %553 = arith.subf %551, %552 : vector<8x1xf32>
    %554 = vector.broadcast %549 : vector<8x1xf32> to vector<8x512xf32>
    %555 = arith.mulf %534, %554 : vector<8x512xf32>
    %556 = vector.broadcast %553 : vector<8x1xf32> to vector<8x512xf32>
    %557 = arith.addf %555, %556 : vector<8x512xf32>
    %cst_373 = arith.constant 1.000000e-01 : f32
    %558 = vector.broadcast %cst_373 : f32 to vector<8x512xf32>
    %559 = arith.mulf %558, %557 : vector<8x512xf32>
    %560 = arith.maximumf %557, %559 : vector<8x512xf32>
    %c8_374 = arith.constant 8 : index
    %c0_375 = arith.constant 0 : index
    %561 = vector.load %arg5[%c8_374, %c0_375] : memref<16x512xf32, #tpu.memory_space<vmem>>, vector<8x512xf32>
    tpu.vector_store %arg5[%c8_374, %c0_375], %560 {strides = array<i32>} : memref<16x512xf32, #tpu.memory_space<vmem>>, vector<8x512xf32>,
    return
  }
}

</mosaic_0001>

<bundles_post_ra>
// kernel: tpu_custom_call.1
= control target key start
LH: loop header
LB: loop body
LE: loop exit
PB: predicated region body
PF: predicated region fallthrough
CT: control target
= control target key end

     0   :  { %s7371_s22 = smov 17   ;;  %s9808_s0 = inlined_call_operand.vmem [shape: f32[8,512], index: 0, kind: input, shape index: {}]   ;;  %s9809_s1 = inlined_call_operand.vmem [shape: f32[54,8,8], index: 1, kind: input, shape index: {}]   ;;  %s9810_s2 = inlined_call_operand.vmem [shape: f32[6,8,1], index: 2, kind: input, shape index: {}]   ;;  %s9811_s3 = inlined_call_operand.vmem [shape: f32[6,8,1], index: 3, kind: input, shape index: {}]   ;;  %s9812_s4 = inlined_call_operand.vmem [shape: f32[9,512], index: 4, kind: input, shape index: {}]   ;;  %s9813_s5 = inlined_call_operand.hbm [shape: f32[16,512], index: 5, kind: output, shape index: {}]  }
   0x1   :  { %v7417_v0 = vld [vmem:[%s9808_s0 + $0x18] sm:$0xff]  ;;  %v7422_v1 = vld [vmem:[%s9808_s0 + $0x8] sm:$0xff] }
   0x2   :  { %34 = vrot.lane.b32.xlu1 %v7417_v0, %s7371_s22  ;;  %30 = vrot.lane.b32.xlu0 %v7422_v1, %s7371_s22 }
   0x3   :  { %10 = vsyncpa [#allocation3], 0  ;;  %s7372_s23 = smov 16   ;;  %v7433_v2 = vld [vmem:[%s9808_s0 + $0x10] sm:$0xff]  ;;  %v7438_v3 = vld [vmem:[%s9808_s0] sm:$0xff]  ;;  %s7373_s28 = smov 15   ;;  %v36_v7 = vlaneseq }
   0x4   :  { %228 = vrot.lane.b32.xlu2 %v7422_v1, %s7372_s23  ;;  %s7374_s0 = smov 1   ;;  %s7375_s29 = smov 127   ;;  %v27_v12 = vld [vmem:[%s9812_s4] ss:$8 sm:$0xf]  ;;  %vm57_vm2 = vcmask 64512  }
   0x5   :  { %s7376_s30 = smov 113   ;;  %s7377_s6 = smov 112   ;;  %v7502_v10 = vand.u32 127, %v36_v7  ;;  %v7510_v13 = vperm.slane %v27_v12, 0  ;;  %v7512_v14 = vperm.slane %v27_v12, 1  ;;  %v7514_v15 = vperm.slane %v27_v12, 2 }
   0x6   :  { %s7378_s7 = smov 111   ;;  %v7516_v16 = vperm.slane %v27_v12, 3  ;;  %v7033_v17 = vld [vmem:[%s9812_s4 + $0x1] ss:$8 sm:$0xf]  ;;  %s7012_s18 = sshll.u32 %s9813_s5, 4  ;;  %s7013_s18 = int_to_ptr.hbm [resolvable:$true] %s7012_s18 }
   0x7   :  { %vm38_vm0 = vcmp.lt.s32.totalorder %v7502_v10, 17  ;;  %vm234_vm1 = vcmp.lt.s32.totalorder %v7502_v10, 16  ;;  %v7534_v28 = vperm.slane %v7033_v17, 2  ;;  %v56_v29 = vld [vmem:[%s9809_s1] sm:$0xff]  ;;  %v7549_v33 = vperm.slane %v7033_v17, 3  ;;  %v7034_v55 = vld [vmem:[%s9809_s1 + $0x8] sm:$0xff] }
   0x8   :  { %v7039_v32 = vld [vmem:[%s9812_s4 + $0x2] ss:$8 sm:$0xf]  ;;  %vm351_vm3 = vcmp.lt.s32.totalorder %v7502_v10, 15  ;;  %v7573_v44 = vperm.slane %v7033_v17, 0  ;;  %v7575_v45 = vperm.slane %v7033_v17, 1 }
   0x9   :  { %v7556_v36 = vperm.slane %v7039_v32, 2  ;;  %v7024_v41 = vld [vmem:[%s9809_s1 + $0x20] sm:$0xff]  ;;  %v7577_v46 = vperm.slane %v7039_v32, 3  ;;  %vm468_vm4 = vcmp.lt.s32.totalorder %v7502_v10, 1  ;;  %v7605_v59 = vperm.slane %v7039_v32, 0  ;;  %s7382_s19 = smov 512  }
   0xa   :  { %32 = vrot.lane.b32.xlu0 %v7433_v2, %s7371_s22  ;;  %28 = vrot.lane.b32.xlu1 %v7438_v3, %s7371_s22  ;;  %v7045_v56 = vld [vmem:[%s9812_s4 + $0x3] ss:$8 sm:$0xf]  ;;  %v7607_v60 = vperm.slane %v7039_v32, 1  ;;  %vm585_vm5 = vcmp.lt.s32.totalorder %v7502_v10, 127  ;;  %vm702_vm6 = vcmp.lt.s32.totalorder %v7502_v10, 113 }
   0xb   :  { %v7601_v57 = vperm.slane %v7045_v56, 2  ;;  %v7603_v58 = vperm.slane %v7045_v56, 3  ;;  %v7613_v62 = vperm.slane %v7045_v56, 0  ;;  %v7615_v63 = vperm.slane %v7045_v56, 1  ;;  %s7383_s20 = smov 32  }
   0xc   :  { %230 = vrot.lane.b32.xlu2 %v7433_v2, %s7372_s23  ;;  %v7063_v56 = vld [vmem:[%s9812_s4 + $0x7] ss:$8 sm:$0xf]  ;;  %vm819_vm7 = vcmp.lt.s32.totalorder %v7502_v10, 112  ;;  %vm936_vm8 = vcmp.lt.s32.totalorder %v7502_v10, 111 }
  0x12   :  { %232 = vrot.lane.b32.xlu0 %v7417_v0, %s7372_s23  ;;  %345 = vrot.lane.b32.xlu1 %v7422_v1, %s7373_s28 }
  0x14   :  { %347 = vrot.lane.b32.xlu2 %v7433_v2, %s7373_s28 }
  0x1a   :  { %226 = vrot.lane.b32.xlu0 %v7438_v3, %s7372_s23  ;;  %349 = vrot.lane.b32.xlu1 %v7417_v0, %s7373_s28 }
  0x1c   :  { %462 = vrot.lane.b32.xlu2 %v7422_v1, %s7374_s0 }
  0x22   :  { %464 = vrot.lane.b32.xlu0 %v7433_v2, %s7374_s0  ;;  %343 = vrot.lane.b32.xlu1 %v7438_v3, %s7373_s28 }
  0x24   :  { %466 = vrot.lane.b32.xlu2 %v7417_v0, %s7374_s0 }
  0x2a   :  { %581 = vrot.lane.b32.xlu0 %v7433_v2, %s7375_s29  ;;  %583 = vrot.lane.b32.xlu1 %v7417_v0, %s7375_s29 }
  0x2c   :  { %460 = vrot.lane.b32.xlu2 %v7438_v3, %s7374_s0 }
  0x32   :  { %577 = vrot.lane.b32.xlu0 %v7438_v3, %s7375_s29  ;;  %698 = vrot.lane.b32.xlu1 %v7433_v2, %s7376_s30 }
  0x34   :  { %700 = vrot.lane.b32.xlu2 %v7417_v0, %s7376_s30 }
  0x3a   :  { %579 = vrot.lane.b32.xlu0 %v7422_v1, %s7375_s29  ;;  %694 = vrot.lane.b32.xlu1 %v7438_v3, %s7376_s30 }
  0x3c   :  { %815 = vrot.lane.b32.xlu2 %v7433_v2, %s7377_s6 }
  0x42   :  { %817 = vrot.lane.b32.xlu0 %v7417_v0, %s7377_s6  ;;  %696 = vrot.lane.b32.xlu1 %v7422_v1, %s7376_s30 }
  0x44   :  { %811 = vrot.lane.b32.xlu2 %v7438_v3, %s7377_s6 }
  0x4a   :  { %932 = vrot.lane.b32.xlu0 %v7433_v2, %s7378_s7  ;;  %934 = vrot.lane.b32.xlu1 %v7417_v0, %s7378_s7 }
  0x4c   :  { %813 = vrot.lane.b32.xlu2 %v7422_v1, %s7377_s6 }
  0x52   :  { %928 = vrot.lane.b32.xlu0 %v7438_v3, %s7378_s7  ;;  %930 = vrot.lane.b32.xlu1 %v7422_v1, %s7378_s7 }
  0x5e   :  { %v7498_v4 = vpop.permute.xlu2 %228 }
  0x66   :  { %v231_v5 = vpop.permute.xlu2 %230 }
  0x67   :  { %v236_v31 = vsel %vm234_vm1, %v7498_v4, %v231_v5 }
  0x68   :  { %v250_v34 = vmul.f32 %v7534_v28, %v236_v31 }
  0x6e   :  { %v7500_v6 = vpop.permute.xlu2 %347 }
  0x74   :  { %v35_v8 = vpop.permute.xlu1 %34  ;;  %v31_v9 = vpop.permute.xlu0 %30 }
  0x76   :  { %v7504_v11 = vpop.permute.xlu2 %462 }
  0x7c   :  { %v33_v18 = vpop.permute.xlu0 %32  ;;  %v29_v19 = vpop.permute.xlu1 %28 }
  0x7d   :  { %v42_v20 = vsel %vm38_vm0, %v35_v8, %v29_v19  ;;  %v41_v21 = vsel %vm38_vm0, %v29_v19, %v31_v9  ;;  %v40_v22 = vsel %vm38_vm0, %v31_v9, %v33_v18  ;;  %v39_v23 = vsel %vm38_vm0, %v33_v18, %v35_v8  ;;  %v7040_v18 = vld [vmem:[%s9809_s1 + $0x10] sm:$0xff] }
  0x7e   :  { %v52_v24 = vmul.f32 %v7510_v13, %v42_v20  ;;  %v53_v25 = vmul.f32 %v7512_v14, %v41_v21  ;;  %v54_v26 = vmul.f32 %v7514_v15, %v40_v22  ;;  %v55_v27 = vmul.f32 %v7516_v16, %v39_v23  ;;  %v7539_v30 = vpop.permute.xlu2 %466 }
  0x80   :  { %76 = vmatpush.msra.mxu0 %v52_v24  ;;  %96 = vmatpush.msra.mxu1 %v53_v25 }
  0x81   :  { %116 = vmatpush.msra.mxu2 %v54_v26  ;;  %136 = vmatpush.msra.mxu3 %v55_v27  ;;  %v7046_v27 = vld [vmem:[%s9809_s1 + $0x18] sm:$0xff] }
  0x82   :  { %7025 = vmatmul.msk.f32.vlgmr.msra.gmra.mxu0 %vm57_vm2, %v56_v29  ;;  %7026 = vmatmul.msk.f32.vlgmr.msra.gmra.mxu1 %vm57_vm2, %v56_v29 }
  0x83   :  { %7027 = vmatmul.msk.f32.vlgmr.msra.gmra.mxu2 %vm57_vm2, %v56_v29  ;;  %7028 = vmatmul.msk.f32.vlgmr.msra.gmra.mxu3 %vm57_vm2, %v56_v29  ;;  %v7057_v29 = vld [vmem:[%s9812_s4 + $0x6] ss:$8 sm:$0xf] }
  0x84   :  { %199 = vmatpush.msrb.mxu2 %v7433_v2  ;;  %v233_v35 = vpop.permute.xlu0 %232  ;;  %v346_v37 = vpop.permute.xlu1 %345  ;;  %219 = vmatpush.msrb.mxu3 %v7417_v0  ;;  %v7666_v31 = vperm.slane %v7057_v29, 2 }
  0x85   :  { %v235_v38 = vsel %vm234_vm1, %v231_v5, %v233_v35  ;;  %v353_v39 = vsel %vm351_vm3, %v346_v37, %v7500_v6  ;;  %159 = vmatpush.msrb.mxu0 %v7438_v3  ;;  %179 = vmatpush.msrb.mxu1 %v7422_v1 }
  0x86   :  { %312 = vmatpush.msra.mxu2 %v250_v34  ;;  %v251_v40 = vmul.f32 %v7549_v33, %v235_v38  ;;  %v367_v42 = vmul.f32 %v7556_v36, %v353_v39  ;;  %v461_v43 = vpop.permute.xlu2 %460 }
  0x87   :  { %v471_v0 = vsel %vm468_vm4, %v461_v43, %v7504_v11  ;;  %v472_v1 = vsel %vm468_vm4, %v7539_v30, %v461_v43 }
  0x88   :  { %332 = vmatpush.msra.mxu3 %v251_v40  ;;  %v482_v19 = vmul.f32 %v7613_v62, %v472_v1  ;;  %v483_v20 = vmul.f32 %v7615_v63, %v471_v0  ;;  %v7058_v0 = vld [vmem:[%s9809_s1 + $0x30] sm:$0xff]  ;;  %v7707_v1 = vperm.slane %v7063_v56, 2 }
  0x8a   :  { %7029 = vmatmul.msk.f32.vlgmr.msrb.gmra.mxu0 %vm57_vm2, %v7024_v41  ;;  %7030 = vmatmul.msk.f32.vlgmr.msrb.gmra.mxu1 %vm57_vm2, %v7024_v41  ;;  %9877 = vst [vmem:[#allocation9_spill] sm:$0xff] %v7707_v1 }
  0x8b   :  { %7031 = vmatmul.msk.f32.vlgmr.msrb.gmra.mxu2 %vm57_vm2, %v7024_v41  ;;  %7032 = vmatmul.msk.f32.vlgmr.msrb.gmra.mxu3 %vm57_vm2, %v7024_v41  ;;  %v7052_v41 = vld [vmem:[%s9809_s1 + $0x28] sm:$0xff] }
  0x8c   :  { %v227_v47 = vpop.permute.xlu0 %226  ;;  %v350_v48 = vpop.permute.xlu1 %349  ;;  %429 = vmatpush.msrb.mxu2 %v367_v42 }
  0x8d   :  { %v237_v49 = vsel %vm234_vm1, %v227_v47, %v7498_v4  ;;  %v238_v50 = vsel %vm234_vm1, %v233_v35, %v227_v47  ;;  %v352_v51 = vsel %vm351_vm3, %v7500_v6, %v350_v48  ;;  %v7684_v47 = vperm.slane %v7057_v29, 3 }
  0x8e   :  { %v248_v52 = vmul.f32 %v7573_v44, %v238_v50  ;;  %v249_v53 = vmul.f32 %v7575_v45, %v237_v49  ;;  %v368_v54 = vmul.f32 %v7577_v46, %v352_v51  ;;  %v7611_v61 = vpop.permute.xlu2 %700 }
  0x8f   :  { %9876 = vst [vmem:[#allocation8_spill] sm:$0xff] %v7684_v47 }
  0x90   :  { %272 = vmatpush.msra.mxu0 %v248_v52  ;;  %292 = vmatpush.msra.mxu1 %v249_v53 }
  0x91   :  { %449 = vmatpush.msrb.mxu3 %v368_v54 }
  0x92   :  { %7035 = vmatmul.msk.f32.vlgmr.msra.gmra.mxu0 %vm57_vm2, %v7034_v55  ;;  %7036 = vmatmul.msk.f32.vlgmr.msra.gmra.mxu1 %vm57_vm2, %v7034_v55 }
  0x93   :  { %7037 = vmatmul.msk.f32.vlgmr.msra.gmra.mxu2 %vm57_vm2, %v7034_v55  ;;  %7038 = vmatmul.msk.f32.vlgmr.msra.gmra.mxu3 %vm57_vm2, %v7034_v55 }
  0x94   :  { %v465_v2 = vpop.permute.xlu0 %464  ;;  %v344_v3 = vpop.permute.xlu1 %343 }
  0x95   :  { %v469_v4 = vsel %vm468_vm4, %v465_v2, %v7539_v30  ;;  %v470_v5 = vsel %vm468_vm4, %v7504_v11, %v465_v2  ;;  %v354_v6 = vsel %vm351_vm3, %v344_v3, %v346_v37  ;;  %v355_v7 = vsel %vm351_vm3, %v350_v48, %v344_v3  ;;  %v7051_v11 = vld [vmem:[%s9812_s4 + $0x5] ss:$8 sm:$0xf] }
  0x96   :  { %v484_v8 = vmul.f32 %v7601_v57, %v470_v5  ;;  %v485_v9 = vmul.f32 %v7603_v58, %v469_v4  ;;  %v365_v12 = vmul.f32 %v7605_v59, %v355_v7  ;;  %v366_v17 = vmul.f32 %v7607_v60, %v354_v6  ;;  %v816_v25 = vpop.permute.xlu2 %815 }
  0x97   :  { %v7648_v21 = vperm.slane %v7051_v11, 2  ;;  %v7663_v30 = vperm.slane %v7051_v11, 3  ;;  %v7680_v42 = vperm.slane %v7051_v11, 0  ;;  %v7682_v43 = vperm.slane %v7051_v11, 1 }
  0x98   :  { %389 = vmatpush.msrb.mxu0 %v365_v12  ;;  %409 = vmatpush.msrb.mxu1 %v366_v17  ;;  %v7709_v2 = vperm.slane %v7063_v56, 3  ;;  %v7711_v3 = vperm.slane %v7057_v29, 0  ;;  %v7713_v4 = vperm.slane %v7057_v29, 1  ;;  %v7717_v5 = vperm.slane %v7063_v56, 1  ;;  %v7064_v29 = vld [vmem:[%s9809_s1 + $0x38] sm:$0xff] }
  0x99   :  { %546 = vmatpush.msra.mxu2 %v484_v8  ;;  %566 = vmatpush.msra.mxu3 %v485_v9  ;;  %9873 = vst [vmem:[#allocation5_spill] sm:$0xff] %v7663_v30  ;;  %v7719_v6 = vperm.slane %v7063_v56, 0 }
  0x9a   :  { %7041 = vmatmul.msk.f32.vlgmr.msrb.gmra.mxu0 %vm57_vm2, %v7040_v18  ;;  %7042 = vmatmul.msk.f32.vlgmr.msrb.gmra.mxu1 %vm57_vm2, %v7040_v18  ;;  %9874 = vst [vmem:[#allocation6_spill] sm:$0xff] %v7680_v42 }
  0x9b   :  { %7043 = vmatmul.msk.f32.vlgmr.msrb.gmra.mxu2 %vm57_vm2, %v7040_v18  ;;  %7044 = vmatmul.msk.f32.vlgmr.msrb.gmra.mxu3 %vm57_vm2, %v7040_v18  ;;  %9875 = vst [vmem:[#allocation7_spill] sm:$0xff] %v7682_v43 }
  0x9c   :  { %526 = vmatpush.msra.mxu1 %v483_v20  ;;  %v582_v22 = vpop.permute.xlu0 %581  ;;  %v584_v23 = vpop.permute.xlu1 %583  ;;  %506 = vmatpush.msra.mxu0 %v482_v19  ;;  %9878 = vst [vmem:[#allocation10_spill] sm:$0xff] %v7709_v2 }
  0x9d   :  { %v586_v24 = vsel %vm585_vm5, %v582_v22, %v584_v23  ;;  %9879 = vst [vmem:[#allocation11_spill] sm:$0xff] %v7711_v3 }
  0x9e   :  { %v601_v26 = vmul.f32 %v7648_v21, %v586_v24  ;;  %v812_v40 = vpop.permute.xlu2 %811  ;;  %9880 = vst [vmem:[#allocation12_spill] sm:$0xff] %v7713_v4 }
  0x9f   :  { %9881 = vst [vmem:[#allocation13_spill] sm:$0xff] %v7717_v5 }
  0xa0   :  { %663 = vmatpush.msrb.mxu2 %v601_v26  ;;  %9882 = vst [vmem:[#allocation14_spill] sm:$0xff] %v7719_v6 }
  0xa2   :  { %7047 = vmatmul.msk.f32.vlgmr.msra.gmra.mxu0 %vm57_vm2, %v7046_v27  ;;  %7048 = vmatmul.msk.f32.vlgmr.msra.gmra.mxu1 %vm57_vm2, %v7046_v27 }
  0xa3   :  { %7049 = vmatmul.msk.f32.vlgmr.msra.gmra.mxu2 %vm57_vm2, %v7046_v27  ;;  %7050 = vmatmul.msk.f32.vlgmr.msra.gmra.mxu3 %vm57_vm2, %v7046_v27 }
  0xa4   :  { %v578_v32 = vpop.permute.xlu0 %577  ;;  %v699_v34 = vpop.permute.xlu1 %698 }
  0xa5   :  { %v589_v35 = vsel %vm585_vm5, %v584_v23, %v578_v32  ;;  %v703_v37 = vsel %vm702_vm6, %v699_v34, %v7611_v61 }
  0xa6   :  { %v602_v38 = vmul.f32 %v7663_v30, %v589_v35  ;;  %v718_v39 = vmul.f32 %v7666_v31, %v703_v37 }
  0xa8   :  { %683 = vmatpush.msrb.mxu3 %v602_v38  ;;  %780 = vmatpush.msra.mxu2 %v718_v39  ;;  %v7070_v39 = vld [vmem:[%s9809_s1 + $0x40] sm:$0xff] }
  0xab   :  { %7055 = vmatmul.msk.f32.vlgmr.msrb.gmra.mxu2 %vm57_vm2, %v7052_v41  ;;  %7056 = vmatmul.msk.f32.vlgmr.msrb.gmra.mxu3 %vm57_vm2, %v7052_v41 }
  0xac   :  { %v580_v48 = vpop.permute.xlu0 %579  ;;  %v695_v49 = vpop.permute.xlu1 %694 }
  0xad   :  { %v587_v50 = vsel %vm585_vm5, %v580_v48, %v582_v22  ;;  %v588_v51 = vsel %vm585_vm5, %v578_v32, %v580_v48  ;;  %v706_v52 = vsel %vm702_vm6, %v7611_v61, %v695_v49  ;;  %v814_v61 = vpop.permute.xlu2 %813 }
  0xae   :  { %v599_v53 = vmul.f32 %v7680_v42, %v588_v51  ;;  %v600_v54 = vmul.f32 %v7682_v43, %v587_v50  ;;  %v719_v55 = vmul.f32 %v7684_v47, %v706_v52  ;;  %v821_v7 = vsel %vm819_vm7, %v814_v61, %v816_v25 }
  0xaf   :  { %v822_v8 = vsel %vm819_vm7, %v812_v40, %v814_v61  ;;  %v834_v26 = vmul.f32 %v7717_v5, %v821_v7 }
  0xb0   :  { %623 = vmatpush.msrb.mxu0 %v599_v53  ;;  %643 = vmatpush.msrb.mxu1 %v600_v54  ;;  %v833_v27 = vmul.f32 %v7719_v6, %v822_v8 }
  0xb1   :  { %800 = vmatpush.msra.mxu3 %v719_v55  ;;  %7053 = vmatmul.msk.f32.vlgmr.msrb.gmra.mxu0 %vm57_vm2, %v7052_v41 }
  0xb2   :  { %7054 = vmatmul.msk.f32.vlgmr.msrb.gmra.mxu1 %vm57_vm2, %v7052_v41 }
  0xb3   :  { %7061 = vmatmul.msk.f32.vlgmr.msra.gmra.mxu2 %vm57_vm2, %v7058_v0  ;;  %7062 = vmatmul.msk.f32.vlgmr.msra.gmra.mxu3 %vm57_vm2, %v7058_v0 }
  0xb4   :  { %v818_v9 = vpop.permute.xlu0 %817  ;;  %v697_v12 = vpop.permute.xlu1 %696 }
  0xb5   :  { %v820_v17 = vsel %vm819_vm7, %v816_v25, %v818_v9  ;;  %v823_v18 = vsel %vm819_vm7, %v818_v9, %v812_v40  ;;  %v704_v11 = vsel %vm702_vm6, %v697_v12, %v699_v34  ;;  %v705_v19 = vsel %vm702_vm6, %v695_v49, %v697_v12  ;;  %v7069_v25 = vld [vmem:[%s9812_s4 + $0x20] ss:$8 sm:$0xf] }
  0xb6   :  { %v835_v20 = vmul.f32 %v7707_v1, %v820_v17  ;;  %v836_v22 = vmul.f32 %v7709_v2, %v823_v18  ;;  %v716_v23 = vmul.f32 %v7711_v3, %v705_v19  ;;  %v717_v24 = vmul.f32 %v7713_v4, %v704_v11 }
  0xb7   :  { %v7748_v32 = vperm.slane %v7069_v25, 2  ;;  %v7760_v40 = vperm.slane %v7069_v25, 3  ;;  %v7762_v41 = vperm.slane %v7069_v25, 0  ;;  %v7764_v48 = vperm.slane %v7069_v25, 1 }
  0xb8   :  { %740 = vmatpush.msra.mxu0 %v716_v23  ;;  %760 = vmatpush.msra.mxu1 %v717_v24 }
  0xb9   :  { %897 = vmatpush.msrb.mxu2 %v835_v20  ;;  %917 = vmatpush.msrb.mxu3 %v836_v22  ;;  %9883 = vst [vmem:[#allocation15_spill] sm:$0xff] %v7748_v32 }
  0xba   :  { %7059 = vmatmul.msk.f32.vlgmr.msra.gmra.mxu0 %vm57_vm2, %v7058_v0  ;;  %7060 = vmatmul.msk.f32.vlgmr.msra.gmra.mxu1 %vm57_vm2, %v7058_v0  ;;  %9884 = vst [vmem:[#allocation16_spill] sm:$0xff] %v7760_v40  ;;  %v9822_v0 = vmov 1.0  }
  0xbb   :  { %877 = vmatpush.msrb.mxu1 %v834_v26  ;;  %7067 = vmatmul.msk.f32.vlgmr.msrb.gmra.mxu2 %vm57_vm2, %v7064_v29  ;;  %9885 = vst [vmem:[#allocation17_spill] sm:$0xff] %v7762_v41 }
  0xbc   :  { %7068 = vmatmul.msk.f32.vlgmr.msrb.gmra.mxu3 %vm57_vm2, %v7064_v29  ;;  %v933_v34 = vpop.permute.xlu0 %932  ;;  %v935_v35 = vpop.permute.xlu1 %934  ;;  %857 = vmatpush.msrb.mxu0 %v833_v27  ;;  %9886 = vst [vmem:[#allocation18_spill] sm:$0xff] %v7764_v48 }
  0xbd   :  { %v937_v37 = vsel %vm936_vm8, %v933_v34, %v935_v35 }
  0xbe   :  { %v952_v38 = vmul.f32 %v7748_v32, %v937_v37 }
  0xc0   :  { %1014 = vmatpush.msra.mxu2 %v952_v38 }
  0xc2   :  { %7065 = vmatmul.msk.f32.vlgmr.msrb.gmra.mxu0 %vm57_vm2, %v7064_v29  ;;  %7066 = vmatmul.msk.f32.vlgmr.msrb.gmra.mxu1 %vm57_vm2, %v7064_v29 }
  0xc3   :  { %7073 = vmatmul.msk.f32.vlgmr.msra.gmra.mxu2 %vm57_vm2, %v7070_v39 }
  0xc4   :  { %v929_v49 = vpop.permute.xlu0 %928  ;;  %v931_v50 = vpop.permute.xlu1 %930  ;;  %1083 = vmatpush.msrb.mxu2 %v9822_v0 }
  0xc5   :  { %v940_v51 = vsel %vm936_vm8, %v935_v35, %v929_v49  ;;  %v938_v52 = vsel %vm936_vm8, %v931_v50, %v933_v34  ;;  %v939_v53 = vsel %vm936_vm8, %v929_v49, %v931_v50 }
  0xc6   :  { %v953_v54 = vmul.f32 %v7760_v40, %v940_v51  ;;  %v950_v55 = vmul.f32 %v7762_v41, %v939_v53  ;;  %v951_v56 = vmul.f32 %v7764_v48, %v938_v52  ;;  %1084 = vmatpush.msrb.mxu2 %v9822_v0 }
  0xc8   :  { %974 = vmatpush.msra.mxu0 %v950_v55  ;;  %994 = vmatpush.msra.mxu1 %v951_v56 }
  0xc9   :  { %1034 = vmatpush.msra.mxu3 %v953_v54  ;;  %1085 = vmatpush.msrb.mxu2 %v9822_v0 }
  0xca   :  { %7071 = vmatmul.msk.f32.vlgmr.msra.gmra.mxu0 %vm57_vm2, %v7070_v39  ;;  %7072 = vmatmul.msk.f32.vlgmr.msra.gmra.mxu1 %vm57_vm2, %v7070_v39 }
  0xcb   :  { %7074 = vmatmul.msk.f32.vlgmr.msra.gmra.mxu3 %vm57_vm2, %v7070_v39  ;;  %1043 = vmatpush.msrb.mxu0 %v9822_v0 }
  0xcc   :  { %1063 = vmatpush.msrb.mxu1 %v9822_v0  ;;  %1103 = vmatpush.msrb.mxu3 %v9822_v0 }
  0xcd   :  { %1044 = vmatpush.msrb.mxu0 %v9822_v0  ;;  %1086 = vmatpush.msrb.mxu2 %v9822_v0 }
  0xce   :  { %1064 = vmatpush.msrb.mxu1 %v9822_v0  ;;  %1104 = vmatpush.msrb.mxu3 %v9822_v0 }
  0xcf   :  { %1045 = vmatpush.msrb.mxu0 %v9822_v0  ;;  %1087 = vmatpush.msrb.mxu2 %v9822_v0 }
  0xd0   :  { %1065 = vmatpush.msrb.mxu1 %v9822_v0  ;;  %1105 = vmatpush.msrb.mxu3 %v9822_v0 }
  0xd1   :  { %1046 = vmatpush.msrb.mxu0 %v9822_v0  ;;  %1088 = vmatpush.msrb.mxu2 %v9822_v0 }
  0xd2   :  { %1066 = vmatpush.msrb.mxu1 %v9822_v0  ;;  %1106 = vmatpush.msrb.mxu3 %v9822_v0 }
  0xd3   :  { %1047 = vmatpush.msrb.mxu0 %v9822_v0  ;;  %1089 = vmatpush.msrb.mxu2 %v9822_v0 }
  0xd4   :  { %1067 = vmatpush.msrb.mxu1 %v9822_v0  ;;  %1107 = vmatpush.msrb.mxu3 %v9822_v0 }
  0xd5   :  { %1048 = vmatpush.msrb.mxu0 %v9822_v0  ;;  %1090 = vmatpush.msrb.mxu2 %v9822_v0 }
  0xd6   :  { %1068 = vmatpush.msrb.mxu1 %v9822_v0  ;;  %1108 = vmatpush.msrb.mxu3 %v9822_v0 }
  0xd7   :  { %1049 = vmatpush.msrb.mxu0 %v9822_v0  ;;  %1091 = vmatpush.msrb.mxu2 %v9822_v0 }
  0xd8   :  { %1069 = vmatpush.msrb.mxu1 %v9822_v0  ;;  %1109 = vmatpush.msrb.mxu3 %v9822_v0 }
  0xd9   :  { %1050 = vmatpush.msrb.mxu0 %v9822_v0  ;;  %1092 = vmatpush.msrb.mxu2 %v9822_v0 }
  0xda   :  { %1070 = vmatpush.msrb.mxu1 %v9822_v0  ;;  %1110 = vmatpush.msrb.mxu3 %v9822_v0 }
  0xdb   :  { %1051 = vmatpush.msrb.mxu0 %v9822_v0  ;;  %1093 = vmatpush.msrb.mxu2 %v9822_v0 }
  0xdc   :  { %1071 = vmatpush.msrb.mxu1 %v9822_v0  ;;  %1111 = vmatpush.msrb.mxu3 %v9822_v0 }
  0xdd   :  { %1052 = vmatpush.msrb.mxu0 %v9822_v0  ;;  %1094 = vmatpush.msrb.mxu2 %v9822_v0 }
  0xde   :  { %1072 = vmatpush.msrb.mxu1 %v9822_v0  ;;  %1112 = vmatpush.msrb.mxu3 %v9822_v0 }
  0xdf   :  { %1053 = vmatpush.msrb.mxu0 %v9822_v0  ;;  %1095 = vmatpush.msrb.mxu2 %v9822_v0 }
  0xe0   :  { %1073 = vmatpush.msrb.mxu1 %v9822_v0  ;;  %1113 = vmatpush.msrb.mxu3 %v9822_v0 }
  0xe1   :  { %1054 = vmatpush.msrb.mxu0 %v9822_v0  ;;  %1096 = vmatpush.msrb.mxu2 %v9822_v0 }
  0xe2   :  { %1074 = vmatpush.msrb.mxu1 %v9822_v0  ;;  %1114 = vmatpush.msrb.mxu3 %v9822_v0 }
  0xe3   :  { %1055 = vmatpush.msrb.mxu0 %v9822_v0  ;;  %1097 = vmatpush.msrb.mxu2 %v9822_v0 }
  0xe4   :  { %1075 = vmatpush.msrb.mxu1 %v9822_v0  ;;  %1115 = vmatpush.msrb.mxu3 %v9822_v0 }
  0xe5   :  { %1056 = vmatpush.msrb.mxu0 %v9822_v0  ;;  %1098 = vmatpush.msrb.mxu2 %v9822_v0 }
  0xe6   :  { %1076 = vmatpush.msrb.mxu1 %v9822_v0  ;;  %1116 = vmatpush.msrb.mxu3 %v9822_v0 }
  0xe7   :  { %1057 = vmatpush.msrb.mxu0 %v9822_v0  ;;  %1167 = vmatpush.msra.mxu2 %v9822_v0 }
  0xe8   :  { %1077 = vmatpush.msrb.mxu1 %v9822_v0  ;;  %1117 = vmatpush.msrb.mxu3 %v9822_v0 }
  0xe9   :  { %1058 = vmatpush.msrb.mxu0 %v9822_v0  ;;  %1168 = vmatpush.msra.mxu2 %v9822_v0 }
  0xea   :  { %1078 = vmatpush.msrb.mxu1 %v9822_v0  ;;  %1118 = vmatpush.msrb.mxu3 %v9822_v0 }
  0xeb   :  { %1127 = vmatpush.msra.mxu0 %v9822_v0  ;;  %1169 = vmatpush.msra.mxu2 %v9822_v0 }
  0xec   :  { %1147 = vmatpush.msra.mxu1 %v9822_v0  ;;  %1187 = vmatpush.msra.mxu3 %v9822_v0 }
  0xed   :  { %1128 = vmatpush.msra.mxu0 %v9822_v0  ;;  %1170 = vmatpush.msra.mxu2 %v9822_v0 }
  0xee   :  { %1148 = vmatpush.msra.mxu1 %v9822_v0  ;;  %1188 = vmatpush.msra.mxu3 %v9822_v0 }
  0xef   :  { %1129 = vmatpush.msra.mxu0 %v9822_v0  ;;  %1171 = vmatpush.msra.mxu2 %v9822_v0 }
  0xf0   :  { %1149 = vmatpush.msra.mxu1 %v9822_v0  ;;  %1189 = vmatpush.msra.mxu3 %v9822_v0 }
  0xf1   :  { %1130 = vmatpush.msra.mxu0 %v9822_v0  ;;  %1172 = vmatpush.msra.mxu2 %v9822_v0 }
  0xf2   :  { %1150 = vmatpush.msra.mxu1 %v9822_v0  ;;  %1190 = vmatpush.msra.mxu3 %v9822_v0 }
  0xf3   :  { %1131 = vmatpush.msra.mxu0 %v9822_v0  ;;  %1173 = vmatpush.msra.mxu2 %v9822_v0 }
  0xf4   :  { %1151 = vmatpush.msra.mxu1 %v9822_v0  ;;  %1191 = vmatpush.msra.mxu3 %v9822_v0 }
  0xf5   :  { %1132 = vmatpush.msra.mxu0 %v9822_v0  ;;  %1174 = vmatpush.msra.mxu2 %v9822_v0 }
  0xf6   :  { %1152 = vmatpush.msra.mxu1 %v9822_v0  ;;  %1192 = vmatpush.msra.mxu3 %v9822_v0 }
  0xf7   :  { %1133 = vmatpush.msra.mxu0 %v9822_v0  ;;  %1175 = vmatpush.msra.mxu2 %v9822_v0 }
  0xf8   :  { %1153 = vmatpush.msra.mxu1 %v9822_v0  ;;  %1193 = vmatpush.msra.mxu3 %v9822_v0 }
  0xf9   :  { %1134 = vmatpush.msra.mxu0 %v9822_v0  ;;  %1176 = vmatpush.msra.mxu2 %v9822_v0 }
  0xfa   :  { %1154 = vmatpush.msra.mxu1 %v9822_v0  ;;  %1194 = vmatpush.msra.mxu3 %v9822_v0 }
  0xfb   :  { %1135 = vmatpush.msra.mxu0 %v9822_v0  ;;  %1177 = vmatpush.msra.mxu2 %v9822_v0 }
  0xfc   :  { %1155 = vmatpush.msra.mxu1 %v9822_v0  ;;  %1195 = vmatpush.msra.mxu3 %v9822_v0 }
  0xfd   :  { %1136 = vmatpush.msra.mxu0 %v9822_v0  ;;  %1178 = vmatpush.msra.mxu2 %v9822_v0 }
  0xfe   :  { %1156 = vmatpush.msra.mxu1 %v9822_v0  ;;  %1196 = vmatpush.msra.mxu3 %v9822_v0 }
  0xff   :  { %v7807_v61 = vpop.f32.mrf.mxu0  ;;  %v7809_v7 = vpop.f32.mrf.mxu1  ;;  %1137 = vmatpush.msra.mxu0 %v9822_v0  ;;  %1179 = vmatpush.msra.mxu2 %v9822_v0 }
 0x100   :  { %1157 = vmatpush.msra.mxu1 %v9822_v0  ;;  %1197 = vmatpush.msra.mxu3 %v9822_v0 }
 0x101   :  { %1138 = vmatpush.msra.mxu0 %v9822_v0  ;;  %1180 = vmatpush.msra.mxu2 %v9822_v0 }
 0x102   :  { %1158 = vmatpush.msra.mxu1 %v9822_v0  ;;  %1198 = vmatpush.msra.mxu3 %v9822_v0 }
 0x103   :  { %1139 = vmatpush.msra.mxu0 %v9822_v0  ;;  %1181 = vmatpush.msra.mxu2 %v9822_v0 }
 0x104   :  { %1159 = vmatpush.msra.mxu1 %v9822_v0  ;;  %1199 = vmatpush.msra.mxu3 %v9822_v0 }
 0x105   :  { %1140 = vmatpush.msra.mxu0 %v9822_v0  ;;  %1182 = vmatpush.msra.mxu2 %v9822_v0 }
 0x106   :  { %v7825_v8 = vpop.f32.mrf.mxu2  ;;  %v7827_v9 = vpop.f32.mrf.mxu3  ;;  %1160 = vmatpush.msra.mxu1 %v9822_v0  ;;  %1200 = vmatpush.msra.mxu3 %v9822_v0 }
 0x107   :  { %v7835_v12 = vpop.f32.mrf.mxu0  ;;  %v7837_v17 = vpop.f32.mrf.mxu1  ;;  %1141 = vmatpush.msra.mxu0 %v9822_v0 }
 0x108   :  { %1161 = vmatpush.msra.mxu1 %v9822_v0  ;;  %1201 = vmatpush.msra.mxu3 %v9822_v0  ;;  %v162_v54 = vadd.f32 %v7835_v12, %v7807_v61  ;;  %v182_v55 = vadd.f32 %v7837_v17, %v7809_v7 }
 0x109   :  { %1142 = vmatpush.msra.mxu0 %v9822_v0 }
 0x10a   :  { %1162 = vmatpush.msra.mxu1 %v9822_v0  ;;  %1202 = vmatpush.msra.mxu3 %v9822_v0 }
 0x10e   :  { %v7849_v18 = vpop.f32.mrf.mxu2  ;;  %v7851_v11 = vpop.f32.mrf.mxu3 }
 0x10f   :  { %v7863_v19 = vpop.f32.mrf.mxu0  ;;  %v7865_v20 = vpop.f32.mrf.mxu1  ;;  %v202_v56 = vadd.f32 %v7849_v18, %v7825_v8  ;;  %v222_v8 = vadd.f32 %v7851_v11, %v7827_v9 }
 0x110   :  { %v337_v41 = vadd.f32 %v7863_v19, %v162_v54  ;;  %v338_v6 = vadd.f32 %v7865_v20, %v182_v55 }
 0x116   :  { %v7873_v22 = vpop.f32.mrf.mxu2  ;;  %v7875_v23 = vpop.f32.mrf.mxu3 }
 0x117   :  { %v7891_v24 = vpop.f32.mrf.mxu0  ;;  %v7893_v26 = vpop.f32.mrf.mxu1  ;;  %v339_v48 = vadd.f32 %v7873_v22, %v202_v56  ;;  %v340_v19 = vadd.f32 %v7875_v23, %v222_v8 }
 0x118   :  { %v454_v40 = vadd.f32 %v7891_v24, %v337_v41  ;;  %v455_v32 = vadd.f32 %v7893_v26, %v338_v6 }
 0x11e   :  { %v431_v25 = vpop.f32.mrf.mxu2  ;;  %v7897_v27 = vpop.f32.mrf.mxu3 }
 0x11f   :  { %v508_v34 = vpop.f32.mrf.mxu0  ;;  %v528_v35 = vpop.f32.mrf.mxu1  ;;  %v456_v0 = vadd.f32 %v431_v25, %v339_v48  ;;  %v457_v41 = vadd.f32 %v7897_v27, %v340_v19 }
 0x120   :  { %v571_v1 = vadd.f32 %v508_v34, %v454_v40  ;;  %v572_v17 = vadd.f32 %v528_v35, %v455_v32 }
 0x126   :  { %v548_v29 = vpop.f32.mrf.mxu2  ;;  %v568_v37 = vpop.f32.mrf.mxu3 }
 0x127   :  { %v573_v61 = vadd.f32 %v548_v29, %v456_v0  ;;  %v574_v40 = vadd.f32 %v568_v37, %v457_v41 }
 0x12e   :  { %v665_v38 = vpop.f32.mrf.mxu2  ;;  %v625_v39 = vpop.f32.mrf.mxu0 }
 0x12f   :  { %v645_v49 = vpop.f32.mrf.mxu1  ;;  %v685_v50 = vpop.f32.mrf.mxu3  ;;  %v690_v18 = vadd.f32 %v665_v38, %v573_v61  ;;  %v688_v22 = vadd.f32 %v625_v39, %v571_v1 }
 0x130   :  { %v689_v54 = vadd.f32 %v645_v49, %v572_v17  ;;  %v691_v11 = vadd.f32 %v685_v50, %v574_v40 }
 0x136   :  { %v782_v51 = vpop.f32.mrf.mxu2 }
 0x137   :  { %v742_v52 = vpop.f32.mrf.mxu0  ;;  %v762_v53 = vpop.f32.mrf.mxu1  ;;  %v807_v20 = vadd.f32 %v782_v51, %v690_v18 }
 0x138   :  { %v802_v5 = vpop.f32.mrf.mxu3  ;;  %v805_v48 = vadd.f32 %v742_v52, %v688_v22  ;;  %v806_v24 = vadd.f32 %v762_v53, %v689_v54  ;;  %v7380_v53 = vmov 0  }
 0x139   :  { %v808_v27 = vadd.f32 %v802_v5, %v691_v11  ;;  %7330 = vset.pattern.permute.xlu2 %v7380_v53  ;;  %7331 = vset.pattern.permute.xlu0 %v7380_v53 }
 0x13a   :  { %7332 = vset.pattern.permute.xlu1 %v7380_v53 }
 0x13e   :  { %v899_v2 = vpop.f32.mrf.mxu2 }
 0x13f   :  { %v859_v12 = vpop.f32.mrf.mxu0  ;;  %v879_v7 = vpop.f32.mrf.mxu1  ;;  %v924_v25 = vadd.f32 %v899_v2, %v807_v20 }
 0x140   :  { %v919_v6 = vpop.f32.mrf.mxu3  ;;  %v922_v0 = vadd.f32 %v859_v12, %v805_v48  ;;  %v923_v29 = vadd.f32 %v879_v7, %v806_v24 }
 0x141   :  { %v925_v2 = vadd.f32 %v919_v6, %v808_v27 }
 0x146   :  { %v1016_v26 = vpop.f32.mrf.mxu2 }
 0x147   :  { %v7952_v34 = vadd.f32 %v1016_v26, %v924_v25  ;;  %v976_v9 = vpop.f32.mrf.mxu0  ;;  %v996_v1 = vpop.f32.mrf.mxu1 }
 0x148   :  { %v7954_v32 = vadd.f32 %v976_v9, %v922_v0  ;;  %v1040_v23 = vadd.f32 %v996_v1, %v923_v29  ;;  %v1211_v9 = vld [vmem:[%s9810_s2] sm:$0xff] }
 0x149   :  { %1099 = vmatmul.f32.vlgmr.msrb.gmra.mxu2 %v7952_v34  ;;  %v1125_v37 = vmul.f32 %v7952_v34, %v7952_v34 }
 0x14a   :  { %1059 = vmatmul.f32.vlgmr.msrb.gmra.mxu0 %v7954_v32  ;;  %1079 = vmatmul.f32.vlgmr.msrb.gmra.mxu1 %v1040_v23  ;;  %v1123_v39 = vmul.f32 %v7954_v32, %v7954_v32  ;;  %v1124_v49 = vmul.f32 %v1040_v23, %v1040_v23 }
 0x14e   :  { %v1036_v35 = vpop.f32.mrf.mxu3 }
 0x14f   :  { %v1042_v38 = vadd.f32 %v1036_v35, %v925_v2  ;;  %v1224_v2 = vld [vmem:[%s9811_s3] sm:$0xff] }
 0x151   :  { %1119 = vmatmul.f32.vlgmr.msrb.gmra.mxu3 %v1042_v38  ;;  %1183 = vmatmul.f32.vlgmr.msra.gmra.mxu2 %v1125_v37  ;;  %v1126_v50 = vmul.f32 %v1042_v38, %v1042_v38 }
 0x152   :  { %1143 = vmatmul.f32.vlgmr.msra.gmra.mxu0 %v1123_v39  ;;  %1163 = vmatmul.f32.vlgmr.msra.gmra.mxu1 %v1124_v49 }
 0x159   :  { %1203 = vmatmul.f32.vlgmr.msra.gmra.mxu3 %v1126_v50 }
 0x1c7   :  { %v1060_v51 = vpop.f32.mrf.mxu0  ;;  %v1080_v52 = vpop.f32.mrf.mxu1 }
 0x1c8   :  { %v1081_v55 = vadd.f32 %v1080_v52, %v1060_v51 }
 0x1cc   :  { %v1100_v5 = vpop.f32.mrf.mxu2 }
 0x1cd   :  { %v1101_v61 = vadd.f32 %v1100_v5, %v1081_v55 }
 0x1cf   :  { %v1144_v12 = vpop.f32.mrf.mxu0  ;;  %v1164_v7 = vpop.f32.mrf.mxu1 }
 0x1d0   :  { %v1165_v18 = vadd.f32 %v1164_v7, %v1144_v12 }
 0x1d4   :  { %v1120_v56 = vpop.f32.mrf.mxu3  ;;  %v1184_v17 = vpop.f32.mrf.mxu2 }
 0x1d5   :  { %v1121_v8 = vadd.f32 %v1120_v56, %v1101_v61  ;;  %v1185_v19 = vadd.f32 %v1184_v17, %v1165_v18 }
 0x1d7   :  { %v1207_v22 = vmul.f32 0.001953125, %v1121_v8 }
 0x1d9   :  { %v1209_v48 = vmul.f32 %v1207_v22, %v1207_v22 }
 0x1dc   :  { %v1204_v54 = vpop.f32.mrf.mxu3 }
 0x1dd   :  { %v1205_v20 = vadd.f32 %v1204_v54, %v1185_v19 }
 0x1df   :  { %v1208_v41 = vmul.f32 0.001953125, %v1205_v20 }
 0x1e1   :  { %v1210_v24 = vsub.f32 %v1208_v41, %v1209_v48 }
 0x1e3   :  { %v1212_v25 = vadd.f32 1e-05, %v1210_v24 }
 0x1e5   :  { %7333 = vrsqrt.f32 %v1212_v25  ;;  %vm1219_vm10 = vweird.f32 %v1212_v25 }
 0x1eb   :  { %v7334_v6 = vpop.eup %7333 }
 0x1ec   :  { %v1214_v0 = vmul.f32 %v7334_v6, %v1212_v25  ;;  %vm1220_vm9 = vweird.f32 %v7334_v6 }
 0x1ed   :  { %vm1221_vm11 = vmor %vm1219_vm10, %vm1220_vm9 }
 0x1ee   :  { %v1215_v26 = vmul.f32 %v7334_v6, %v1214_v0 }
 0x1f0   :  { %v1216_v40 = vmul.f32 0.5, %v1215_v26  ;;  %v7076_v26 = vld [vmem:[%s9809_s1 + $0x48] sm:$0xff] }
 0x1f2   :  { %v1217_v29 = vsub.f32 1.5, %v1216_v40 }
 0x1f4   :  { %v1218_v1 = vmul.f32 %v7334_v6, %v1217_v29 }
 0x1f6   :  { %v1222_v11 = vsel %vm1221_vm11, %v7334_v6, %v1218_v1 }
 0x1f7   :  { %v1223_v27 = vmul.f32 %v1222_v11, %v1211_v9 }
 0x1f9   :  { %1229 = vperm.xlu2 %7330, %v1223_v27   ;;  %v1225_v35 = vmul.f32 %v1223_v27, %v1207_v22 }
 0x1fb   :  { %v1226_v37 = vsub.f32 %v1224_v2, %v1225_v35 }
 0x1fd   :  { %1238 = vperm.xlu0 %7331, %v1226_v37   ;;  %v7075_v37 = vld [vmem:[%s9809_s1 + $0x68] sm:$0xff] }
 0x253   :  { %v1230_v39 = vpop.permute.xlu2 %1229 }
 0x254   :  { %v1233_v49 = vmul.f32 %v1230_v39, %v1040_v23  ;;  %v1234_v50 = vmul.f32 %v1230_v39, %v7952_v34  ;;  %v1232_v53 = vmul.f32 %v1230_v39, %v7954_v32  ;;  %v1235_v61 = vmul.f32 %v1230_v39, %v1042_v38 }
 0x26f   :  { %v1239_v51 = vpop.permute.xlu0 %1238 }
 0x270   :  { %v1242_v52 = vadd.f32 %v1239_v51, %v1233_v49  ;;  %v1243_v5 = vadd.f32 %v1239_v51, %v1234_v50  ;;  %v1241_v12 = vadd.f32 %v1239_v51, %v1232_v53  ;;  %v1244_v17 = vadd.f32 %v1239_v51, %v1235_v61 }
 0x272   :  { %v1246_v55 = vmul.f32 0.1, %v1242_v52  ;;  %v1247_v56 = vmul.f32 0.1, %v1243_v5  ;;  %v1245_v23 = vmul.f32 0.1, %v1241_v12 }
 0x273   :  { %v1248_v34 = vmul.f32 0.1, %v1244_v17 }
 0x274   :  { %v1250_v7 = vmax.f32 %v1242_v52, %v1246_v55  ;;  %v1251_v8 = vmax.f32 %v1243_v5, %v1247_v56  ;;  %v7973_v18 = vmax.f32 %v1241_v12, %v1245_v23  ;;  %v7085_v56 = vld [vmem:[%s9809_s1 + $0x50] sm:$0xff] }
 0x275   :  { %v7975_v22 = vmax.f32 %v1244_v17, %v1248_v34 }
 0x276   :  { %1259 = vrot.lane.b32.xlu2 %v1251_v8, %s7371_s22  ;;  %1441 = vrot.lane.b32.xlu0 %v1250_v7, %s7372_s23 }
 0x277   :  { %1257 = vrot.lane.b32.xlu1 %v1250_v7, %s7371_s22 }
 0x27e   :  { %1546 = vrot.lane.b32.xlu0 %v1250_v7, %s7373_s28  ;;  %1255 = vrot.lane.b32.xlu2 %v7973_v18, %s7371_s22 }
 0x27f   :  { %1261 = vrot.lane.b32.xlu1 %v7975_v22, %s7371_s22 }
 0x286   :  { %1550 = vrot.lane.b32.xlu0 %v7975_v22, %s7373_s28  ;;  %1445 = vrot.lane.b32.xlu2 %v7975_v22, %s7372_s23 }
 0x287   :  { %1443 = vrot.lane.b32.xlu1 %v1251_v8, %s7372_s23 }
 0x28e   :  { %1544 = vrot.lane.b32.xlu0 %v7973_v18, %s7373_s28  ;;  %1439 = vrot.lane.b32.xlu2 %v7973_v18, %s7372_s23 }
 0x28f   :  { %1548 = vrot.lane.b32.xlu1 %v1251_v8, %s7373_s28 }
 0x296   :  { %1760 = vrot.lane.b32.xlu0 %v7975_v22, %s7375_s29  ;;  %1653 = vrot.lane.b32.xlu2 %v1251_v8, %s7374_s0 }
 0x297   :  { %1651 = vrot.lane.b32.xlu1 %v1250_v7, %s7374_s0 }
 0x29e   :  { %1863 = vrot.lane.b32.xlu0 %v1251_v8, %s7376_s30  ;;  %1758 = vrot.lane.b32.xlu2 %v1251_v8, %s7375_s29 }
 0x29f   :  { %1655 = vrot.lane.b32.xlu1 %v7975_v22, %s7374_s0 }
 0x2a6   :  { %1859 = vrot.lane.b32.xlu0 %v7973_v18, %s7376_s30  ;;  %1754 = vrot.lane.b32.xlu2 %v7973_v18, %s7375_s29 }
 0x2a7   :  { %1649 = vrot.lane.b32.xlu1 %v7973_v18, %s7374_s0 }
 0x2ae   :  { %1861 = vrot.lane.b32.xlu0 %v1250_v7, %s7376_s30  ;;  %1756 = vrot.lane.b32.xlu2 %v1250_v7, %s7375_s29 }
 0x2af   :  { %1865 = vrot.lane.b32.xlu1 %v7975_v22, %s7376_s30 }
 0x2b6   :  { %2075 = vrot.lane.b32.xlu0 %v7975_v22, %s7378_s7  ;;  %1970 = vrot.lane.b32.xlu2 %v7975_v22, %s7377_s6 }
 0x2b7   :  { %1968 = vrot.lane.b32.xlu1 %v1251_v8, %s7377_s6 }
 0x2be   :  { %2071 = vrot.lane.b32.xlu0 %v1250_v7, %s7378_s7  ;;  %2073 = vrot.lane.b32.xlu2 %v1251_v8, %s7378_s7 }
 0x2bf   :  { %1964 = vrot.lane.b32.xlu1 %v7973_v18, %s7377_s6 }
 0x2c6   :  { %2069 = vrot.lane.b32.xlu2 %v7973_v18, %s7378_s7 }
 0x2c7   :  { %1966 = vrot.lane.b32.xlu1 %v1250_v7, %s7377_s6 }
 0x2d0   :  { %v1260_v32 = vpop.permute.xlu2 %1259 }
 0x2d8   :  { %v1256_v38 = vpop.permute.xlu2 %1255 }
 0x2e0   :  { %v1446_v19 = vpop.permute.xlu2 %1445 }
 0x2e8   :  { %v1442_v54 = vpop.permute.xlu0 %1441  ;;  %v1440_v20 = vpop.permute.xlu2 %1439 }
 0x2e9   :  { %v1258_v48 = vpop.permute.xlu1 %1257  ;;  %v1449_v0 = vsel %vm234_vm1, %v1440_v20, %v1442_v54  ;;  %v1450_v27 = vsel %vm234_vm1, %v1446_v19, %v1440_v20 }
 0x2ea   :  { %v1264_v41 = vsel %vm38_vm0, %v1258_v48, %v1260_v32  ;;  %v1265_v24 = vsel %vm38_vm0, %v1256_v38, %v1258_v48  ;;  %v1452_v40 = vmul.f32 %v1449_v0, %v7575_v45  ;;  %v1451_v49 = vmul.f32 %v1450_v27, %v7573_v44  ;;  %v7095_v0 = vld [vmem:[%s9809_s1 + $0x60] sm:$0xff]  ;;  %v7100_v27 = vld [vmem:[%s9809_s1 + $0x70] sm:$0xff] }
 0x2eb   :  { %v1268_v25 = vmul.f32 %v1265_v24, %v7512_v14  ;;  %v1269_v6 = vmul.f32 %v1264_v41, %v7514_v15 }
 0x2ed   :  { %1311 = vmatpush.msrb.mxu1 %v1268_v25  ;;  %1331 = vmatpush.msrb.mxu2 %v1269_v6 }
 0x2ee   :  { %7079 = vmatmul.msk.f32.vlgmr.msrb.gmra.mxu2 %vm57_vm2, %v7076_v26  ;;  %7078 = vmatmul.msk.f32.vlgmr.msrb.gmra.mxu1 %vm57_vm2, %v7076_v26 }
 0x2ef   :  { %1394 = vmatpush.msra.mxu1 %v1250_v7  ;;  %1414 = vmatpush.msra.mxu2 %v1251_v8 }
 0x2f0   :  { %v1547_v29 = vpop.permute.xlu0 %1546  ;;  %v1654_v39 = vpop.permute.xlu2 %1653 }
 0x2f1   :  { %1495 = vmatpush.msrb.mxu1 %v1452_v40  ;;  %v1262_v9 = vpop.permute.xlu1 %1261 }
 0x2f2   :  { %v1263_v1 = vsel %vm38_vm0, %v1260_v32, %v1262_v9  ;;  %v1266_v11 = vsel %vm38_vm0, %v1262_v9, %v1256_v38 }
 0x2f3   :  { %v1267_v2 = vmul.f32 %v1266_v11, %v7510_v13  ;;  %v1270_v35 = vmul.f32 %v1263_v1, %v7516_v16 }
 0x2f5   :  { %1291 = vmatpush.msrb.mxu0 %v1267_v2  ;;  %1351 = vmatpush.msrb.mxu3 %v1270_v35 }
 0x2f6   :  { %7077 = vmatmul.msk.f32.vlgmr.msrb.gmra.mxu0 %vm57_vm2, %v7076_v26  ;;  %7080 = vmatmul.msk.f32.vlgmr.msrb.gmra.mxu3 %vm57_vm2, %v7076_v26 }
 0x2f7   :  { %1374 = vmatpush.msra.mxu0 %v7973_v18  ;;  %7083 = vmatmul.msk.f32.vlgmr.msra.gmra.mxu2 %vm57_vm2, %v7075_v37 }
 0x2f8   :  { %1434 = vmatpush.msra.mxu3 %v7975_v22  ;;  %v1551_v50 = vpop.permute.xlu0 %1550  ;;  %7082 = vmatmul.msk.f32.vlgmr.msra.gmra.mxu1 %vm57_vm2, %v7075_v37  ;;  %v1759_v61 = vpop.permute.xlu2 %1758 }
 0x2f9   :  { %1475 = vmatpush.msrb.mxu0 %v1451_v49  ;;  %v1444_v51 = vpop.permute.xlu1 %1443 }
 0x2fa   :  { %v1447_v52 = vsel %vm234_vm1, %v1444_v51, %v1446_v19  ;;  %v1448_v5 = vsel %vm234_vm1, %v1442_v54, %v1444_v51  ;;  %v7090_v19 = vld [vmem:[%s9809_s1 + $0x58] sm:$0xff] }
 0x2fb   :  { %v1453_v53 = vmul.f32 %v1448_v5, %v7534_v28  ;;  %v1454_v55 = vmul.f32 %v1447_v52, %v7549_v33 }
 0x2fd   :  { %1515 = vmatpush.msrb.mxu2 %v1453_v53  ;;  %1535 = vmatpush.msrb.mxu3 %v1454_v55 }
 0x2fe   :  { %7081 = vmatmul.msk.f32.vlgmr.msra.gmra.mxu0 %vm57_vm2, %v7075_v37  ;;  %7084 = vmatmul.msk.f32.vlgmr.msra.gmra.mxu3 %vm57_vm2, %v7075_v37 }
 0x2ff   :  { %7088 = vmatmul.msk.f32.vlgmr.msrb.gmra.mxu2 %vm57_vm2, %v7085_v56 }
 0x300   :  { %v1545_v12 = vpop.permute.xlu0 %1544  ;;  %7087 = vmatmul.msk.f32.vlgmr.msrb.gmra.mxu1 %vm57_vm2, %v7085_v56  ;;  %v1755_v20 = vpop.permute.xlu2 %1754 }
 0x301   :  { %v1549_v7 = vpop.permute.xlu1 %1548  ;;  %v1554_v8 = vsel %vm351_vm3, %v1545_v12, %v1547_v29  ;;  %v1555_v17 = vsel %vm351_vm3, %v1551_v50, %v1545_v12 }
 0x302   :  { %v1552_v23 = vsel %vm351_vm3, %v1549_v7, %v1551_v50  ;;  %v1553_v34 = vsel %vm351_vm3, %v1547_v29, %v1549_v7  ;;  %v1556_v18 = vmul.f32 %v1555_v17, %v7605_v59  ;;  %v1557_v22 = vmul.f32 %v1554_v8, %v7607_v60 }
 0x303   :  { %v1558_v32 = vmul.f32 %v1553_v34, %v7556_v36  ;;  %v1559_v38 = vmul.f32 %v1552_v23, %v7577_v46 }
 0x304   :  { %1580 = vmatpush.msra.mxu0 %v1556_v18  ;;  %1600 = vmatpush.msra.mxu1 %v1557_v22 }
 0x305   :  { %1620 = vmatpush.msra.mxu2 %v1558_v32  ;;  %1640 = vmatpush.msra.mxu3 %v1559_v38  ;;  %v7105_v38 = vld [vmem:[%s9809_s1 + $0x78] sm:$0xff] }
 0x306   :  { %7086 = vmatmul.msk.f32.vlgmr.msrb.gmra.mxu0 %vm57_vm2, %v7085_v56  ;;  %7089 = vmatmul.msk.f32.vlgmr.msrb.gmra.mxu3 %vm57_vm2, %v7085_v56 }
 0x307   :  { %7093 = vmatmul.msk.f32.vlgmr.msra.gmra.mxu2 %vm57_vm2, %v7090_v19 }
 0x308   :  { %v1761_v54 = vpop.permute.xlu0 %1760  ;;  %7092 = vmatmul.msk.f32.vlgmr.msra.gmra.mxu1 %vm57_vm2, %v7090_v19  ;;  %v1757_v1 = vpop.permute.xlu2 %1756 }
 0x309   :  { %v1652_v48 = vpop.permute.xlu1 %1651  ;;  %v1762_v41 = vsel %vm585_vm5, %v1759_v61, %v1761_v54  ;;  %v1765_v29 = vsel %vm585_vm5, %v1761_v54, %v1755_v20  ;;  %v1764_v49 = vsel %vm585_vm5, %v1755_v20, %v1757_v1 }
 0x30a   :  { %v1658_v24 = vsel %vm468_vm4, %v1652_v48, %v1654_v39  ;;  %v1768_v6 = vmul.f32 %v1762_v41, %v7648_v21  ;;  %v1769_v2 = vmul.f32 %v1765_v29, %v7663_v30  ;;  %v1766_v53 = vmul.f32 %v1764_v49, %v7680_v42 }
 0x30b   :  { %v1663_v25 = vmul.f32 %v1658_v24, %v7601_v57  ;;  %v9887_v24 = vld [vmem:[#allocation9_spill] sm:$0xff] }
 0x30d   :  { %1725 = vmatpush.msrb.mxu2 %v1663_v25 }
 0x30e   :  { %7091 = vmatmul.msk.f32.vlgmr.msra.gmra.mxu0 %vm57_vm2, %v7090_v19  ;;  %7094 = vmatmul.msk.f32.vlgmr.msra.gmra.mxu3 %vm57_vm2, %v7090_v19 }
 0x30f   :  { %7098 = vmatmul.msk.f32.vlgmr.msrb.gmra.mxu2 %vm57_vm2, %v7095_v0 }
 0x310   :  { %1830 = vmatpush.msra.mxu2 %v1768_v6  ;;  %v1864_v26 = vpop.permute.xlu0 %1863  ;;  %v1971_v56 = vpop.permute.xlu2 %1970  ;;  %v9888_v6 = vld [vmem:[#allocation15_spill] sm:$0xff] }
 0x311   :  { %v1656_v40 = vpop.permute.xlu1 %1655 }
 0x312   :  { %v1657_v9 = vsel %vm468_vm4, %v1654_v39, %v1656_v40  ;;  %v1763_v39 = vsel %vm585_vm5, %v1757_v1, %v1759_v61 }
 0x313   :  { %v1664_v11 = vmul.f32 %v1657_v9, %v7603_v58  ;;  %v1767_v55 = vmul.f32 %v1763_v39, %v7682_v43  ;;  %v9889_v9 = vmov 1.0  }
 0x315   :  { %1745 = vmatpush.msrb.mxu3 %v1664_v11 }
 0x316   :  { %7099 = vmatmul.msk.f32.vlgmr.msrb.gmra.mxu3 %vm57_vm2, %v7095_v0 }
 0x317   :  { %7103 = vmatmul.msk.f32.vlgmr.msra.gmra.mxu2 %vm57_vm2, %v7100_v27  ;;  %1850 = vmatpush.msra.mxu3 %v1769_v2 }
 0x318   :  { %v1860_v35 = vpop.permute.xlu0 %1859  ;;  %v2074_v19 = vpop.permute.xlu2 %2073 }
 0x319   :  { %v1650_v37 = vpop.permute.xlu1 %1649 }
 0x31a   :  { %v1659_v50 = vsel %vm468_vm4, %v1650_v37, %v1652_v48  ;;  %v1660_v51 = vsel %vm468_vm4, %v1656_v40, %v1650_v37  ;;  %v9891_v37 = vld [vmem:[#allocation16_spill] sm:$0xff] }
 0x31b   :  { %v1661_v52 = vmul.f32 %v1660_v51, %v7613_v62  ;;  %v1662_v5 = vmul.f32 %v1659_v50, %v7615_v63 }
 0x31d   :  { %1685 = vmatpush.msrb.mxu0 %v1661_v52  ;;  %1705 = vmatpush.msrb.mxu1 %v1662_v5 }
 0x31e   :  { %7096 = vmatmul.msk.f32.vlgmr.msrb.gmra.mxu0 %vm57_vm2, %v7095_v0  ;;  %7097 = vmatmul.msk.f32.vlgmr.msrb.gmra.mxu1 %vm57_vm2, %v7095_v0 }
 0x31f   :  { %1790 = vmatpush.msra.mxu0 %v1766_v53  ;;  %1810 = vmatpush.msra.mxu1 %v1767_v55  ;;  %v9892_v55 = vld [vmem:[#allocation14_spill] sm:$0xff] }
 0x320   :  { %7104 = vmatmul.msk.f32.vlgmr.msra.gmra.mxu3 %vm57_vm2, %v7100_v27  ;;  %v1862_v61 = vpop.permute.xlu0 %1861  ;;  %v2070_v40 = vpop.permute.xlu2 %2069 }
 0x321   :  { %v1866_v12 = vpop.permute.xlu1 %1865  ;;  %v1868_v7 = vsel %vm702_vm6, %v1862_v61, %v1864_v26  ;;  %v1869_v8 = vsel %vm702_vm6, %v1860_v35, %v1862_v61  ;;  %v9893_v61 = vld [vmem:[#allocation13_spill] sm:$0xff] }
 0x322   :  { %v1867_v17 = vsel %vm702_vm6, %v1864_v26, %v1866_v12  ;;  %v1870_v23 = vsel %vm702_vm6, %v1866_v12, %v1860_v35  ;;  %v1871_v34 = vmul.f32 %v1869_v8, %v7711_v3  ;;  %v1872_v18 = vmul.f32 %v1868_v7, %v7713_v4  ;;  %v7110_v26 = vld [vmem:[%s9809_s1 + $0x80] sm:$0xff]  ;;  %v7115_v35 = vld [vmem:[%s9809_s1 + $0x88] sm:$0xff] }
 0x323   :  { %v1873_v22 = vmul.f32 %v1867_v17, %v7666_v31  ;;  %v1874_v32 = vmul.f32 %v1870_v23, %v7684_v47  ;;  %v9894_v7 = vld [vmem:[#allocation17_spill] sm:$0xff]  ;;  %v9895_v17 = vld [vmem:[#allocation18_spill] sm:$0xff] }
 0x324   :  { %1895 = vmatpush.msrb.mxu0 %v1871_v34  ;;  %1915 = vmatpush.msrb.mxu1 %v1872_v18 }
 0x325   :  { %1935 = vmatpush.msrb.mxu2 %v1873_v22  ;;  %1955 = vmatpush.msrb.mxu3 %v1874_v32 }
 0x326   :  { %7101 = vmatmul.msk.f32.vlgmr.msra.gmra.mxu0 %vm57_vm2, %v7100_v27  ;;  %7102 = vmatmul.msk.f32.vlgmr.msra.gmra.mxu1 %vm57_vm2, %v7100_v27  ;;  %v9890_v27 = vld [vmem:[#allocation10_spill] sm:$0xff] }
 0x327   :  { %7108 = vmatmul.msk.f32.vlgmr.msrb.gmra.mxu2 %vm57_vm2, %v7105_v38 }
 0x328   :  { %7109 = vmatmul.msk.f32.vlgmr.msrb.gmra.mxu3 %vm57_vm2, %v7105_v38  ;;  %v2076_v54 = vpop.permute.xlu0 %2075 }
 0x329   :  { %v1969_v20 = vpop.permute.xlu1 %1968  ;;  %v2077_v48 = vsel %vm936_vm8, %v2074_v19, %v2076_v54  ;;  %v2080_v1 = vsel %vm936_vm8, %v2076_v54, %v2070_v40 }
 0x32a   :  { %v1972_v41 = vsel %vm819_vm7, %v1969_v20, %v1971_v56  ;;  %v2083_v0 = vmul.f32 %v2077_v48, %v9888_v6  ;;  %v2084_v39 = vmul.f32 %v2080_v1, %v9891_v37 }
 0x32b   :  { %v1978_v25 = vmul.f32 %v1972_v41, %v9887_v24 }
 0x32d   :  { %2040 = vmatpush.msra.mxu2 %v1978_v25 }
 0x32e   :  { %7106 = vmatmul.msk.f32.vlgmr.msrb.gmra.mxu0 %vm57_vm2, %v7105_v38  ;;  %7107 = vmatmul.msk.f32.vlgmr.msrb.gmra.mxu1 %vm57_vm2, %v7105_v38 }
 0x32f   :  { %7113 = vmatmul.msk.f32.vlgmr.msra.gmra.mxu2 %vm57_vm2, %v7110_v26 }
 0x330   :  { %2145 = vmatpush.msrb.mxu2 %v2083_v0  ;;  %v2072_v49 = vpop.permute.xlu0 %2071 }
 0x331   :  { %v1965_v29 = vpop.permute.xlu1 %1964  ;;  %v2078_v50 = vsel %vm936_vm8, %v2072_v49, %v2074_v19  ;;  %v2079_v52 = vsel %vm936_vm8, %v2070_v40, %v2072_v49 }
 0x332   :  { %2214 = vmatpush.msra.mxu2 %v9889_v9  ;;  %v1975_v11 = vsel %vm819_vm7, %v1971_v56, %v1965_v29  ;;  %v2081_v8 = vmul.f32 %v2079_v52, %v9894_v7  ;;  %v2082_v23 = vmul.f32 %v2078_v50, %v9895_v17 }
 0x333   :  { %v1979_v2 = vmul.f32 %v1975_v11, %v9890_v27 }
 0x334   :  { %2215 = vmatpush.msra.mxu2 %v9889_v9 }
 0x335   :  { %2060 = vmatpush.msra.mxu3 %v1979_v2 }
 0x336   :  { %2216 = vmatpush.msra.mxu2 %v9889_v9  ;;  %7114 = vmatmul.msk.f32.vlgmr.msra.gmra.mxu3 %vm57_vm2, %v7110_v26 }
 0x337   :  { %7118 = vmatmul.msk.f32.vlgmr.msrb.gmra.mxu2 %vm57_vm2, %v7115_v35  ;;  %2165 = vmatpush.msrb.mxu3 %v2084_v39 }
 0x338   :  { %2217 = vmatpush.msra.mxu2 %v9889_v9 }
 0x339   :  { %2234 = vmatpush.msra.mxu3 %v9889_v9  ;;  %v1967_v51 = vpop.permute.xlu1 %1966 }
 0x33a   :  { %v1973_v5 = vsel %vm819_vm7, %v1967_v51, %v1969_v20  ;;  %v1974_v53 = vsel %vm819_vm7, %v1965_v29, %v1967_v51  ;;  %2218 = vmatpush.msra.mxu2 %v9889_v9 }
 0x33b   :  { %2235 = vmatpush.msra.mxu3 %v9889_v9  ;;  %v1976_v56 = vmul.f32 %v1974_v53, %v9892_v55  ;;  %v1977_v12 = vmul.f32 %v1973_v5, %v9893_v61 }
 0x33c   :  { %2219 = vmatpush.msra.mxu2 %v9889_v9 }
 0x33d   :  { %2236 = vmatpush.msra.mxu3 %v9889_v9  ;;  %2000 = vmatpush.msra.mxu0 %v1976_v56 }
 0x33e   :  { %2020 = vmatpush.msra.mxu1 %v1977_v12  ;;  %7111 = vmatmul.msk.f32.vlgmr.msra.gmra.mxu0 %vm57_vm2, %v7110_v26 }
 0x33f   :  { %7112 = vmatmul.msk.f32.vlgmr.msra.gmra.mxu1 %vm57_vm2, %v7110_v26  ;;  %2105 = vmatpush.msrb.mxu0 %v2081_v8 }
 0x340   :  { %2125 = vmatpush.msrb.mxu1 %v2082_v23  ;;  %7119 = vmatmul.msk.f32.vlgmr.msrb.gmra.mxu3 %vm57_vm2, %v7115_v35 }
 0x341   :  { %2174 = vmatpush.msra.mxu0 %v9889_v9  ;;  %2220 = vmatpush.msra.mxu2 %v9889_v9 }
 0x342   :  { %2194 = vmatpush.msra.mxu1 %v9889_v9  ;;  %2237 = vmatpush.msra.mxu3 %v9889_v9 }
 0x343   :  { %2175 = vmatpush.msra.mxu0 %v9889_v9  ;;  %2221 = vmatpush.msra.mxu2 %v9889_v9 }
 0x344   :  { %2195 = vmatpush.msra.mxu1 %v9889_v9  ;;  %2238 = vmatpush.msra.mxu3 %v9889_v9 }
 0x345   :  { %2176 = vmatpush.msra.mxu0 %v9889_v9  ;;  %2222 = vmatpush.msra.mxu2 %v9889_v9 }
 0x346   :  { %2196 = vmatpush.msra.mxu1 %v9889_v9  ;;  %7116 = vmatmul.msk.f32.vlgmr.msrb.gmra.mxu0 %vm57_vm2, %v7115_v35 }
 0x347   :  { %7117 = vmatmul.msk.f32.vlgmr.msrb.gmra.mxu1 %vm57_vm2, %v7115_v35  ;;  %2177 = vmatpush.msra.mxu0 %v9889_v9 }
 0x348   :  { %2197 = vmatpush.msra.mxu1 %v9889_v9  ;;  %2223 = vmatpush.msra.mxu2 %v9889_v9 }
 0x349   :  { %2239 = vmatpush.msra.mxu3 %v9889_v9  ;;  %2178 = vmatpush.msra.mxu0 %v9889_v9 }
 0x34a   :  { %2198 = vmatpush.msra.mxu1 %v9889_v9  ;;  %2224 = vmatpush.msra.mxu2 %v9889_v9 }
 0x34b   :  { %2240 = vmatpush.msra.mxu3 %v9889_v9  ;;  %2179 = vmatpush.msra.mxu0 %v9889_v9 }
 0x34c   :  { %2199 = vmatpush.msra.mxu1 %v9889_v9  ;;  %2225 = vmatpush.msra.mxu2 %v9889_v9 }
 0x34d   :  { %2241 = vmatpush.msra.mxu3 %v9889_v9  ;;  %2180 = vmatpush.msra.mxu0 %v9889_v9 }
 0x34e   :  { %2200 = vmatpush.msra.mxu1 %v9889_v9  ;;  %2226 = vmatpush.msra.mxu2 %v9889_v9 }
 0x34f   :  { %2242 = vmatpush.msra.mxu3 %v9889_v9  ;;  %2181 = vmatpush.msra.mxu0 %v9889_v9 }
 0x350   :  { %2201 = vmatpush.msra.mxu1 %v9889_v9  ;;  %2227 = vmatpush.msra.mxu2 %v9889_v9 }
 0x351   :  { %2243 = vmatpush.msra.mxu3 %v9889_v9  ;;  %2182 = vmatpush.msra.mxu0 %v9889_v9 }
 0x352   :  { %2202 = vmatpush.msra.mxu1 %v9889_v9  ;;  %2228 = vmatpush.msra.mxu2 %v9889_v9 }
 0x353   :  { %2244 = vmatpush.msra.mxu3 %v9889_v9  ;;  %2183 = vmatpush.msra.mxu0 %v9889_v9 }
 0x354   :  { %2203 = vmatpush.msra.mxu1 %v9889_v9  ;;  %2229 = vmatpush.msra.mxu2 %v9889_v9 }
 0x355   :  { %2245 = vmatpush.msra.mxu3 %v9889_v9  ;;  %2184 = vmatpush.msra.mxu0 %v9889_v9 }
 0x356   :  { %2204 = vmatpush.msra.mxu1 %v9889_v9  ;;  %2298 = vmatpush.msrb.mxu2 %v9889_v9 }
 0x357   :  { %2246 = vmatpush.msra.mxu3 %v9889_v9  ;;  %2185 = vmatpush.msra.mxu0 %v9889_v9 }
 0x358   :  { %2205 = vmatpush.msra.mxu1 %v9889_v9  ;;  %2299 = vmatpush.msrb.mxu2 %v9889_v9 }
 0x359   :  { %2247 = vmatpush.msra.mxu3 %v9889_v9  ;;  %2186 = vmatpush.msra.mxu0 %v9889_v9 }
 0x35a   :  { %2206 = vmatpush.msra.mxu1 %v9889_v9  ;;  %2300 = vmatpush.msrb.mxu2 %v9889_v9 }
 0x35b   :  { %2248 = vmatpush.msra.mxu3 %v9889_v9  ;;  %2187 = vmatpush.msra.mxu0 %v9889_v9 }
 0x35c   :  { %2207 = vmatpush.msra.mxu1 %v9889_v9  ;;  %2301 = vmatpush.msrb.mxu2 %v9889_v9 }
 0x35d   :  { %2249 = vmatpush.msra.mxu3 %v9889_v9  ;;  %2188 = vmatpush.msra.mxu0 %v9889_v9 }
 0x35e   :  { %2208 = vmatpush.msra.mxu1 %v9889_v9  ;;  %2302 = vmatpush.msrb.mxu2 %v9889_v9 }
 0x35f   :  { %2318 = vmatpush.msrb.mxu3 %v9889_v9  ;;  %2189 = vmatpush.msra.mxu0 %v9889_v9 }
 0x360   :  { %2209 = vmatpush.msra.mxu1 %v9889_v9  ;;  %2303 = vmatpush.msrb.mxu2 %v9889_v9 }
 0x361   :  { %2258 = vmatpush.msrb.mxu0 %v9889_v9  ;;  %2319 = vmatpush.msrb.mxu3 %v9889_v9 }
 0x362   :  { %2278 = vmatpush.msrb.mxu1 %v9889_v9  ;;  %2304 = vmatpush.msrb.mxu2 %v9889_v9 }
 0x363   :  { %2259 = vmatpush.msrb.mxu0 %v9889_v9  ;;  %2320 = vmatpush.msrb.mxu3 %v9889_v9 }
 0x364   :  { %2279 = vmatpush.msrb.mxu1 %v9889_v9  ;;  %2305 = vmatpush.msrb.mxu2 %v9889_v9 }
 0x365   :  { %2260 = vmatpush.msrb.mxu0 %v9889_v9  ;;  %2321 = vmatpush.msrb.mxu3 %v9889_v9 }
 0x366   :  { %2280 = vmatpush.msrb.mxu1 %v9889_v9  ;;  %2306 = vmatpush.msrb.mxu2 %v9889_v9 }
 0x367   :  { %2261 = vmatpush.msrb.mxu0 %v9889_v9  ;;  %2322 = vmatpush.msrb.mxu3 %v9889_v9 }
 0x368   :  { %2281 = vmatpush.msrb.mxu1 %v9889_v9  ;;  %2307 = vmatpush.msrb.mxu2 %v9889_v9 }
 0x369   :  { %2262 = vmatpush.msrb.mxu0 %v9889_v9  ;;  %2323 = vmatpush.msrb.mxu3 %v9889_v9 }
 0x36a   :  { %2282 = vmatpush.msrb.mxu1 %v9889_v9  ;;  %2308 = vmatpush.msrb.mxu2 %v9889_v9 }
 0x36b   :  { %2263 = vmatpush.msrb.mxu0 %v9889_v9  ;;  %2324 = vmatpush.msrb.mxu3 %v9889_v9  ;;  %v1313_v18 = vpop.f32.mrf.mxu1 }
 0x36c   :  { %2283 = vmatpush.msrb.mxu1 %v9889_v9  ;;  %2309 = vmatpush.msrb.mxu2 %v9889_v9 }
 0x36d   :  { %2264 = vmatpush.msrb.mxu0 %v9889_v9  ;;  %2325 = vmatpush.msrb.mxu3 %v9889_v9 }
 0x36e   :  { %2284 = vmatpush.msrb.mxu1 %v9889_v9  ;;  %2310 = vmatpush.msrb.mxu2 %v9889_v9 }
 0x36f   :  { %2265 = vmatpush.msrb.mxu0 %v9889_v9  ;;  %2326 = vmatpush.msrb.mxu3 %v9889_v9 }
 0x370   :  { %2285 = vmatpush.msrb.mxu1 %v9889_v9  ;;  %2311 = vmatpush.msrb.mxu2 %v9889_v9 }
 0x371   :  { %2266 = vmatpush.msrb.mxu0 %v9889_v9  ;;  %v1333_v34 = vpop.f32.mrf.mxu2  ;;  %2327 = vmatpush.msrb.mxu3 %v9889_v9 }
 0x372   :  { %2286 = vmatpush.msrb.mxu1 %v9889_v9  ;;  %2312 = vmatpush.msrb.mxu2 %v9889_v9 }
 0x373   :  { %2267 = vmatpush.msrb.mxu0 %v9889_v9  ;;  %2328 = vmatpush.msrb.mxu3 %v9889_v9  ;;  %v1293_v22 = vpop.f32.mrf.mxu0 }
 0x374   :  { %2287 = vmatpush.msrb.mxu1 %v9889_v9  ;;  %2313 = vmatpush.msrb.mxu2 %v9889_v9 }
 0x375   :  { %2268 = vmatpush.msrb.mxu0 %v9889_v9  ;;  %2329 = vmatpush.msrb.mxu3 %v9889_v9  ;;  %v1396_v54 = vpop.f32.mrf.mxu1 }
 0x376   :  { %2288 = vmatpush.msrb.mxu1 %v9889_v9  ;;  %v1397_v37 = vadd.f32 %v1396_v54, %v1313_v18 }
 0x377   :  { %2269 = vmatpush.msrb.mxu0 %v9889_v9  ;;  %2330 = vmatpush.msrb.mxu3 %v9889_v9 }
 0x378   :  { %2289 = vmatpush.msrb.mxu1 %v9889_v9 }
 0x379   :  { %2270 = vmatpush.msrb.mxu0 %v9889_v9  ;;  %v1353_v32 = vpop.f32.mrf.mxu3  ;;  %2331 = vmatpush.msrb.mxu3 %v9889_v9 }
 0x37a   :  { %2290 = vmatpush.msrb.mxu1 %v9889_v9  ;;  %v1416_v38 = vpop.f32.mrf.mxu2 }
 0x37b   :  { %2271 = vmatpush.msrb.mxu0 %v9889_v9  ;;  %2332 = vmatpush.msrb.mxu3 %v9889_v9  ;;  %v1376_v20 = vpop.f32.mrf.mxu0  ;;  %v1417_v53 = vadd.f32 %v1416_v38, %v1333_v34 }
 0x37c   :  { %2291 = vmatpush.msrb.mxu1 %v9889_v9  ;;  %v1377_v6 = vadd.f32 %v1376_v20, %v1293_v22 }
 0x37d   :  { %2272 = vmatpush.msrb.mxu0 %v9889_v9  ;;  %2333 = vmatpush.msrb.mxu3 %v9889_v9  ;;  %v1497_v25 = vpop.f32.mrf.mxu1 }
 0x37e   :  { %2292 = vmatpush.msrb.mxu1 %v9889_v9  ;;  %v1541_v27 = vadd.f32 %v1497_v25, %v1397_v37 }
 0x37f   :  { %2273 = vmatpush.msrb.mxu0 %v9889_v9 }
 0x380   :  { %2293 = vmatpush.msrb.mxu1 %v9889_v9 }
 0x381   :  { %v1436_v19 = vpop.f32.mrf.mxu3 }
 0x382   :  { %v1517_v48 = vpop.f32.mrf.mxu2  ;;  %v1437_v55 = vadd.f32 %v1436_v19, %v1353_v32 }
 0x383   :  { %v1477_v0 = vpop.f32.mrf.mxu0  ;;  %v1542_v56 = vadd.f32 %v1517_v48, %v1417_v53 }
 0x384   :  { %v1540_v4 = vadd.f32 %v1477_v0, %v1377_v6 }
 0x385   :  { %v1602_v29 = vpop.f32.mrf.mxu1 }
 0x386   :  { %v1646_v38 = vadd.f32 %v1602_v29, %v1541_v27 }
 0x389   :  { %v1537_v41 = vpop.f32.mrf.mxu3 }
 0x38a   :  { %v1622_v26 = vpop.f32.mrf.mxu2  ;;  %v1543_v3 = vadd.f32 %v1537_v41, %v1437_v55 }
 0x38b   :  { %v1582_v1 = vpop.f32.mrf.mxu0  ;;  %v1647_v12 = vadd.f32 %v1622_v26, %v1542_v56 }
 0x38c   :  { %v1645_v47 = vadd.f32 %v1582_v1, %v1540_v4 }
 0x391   :  { %v1642_v40 = vpop.f32.mrf.mxu3 }
 0x392   :  { %v1727_v11 = vpop.f32.mrf.mxu2  ;;  %v1648_v30 = vadd.f32 %v1642_v40, %v1543_v3 }
 0x393   :  { %v1752_v7 = vadd.f32 %v1727_v11, %v1647_v12 }
 0x399   :  { %v1747_v2 = vpop.f32.mrf.mxu3 }
 0x39a   :  { %v1832_v49 = vpop.f32.mrf.mxu2  ;;  %v1753_v54 = vadd.f32 %v1747_v2, %v1648_v30 }
 0x39b   :  { %v1687_v35 = vpop.f32.mrf.mxu0  ;;  %v1707_v39 = vpop.f32.mrf.mxu1  ;;  %v1857_v61 = vadd.f32 %v1832_v49, %v1752_v7 }
 0x39c   :  { %v1750_v11 = vadd.f32 %v1687_v35, %v1645_v47  ;;  %v1751_v53 = vadd.f32 %v1707_v39, %v1646_v38 }
 0x3a3   :  { %v1852_v50 = vpop.f32.mrf.mxu3  ;;  %v1792_v51 = vpop.f32.mrf.mxu0 }
 0x3a4   :  { %v1812_v52 = vpop.f32.mrf.mxu1  ;;  %v1858_v7 = vadd.f32 %v1852_v50, %v1753_v54  ;;  %v1855_v37 = vadd.f32 %v1792_v51, %v1750_v11 }
 0x3aa   :  { %v1937_v5 = vpop.f32.mrf.mxu2 }
 0x3ab   :  { %v1957_v8 = vpop.f32.mrf.mxu3  ;;  %v1897_v17 = vpop.f32.mrf.mxu0  ;;  %v1962_v24 = vadd.f32 %v1937_v5, %v1857_v61  ;;  %v1856_v61 = vadd.f32 %v1812_v52, %v1751_v53  ;;  %v7120_v53 = vld [vmem:[%s9810_s2 + $0x8] sm:$0xff] }
 0x3ac   :  { %v1917_v9 = vpop.f32.mrf.mxu1  ;;  %v1963_v6 = vadd.f32 %v1957_v8, %v1858_v7  ;;  %v1960_v55 = vadd.f32 %v1897_v17, %v1855_v37 }
 0x3b2   :  { %v2042_v23 = vpop.f32.mrf.mxu2 }
 0x3b3   :  { %v2067_v43 = vadd.f32 %v2042_v23, %v1962_v24  ;;  %v1961_v24 = vadd.f32 %v1917_v9, %v1856_v61 }
 0x3b9   :  { %v2062_v42 = vpop.f32.mrf.mxu3 }
 0x3ba   :  { %v2147_v34 = vpop.f32.mrf.mxu2  ;;  %v2068_v22 = vadd.f32 %v2062_v42, %v1963_v6  ;;  %v7121_v6 = vld [vmem:[%s9811_s3 + $0x8] sm:$0xff] }
 0x3bb   :  { %v8311_v48 = vadd.f32 %v2147_v34, %v2067_v43  ;;  %v2002_v26 = vpop.f32.mrf.mxu0 }
 0x3bc   :  { %v2022_v18 = vpop.f32.mrf.mxu1  ;;  %v2065_v4 = vadd.f32 %v2002_v26, %v1960_v55 }
 0x3bd   :  { %2230 = vmatmul.f32.vlgmr.msra.gmra.mxu2 %v8311_v48  ;;  %v2256_v3 = vmul.f32 %v8311_v48, %v8311_v48  ;;  %v2066_v43 = vadd.f32 %v2022_v18, %v1961_v24 }
 0x3c3   :  { %v2167_v27 = vpop.f32.mrf.mxu3  ;;  %v2107_v32 = vpop.f32.mrf.mxu0 }
 0x3c4   :  { %v2173_v19 = vadd.f32 %v2167_v27, %v2068_v22  ;;  %v2170_v30 = vadd.f32 %v2107_v32, %v2065_v4  ;;  %v2127_v47 = vpop.f32.mrf.mxu1 }
 0x3c5   :  { %v2171_v20 = vadd.f32 %v2127_v47, %v2066_v43  ;;  %2314 = vmatmul.f32.vlgmr.msrb.gmra.mxu2 %v2256_v3 }
 0x3c6   :  { %2250 = vmatmul.f32.vlgmr.msra.gmra.mxu3 %v2173_v19  ;;  %2190 = vmatmul.f32.vlgmr.msra.gmra.mxu0 %v2170_v30  ;;  %v2257_v41 = vmul.f32 %v2173_v19, %v2173_v19  ;;  %v2254_v25 = vmul.f32 %v2170_v30, %v2170_v30 }
 0x3c7   :  { %2210 = vmatmul.f32.vlgmr.msra.gmra.mxu1 %v2171_v20  ;;  %v2255_v17 = vmul.f32 %v2171_v20, %v2171_v20 }
 0x3ce   :  { %2334 = vmatmul.f32.vlgmr.msrb.gmra.mxu3 %v2257_v41  ;;  %2274 = vmatmul.f32.vlgmr.msrb.gmra.mxu0 %v2254_v25 }
 0x3cf   :  { %2294 = vmatmul.f32.vlgmr.msrb.gmra.mxu1 %v2255_v17 }
 0x440   :  { %v2231_v9 = vpop.f32.mrf.mxu2 }
 0x443   :  { %v2191_v42 = vpop.f32.mrf.mxu0 }
 0x444   :  { %v2211_v0 = vpop.f32.mrf.mxu1 }
 0x445   :  { %v2212_v40 = vadd.f32 %v2211_v0, %v2191_v42 }
 0x447   :  { %v2232_v29 = vadd.f32 %v2231_v9, %v2212_v40 }
 0x448   :  { %v2315_v50 = vpop.f32.mrf.mxu2 }
 0x449   :  { %v2251_v1 = vpop.f32.mrf.mxu3 }
 0x44a   :  { %v2252_v35 = vadd.f32 %v2251_v1, %v2232_v29 }
 0x44b   :  { %v2275_v2 = vpop.f32.mrf.mxu0 }
 0x44c   :  { %v2295_v39 = vpop.f32.mrf.mxu1  ;;  %v2338_v52 = vmul.f32 0.001953125, %v2252_v35 }
 0x44d   :  { %v2296_v49 = vadd.f32 %v2295_v39, %v2275_v2 }
 0x44e   :  { %v2340_v12 = vmul.f32 %v2338_v52, %v2338_v52 }
 0x44f   :  { %v2316_v51 = vadd.f32 %v2315_v50, %v2296_v49 }
 0x451   :  { %v2335_v5 = vpop.f32.mrf.mxu3 }
 0x452   :  { %v2336_v56 = vadd.f32 %v2335_v5, %v2316_v51 }
 0x454   :  { %v2339_v8 = vmul.f32 0.001953125, %v2336_v56  ;;  %v7123_v56 = vld [vmem:[%s9809_s1 + $0x90] sm:$0xff] }
 0x456   :  { %v2341_v23 = vsub.f32 %v2339_v8, %v2340_v12 }
 0x458   :  { %v2344_v34 = vadd.f32 1e-05, %v2341_v23 }
 0x45a   :  { %7335 = vrsqrt.f32 %v2344_v34  ;;  %vm2351_vm13 = vweird.f32 %v2344_v34 }
 0x460   :  { %v7336_v38 = vpop.eup %7335 }
 0x461   :  { %v2346_v26 = vmul.f32 %v7336_v38, %v2344_v34  ;;  %vm2352_vm12 = vweird.f32 %v7336_v38 }
 0x462   :  { %vm2353_vm14 = vmor %vm2351_vm13, %vm2352_vm12 }
 0x463   :  { %v2347_v18 = vmul.f32 %v7336_v38, %v2346_v26 }
 0x465   :  { %v2348_v54 = vmul.f32 0.5, %v2347_v18 }
 0x467   :  { %v2349_v11 = vsub.f32 1.5, %v2348_v54  ;;  %v7122_v54 = vld [vmem:[%s9809_s1 + $0xb0] sm:$0xff] }
 0x469   :  { %v2350_v7 = vmul.f32 %v7336_v38, %v2349_v11 }
 0x46b   :  { %v2354_v37 = vsel %vm2353_vm14, %v7336_v38, %v2350_v7 }
 0x46c   :  { %v2355_v61 = vmul.f32 %v7120_v53, %v2354_v37  ;;  %v7132_v37 = vld [vmem:[%s9809_s1 + $0x98] sm:$0xff] }
 0x46e   :  { %2362 = vperm.xlu1 %7332, %v2355_v61   ;;  %v2358_v55 = vmul.f32 %v2355_v61, %v2338_v52 }
 0x470   :  { %v2359_v24 = vsub.f32 %v7121_v6, %v2358_v55 }
 0x472   :  { %2371 = vperm.xlu2 %7330, %v2359_v24  }
 0x4cc   :  { %v2372_v27 = vpop.permute.xlu2 %2371 }
 0x4e0   :  { %v2363_v22 = vpop.permute.xlu1 %2362 }
 0x4e1   :  { %v2366_v4 = vmul.f32 %v2363_v22, %v2171_v20  ;;  %v2367_v3 = vmul.f32 %v2363_v22, %v8311_v48  ;;  %v2368_v43 = vmul.f32 %v2363_v22, %v2173_v19  ;;  %v2365_v32 = vmul.f32 %v2363_v22, %v2170_v30 }
 0x4e3   :  { %v2375_v47 = vadd.f32 %v2372_v27, %v2366_v4  ;;  %v2376_v41 = vadd.f32 %v2372_v27, %v2367_v3  ;;  %v2377_v25 = vadd.f32 %v2372_v27, %v2368_v43  ;;  %v2374_v0 = vadd.f32 %v2372_v27, %v2365_v32  ;;  %v7137_v43 = vld [vmem:[%s9809_s1 + $0xa0] sm:$0xff] }
 0x4e5   :  { %v2379_v17 = vmul.f32 0.1, %v2375_v47  ;;  %v2380_v42 = vmul.f32 0.1, %v2376_v41  ;;  %v2381_v9 = vmul.f32 0.1, %v2377_v25 }
 0x4e6   :  { %v2378_v48 = vmul.f32 0.1, %v2374_v0 }
 0x4e7   :  { %v8323_v40 = vmax.f32 %v2375_v47, %v2379_v17  ;;  %v2384_v29 = vmax.f32 %v2376_v41, %v2380_v42  ;;  %v2385_v1 = vmax.f32 %v2377_v25, %v2381_v9 }
 0x4e8   :  { %v2382_v19 = vmax.f32 %v2374_v0, %v2378_v48  ;;  %v7142_v48 = vld [vmem:[%s9809_s1 + $0xa8] sm:$0xff] }
 0x4e9   :  { %2392 = vrot.lane.b32.xlu1 %v2384_v29, %s7371_s22  ;;  %2390 = vrot.lane.b32.xlu0 %v8323_v40, %s7371_s22 }
 0x4ea   :  { %2394 = vrot.lane.b32.xlu2 %v2385_v1, %s7371_s22 }
 0x4f1   :  { %2574 = vrot.lane.b32.xlu1 %v8323_v40, %s7372_s23  ;;  %2388 = vrot.lane.b32.xlu0 %v2382_v19, %s7371_s22 }
 0x4f2   :  { %2576 = vrot.lane.b32.xlu2 %v2384_v29, %s7372_s23 }
 0x4f9   :  { %2679 = vrot.lane.b32.xlu1 %v8323_v40, %s7373_s28  ;;  %2578 = vrot.lane.b32.xlu0 %v2385_v1, %s7372_s23 }
 0x4fa   :  { %2681 = vrot.lane.b32.xlu2 %v2384_v29, %s7373_s28 }
 0x501   :  { %2683 = vrot.lane.b32.xlu1 %v2385_v1, %s7373_s28  ;;  %2572 = vrot.lane.b32.xlu0 %v2382_v19, %s7372_s23 }
 0x502   :  { %2784 = vrot.lane.b32.xlu2 %v8323_v40, %s7374_s0 }
 0x509   :  { %2677 = vrot.lane.b32.xlu1 %v2382_v19, %s7373_s28  ;;  %2786 = vrot.lane.b32.xlu0 %v2384_v29, %s7374_s0 }
 0x50a   :  { %2788 = vrot.lane.b32.xlu2 %v2385_v1, %s7374_s0 }
 0x511   :  { %2893 = vrot.lane.b32.xlu1 %v2385_v1, %s7375_s29  ;;  %2891 = vrot.lane.b32.xlu0 %v2384_v29, %s7375_s29 }
 0x512   :  { %2782 = vrot.lane.b32.xlu2 %v2382_v19, %s7374_s0 }
 0x519   :  { %2996 = vrot.lane.b32.xlu1 %v2384_v29, %s7376_s30  ;;  %2887 = vrot.lane.b32.xlu0 %v2382_v19, %s7375_s29 }
 0x51a   :  { %2998 = vrot.lane.b32.xlu2 %v2385_v1, %s7376_s30 }
 0x521   :  { %2992 = vrot.lane.b32.xlu1 %v2382_v19, %s7376_s30  ;;  %2889 = vrot.lane.b32.xlu0 %v8323_v40, %s7375_s29 }
 0x522   :  { %3101 = vrot.lane.b32.xlu2 %v2384_v29, %s7377_s6 }
 0x529   :  { %2994 = vrot.lane.b32.xlu1 %v8323_v40, %s7376_s30  ;;  %3103 = vrot.lane.b32.xlu0 %v2385_v1, %s7377_s6 }
 0x52a   :  { %3097 = vrot.lane.b32.xlu2 %v2382_v19, %s7377_s6 }
 0x531   :  { %3208 = vrot.lane.b32.xlu1 %v2385_v1, %s7378_s7  ;;  %3206 = vrot.lane.b32.xlu0 %v2384_v29, %s7378_s7 }
 0x532   :  { %3099 = vrot.lane.b32.xlu2 %v8323_v40, %s7377_s6 }
 0x539   :  { %3204 = vrot.lane.b32.xlu1 %v8323_v40, %s7378_s7  ;;  %3202 = vrot.lane.b32.xlu0 %v2382_v19, %s7378_s7 }
 0x544   :  { %v2395_v30 = vpop.permute.xlu2 %2394 }
 0x54c   :  { %v2577_v20 = vpop.permute.xlu2 %2576 }
 0x554   :  { %v2682_v2 = vpop.permute.xlu2 %2681 }
 0x55b   :  { %v2393_v35 = vpop.permute.xlu1 %2392  ;;  %v2391_v39 = vpop.permute.xlu0 %2390 }
 0x55c   :  { %v2396_v49 = vsel %vm38_vm0, %v2393_v35, %v2395_v30  ;;  %v8367_v50 = vpop.permute.xlu2 %2784  ;;  %v2397_v51 = vsel %vm38_vm0, %v2391_v39, %v2393_v35  ;;  %v9896_v35 = vld [vmem:[#allocation5_spill] sm:$0xff] }
 0x55d   :  { %v2403_v52 = vmul.f32 %v2396_v49, %v7516_v16  ;;  %v2402_v5 = vmul.f32 %v2397_v51, %v7514_v15 }
 0x55f   :  { %2464 = vmatpush.msra.mxu2 %v2402_v5  ;;  %2484 = vmatpush.msra.mxu3 %v2403_v52 }
 0x560   :  { %7126 = vmatmul.msk.f32.vlgmr.msra.gmra.mxu2 %vm57_vm2, %v7123_v56  ;;  %7127 = vmatmul.msk.f32.vlgmr.msra.gmra.mxu3 %vm57_vm2, %v7123_v56 }
 0x561   :  { %2547 = vmatpush.msrb.mxu2 %v2384_v29  ;;  %2567 = vmatpush.msrb.mxu3 %v2385_v1 }
 0x563   :  { %v2575_v12 = vpop.permute.xlu1 %2574  ;;  %v2389_v8 = vpop.permute.xlu0 %2388 }
 0x564   :  { %v2581_v23 = vsel %vm234_vm1, %v2575_v12, %v2577_v20  ;;  %v2398_v15 = vsel %vm38_vm0, %v2389_v8, %v2391_v39  ;;  %v2399_v16 = vsel %vm38_vm0, %v2395_v30, %v2389_v8  ;;  %v2789_v18 = vpop.permute.xlu2 %2788 }
 0x565   :  { %v2586_v34 = vmul.f32 %v2581_v23, %v7534_v28  ;;  %v2400_v38 = vmul.f32 %v2399_v16, %v7510_v13  ;;  %v2401_v26 = vmul.f32 %v2398_v15, %v7512_v14  ;;  %v9898_v23 = vld [vmem:[#allocation6_spill] sm:$0xff]  ;;  %v9899_v16 = vld [vmem:[#allocation7_spill] sm:$0xff] }
 0x567   :  { %2424 = vmatpush.msra.mxu0 %v2400_v38  ;;  %2444 = vmatpush.msra.mxu1 %v2401_v26 }
 0x568   :  { %2648 = vmatpush.msra.mxu2 %v2586_v34  ;;  %7124 = vmatmul.msk.f32.vlgmr.msra.gmra.mxu0 %vm57_vm2, %v7123_v56 }
 0x569   :  { %7125 = vmatmul.msk.f32.vlgmr.msra.gmra.mxu1 %vm57_vm2, %v7123_v56  ;;  %2507 = vmatpush.msrb.mxu0 %v2382_v19 }
 0x56a   :  { %2527 = vmatpush.msrb.mxu1 %v8323_v40  ;;  %7130 = vmatmul.msk.f32.vlgmr.msrb.gmra.mxu2 %vm57_vm2, %v7122_v54 }
 0x56b   :  { %7131 = vmatmul.msk.f32.vlgmr.msrb.gmra.mxu3 %vm57_vm2, %v7122_v54  ;;  %v2680_v13 = vpop.permute.xlu1 %2679  ;;  %v2579_v14 = vpop.permute.xlu0 %2578 }
 0x56c   :  { %v2686_v28 = vsel %vm351_vm3, %v2680_v13, %v2682_v2  ;;  %v2580_v11 = vsel %vm234_vm1, %v2577_v20, %v2579_v14  ;;  %v2783_v61 = vpop.permute.xlu2 %2782 }
 0x56d   :  { %v2691_v53 = vmul.f32 %v2686_v28, %v7556_v36  ;;  %v2587_v7 = vmul.f32 %v2580_v11, %v7549_v33 }
 0x56f   :  { %2668 = vmatpush.msra.mxu3 %v2587_v7  ;;  %2753 = vmatpush.msrb.mxu2 %v2691_v53  ;;  %v9900_v7 = vld [vmem:[#allocation11_spill] sm:$0xff] }
 0x570   :  { %7128 = vmatmul.msk.f32.vlgmr.msrb.gmra.mxu0 %vm57_vm2, %v7122_v54 }
 0x571   :  { %7129 = vmatmul.msk.f32.vlgmr.msrb.gmra.mxu1 %vm57_vm2, %v7122_v54 }
 0x572   :  { %7135 = vmatmul.msk.f32.vlgmr.msra.gmra.mxu2 %vm57_vm2, %v7132_v37 }
 0x573   :  { %7136 = vmatmul.msk.f32.vlgmr.msra.gmra.mxu3 %vm57_vm2, %v7132_v37  ;;  %v2684_v6 = vpop.permute.xlu1 %2683  ;;  %v2573_v55 = vpop.permute.xlu0 %2572 }
 0x574   :  { %v2685_v33 = vsel %vm351_vm3, %v2682_v2, %v2684_v6  ;;  %v2582_v36 = vsel %vm234_vm1, %v2573_v55, %v2575_v12  ;;  %v2583_v24 = vsel %vm234_vm1, %v2579_v14, %v2573_v55  ;;  %v2999_v27 = vpop.permute.xlu2 %2998  ;;  %v9897_v12 = vld [vmem:[#allocation8_spill] sm:$0xff]  ;;  %v9902_v55 = vld [vmem:[#allocation9_spill] sm:$0xff] }
 0x575   :  { %v2692_v22 = vmul.f32 %v2685_v33, %v7577_v46  ;;  %v2584_v4 = vmul.f32 %v2583_v24, %v7573_v44  ;;  %v2585_v3 = vmul.f32 %v2582_v36, %v7575_v45  ;;  %v2792_v44 = vsel %vm468_vm4, %v2783_v61, %v8367_v50  ;;  %v9903_v36 = vld [vmem:[#allocation10_spill] sm:$0xff] }
 0x576   :  { %v2793_v45 = vsel %vm468_vm4, %v2789_v18, %v2783_v61  ;;  %v2795_v1 = vmul.f32 %v2792_v44, %v7615_v63  ;;  %v7147_v63 = vld [vmem:[%s9809_s1 + $0xb8] sm:$0xff] }
 0x577   :  { %2608 = vmatpush.msra.mxu0 %v2584_v4  ;;  %2628 = vmatpush.msra.mxu1 %v2585_v3  ;;  %v2794_v29 = vmul.f32 %v2793_v45, %v7613_v62  ;;  %v9901_v61 = vld [vmem:[#allocation12_spill] sm:$0xff]  ;;  %v9905_v3 = vld [vmem:[#allocation13_spill] sm:$0xff] }
 0x578   :  { %2773 = vmatpush.msrb.mxu3 %v2692_v22  ;;  %7133 = vmatmul.msk.f32.vlgmr.msra.gmra.mxu0 %vm57_vm2, %v7132_v37  ;;  %v9904_v22 = vld [vmem:[#allocation14_spill] sm:$0xff] }
 0x579   :  { %7134 = vmatmul.msk.f32.vlgmr.msra.gmra.mxu1 %vm57_vm2, %v7132_v37 }
 0x57a   :  { %7140 = vmatmul.msk.f32.vlgmr.msrb.gmra.mxu2 %vm57_vm2, %v7137_v43 }
 0x57b   :  { %7141 = vmatmul.msk.f32.vlgmr.msrb.gmra.mxu3 %vm57_vm2, %v7137_v43  ;;  %v2678_v46 = vpop.permute.xlu1 %2677  ;;  %v2787_v32 = vpop.permute.xlu0 %2786 }
 0x57c   :  { %v2687_v47 = vsel %vm351_vm3, %v2678_v46, %v2680_v13  ;;  %v2688_v41 = vsel %vm351_vm3, %v2684_v6, %v2678_v46  ;;  %v2790_v25 = vsel %vm468_vm4, %v2787_v32, %v2789_v18  ;;  %v2791_v17 = vsel %vm468_vm4, %v8367_v50, %v2787_v32  ;;  %v7152_v50 = vld [vmem:[%s9809_s1 + $0xc0] sm:$0xff]  ;;  %v9906_v32 = vld [vmem:[#allocation15_spill] sm:$0xff] }
 0x57d   :  { %v2689_v42 = vmul.f32 %v2688_v41, %v7605_v59  ;;  %v2690_v9 = vmul.f32 %v2687_v47, %v7607_v60  ;;  %v2796_v0 = vmul.f32 %v2791_v17, %v7601_v57  ;;  %v2797_v40 = vmul.f32 %v2790_v25, %v7603_v58  ;;  %v3102_v59 = vpop.permute.xlu2 %3101  ;;  %v7162_v41 = vld [vmem:[%s9809_s1 + $0xd0] sm:$0xff] }
 0x57e   :  { %v9907_v25 = vmov 1.0  }
 0x57f   :  { %2713 = vmatpush.msrb.mxu0 %v2689_v42  ;;  %2733 = vmatpush.msrb.mxu1 %v2690_v9 }
 0x580   :  { %2858 = vmatpush.msra.mxu2 %v2796_v0  ;;  %2878 = vmatpush.msra.mxu3 %v2797_v40 }
 0x581   :  { %7138 = vmatmul.msk.f32.vlgmr.msrb.gmra.mxu0 %vm57_vm2, %v7137_v43  ;;  %7139 = vmatmul.msk.f32.vlgmr.msrb.gmra.mxu1 %vm57_vm2, %v7137_v43 }
 0x582   :  { %2818 = vmatpush.msra.mxu0 %v2794_v29  ;;  %2838 = vmatpush.msra.mxu1 %v2795_v1  ;;  %v9908_v29 = vld [vmem:[#allocation18_spill] sm:$0xff] }
 0x583   :  { %7145 = vmatmul.msk.f32.vlgmr.msra.gmra.mxu2 %vm57_vm2, %v7142_v48  ;;  %7146 = vmatmul.msk.f32.vlgmr.msra.gmra.mxu3 %vm57_vm2, %v7142_v48  ;;  %v2894_v57 = vpop.permute.xlu1 %2893  ;;  %v2892_v58 = vpop.permute.xlu0 %2891 }
 0x584   :  { %v2895_v60 = vsel %vm585_vm5, %v2892_v58, %v2894_v57 }
 0x585   :  { %v2901_v62 = vmul.f32 %v2895_v60, %v7648_v21  ;;  %v3098_v49 = vpop.permute.xlu2 %3097 }
 0x587   :  { %2963 = vmatpush.msrb.mxu2 %v2901_v62 }
 0x589   :  { %7143 = vmatmul.msk.f32.vlgmr.msra.gmra.mxu0 %vm57_vm2, %v7142_v48  ;;  %7144 = vmatmul.msk.f32.vlgmr.msra.gmra.mxu1 %vm57_vm2, %v7142_v48  ;;  %v9909_v48 = vld [vmem:[#allocation17_spill] sm:$0xff] }
 0x58b   :  { %7150 = vmatmul.msk.f32.vlgmr.msrb.gmra.mxu2 %vm57_vm2, %v7147_v63  ;;  %v2997_v19 = vpop.permute.xlu1 %2996  ;;  %v2888_v30 = vpop.permute.xlu0 %2887 }
 0x58c   :  { %v3000_v20 = vsel %vm702_vm6, %v2997_v19, %v2999_v27  ;;  %v2898_v2 = vsel %vm585_vm5, %v2894_v57, %v2888_v30 }
 0x58d   :  { %v3006_v21 = vmul.f32 %v3000_v20, %v7666_v31  ;;  %v2902_v39 = vmul.f32 %v2898_v2, %v9896_v35  ;;  %v3100_v38 = vpop.permute.xlu2 %3099 }
 0x58e   :  { %v3106_v26 = vsel %vm819_vm7, %v3100_v38, %v3102_v59  ;;  %v3107_v18 = vsel %vm819_vm7, %v3098_v49, %v3100_v38 }
 0x58f   :  { %2983 = vmatpush.msrb.mxu3 %v2902_v39  ;;  %3068 = vmatpush.msra.mxu2 %v3006_v21  ;;  %v3109_v4 = vmul.f32 %v3107_v18, %v9904_v22  ;;  %v3110_v43 = vmul.f32 %v3106_v26, %v9905_v3 }
 0x590   :  { %7151 = vmatmul.msk.f32.vlgmr.msrb.gmra.mxu3 %vm57_vm2, %v7147_v63 }
 0x593   :  { %7155 = vmatmul.msk.f32.vlgmr.msra.gmra.mxu2 %vm57_vm2, %v7152_v50  ;;  %v2993_v51 = vpop.permute.xlu1 %2992  ;;  %v2890_v52 = vpop.permute.xlu0 %2889 }
 0x594   :  { %v3003_v5 = vsel %vm702_vm6, %v2999_v27, %v2993_v51  ;;  %v2896_v31 = vsel %vm585_vm5, %v2890_v52, %v2892_v58  ;;  %v2897_v56 = vsel %vm585_vm5, %v2888_v30, %v2890_v52  ;;  %v7157_v27 = vld [vmem:[%s9809_s1 + $0xc8] sm:$0xff]  ;;  %v9910_v58 = vld [vmem:[#allocation16_spill] sm:$0xff] }
 0x595   :  { %v3007_v8 = vmul.f32 %v3003_v5, %v9897_v12  ;;  %v2899_v15 = vmul.f32 %v2897_v56, %v9898_v23  ;;  %v2900_v34 = vmul.f32 %v2896_v31, %v9899_v16 }
 0x597   :  { %2923 = vmatpush.msrb.mxu0 %v2899_v15  ;;  %2943 = vmatpush.msrb.mxu1 %v2900_v34 }
 0x598   :  { %3088 = vmatpush.msra.mxu3 %v3007_v8  ;;  %7148 = vmatmul.msk.f32.vlgmr.msrb.gmra.mxu0 %vm57_vm2, %v7147_v63 }
 0x599   :  { %7149 = vmatmul.msk.f32.vlgmr.msrb.gmra.mxu1 %vm57_vm2, %v7147_v63  ;;  %7156 = vmatmul.msk.f32.vlgmr.msra.gmra.mxu3 %vm57_vm2, %v7152_v50 }
 0x59b   :  { %v2995_v54 = vpop.permute.xlu1 %2994  ;;  %v3104_v13 = vpop.permute.xlu0 %3103 }
 0x59c   :  { %v3001_v14 = vsel %vm702_vm6, %v2995_v54, %v2997_v19  ;;  %v3002_v28 = vsel %vm702_vm6, %v2993_v51, %v2995_v54  ;;  %v3105_v11 = vsel %vm819_vm7, %v3102_v59, %v3104_v13  ;;  %v3108_v53 = vsel %vm819_vm7, %v3104_v13, %v3098_v49 }
 0x59d   :  { %v3004_v37 = vmul.f32 %v3002_v28, %v9900_v7  ;;  %v3005_v6 = vmul.f32 %v3001_v14, %v9901_v61  ;;  %v3111_v33 = vmul.f32 %v3105_v11, %v9902_v55  ;;  %v3112_v24 = vmul.f32 %v3108_v53, %v9903_v36 }
 0x59f   :  { %3028 = vmatpush.msra.mxu0 %v3004_v37  ;;  %3048 = vmatpush.msra.mxu1 %v3005_v6 }
 0x5a0   :  { %3173 = vmatpush.msrb.mxu2 %v3111_v33  ;;  %3193 = vmatpush.msrb.mxu3 %v3112_v24 }
 0x5a1   :  { %7153 = vmatmul.msk.f32.vlgmr.msra.gmra.mxu0 %vm57_vm2, %v7152_v50  ;;  %7154 = vmatmul.msk.f32.vlgmr.msra.gmra.mxu1 %vm57_vm2, %v7152_v50 }
 0x5a2   :  { %3133 = vmatpush.msrb.mxu0 %v3109_v4  ;;  %3153 = vmatpush.msrb.mxu1 %v3110_v43 }
 0x5a3   :  { %7160 = vmatmul.msk.f32.vlgmr.msrb.gmra.mxu2 %vm57_vm2, %v7157_v27  ;;  %7161 = vmatmul.msk.f32.vlgmr.msrb.gmra.mxu3 %vm57_vm2, %v7157_v27  ;;  %v3209_v44 = vpop.permute.xlu1 %3208  ;;  %v3207_v45 = vpop.permute.xlu0 %3206 }
 0x5a4   :  { %v3210_v46 = vsel %vm936_vm8, %v3207_v45, %v3209_v44 }
 0x5a5   :  { %v3216_v47 = vmul.f32 %v3210_v46, %v9906_v32 }
 0x5a7   :  { %3278 = vmatpush.msra.mxu2 %v3216_v47 }
 0x5a9   :  { %3347 = vmatpush.msrb.mxu2 %v9907_v25  ;;  %7158 = vmatmul.msk.f32.vlgmr.msrb.gmra.mxu0 %vm57_vm2, %v7157_v27 }
 0x5aa   :  { %7159 = vmatmul.msk.f32.vlgmr.msrb.gmra.mxu1 %vm57_vm2, %v7157_v27 }
 0x5ab   :  { %3348 = vmatpush.msrb.mxu2 %v9907_v25  ;;  %v3205_v17 = vpop.permute.xlu1 %3204  ;;  %v3203_v42 = vpop.permute.xlu0 %3202 }
 0x5ac   :  { %7165 = vmatmul.msk.f32.vlgmr.msra.gmra.mxu2 %vm57_vm2, %v7162_v41  ;;  %v3211_v9 = vsel %vm936_vm8, %v3205_v17, %v3207_v45  ;;  %v3212_v0 = vsel %vm936_vm8, %v3203_v42, %v3205_v17  ;;  %v3213_v40 = vsel %vm936_vm8, %v3209_v44, %v3203_v42 }
 0x5ad   :  { %3349 = vmatpush.msrb.mxu2 %v9907_v25  ;;  %v3215_v1 = vmul.f32 %v3211_v9, %v9908_v29  ;;  %v3214_v57 = vmul.f32 %v3212_v0, %v9909_v48  ;;  %v3217_v59 = vmul.f32 %v3213_v40, %v9910_v58 }
 0x5af   :  { %3350 = vmatpush.msrb.mxu2 %v9907_v25  ;;  %3238 = vmatpush.msra.mxu0 %v3214_v57 }
 0x5b0   :  { %3258 = vmatpush.msra.mxu1 %v3215_v1  ;;  %3298 = vmatpush.msra.mxu3 %v3217_v59 }
 0x5b1   :  { %3307 = vmatpush.msrb.mxu0 %v9907_v25  ;;  %7166 = vmatmul.msk.f32.vlgmr.msra.gmra.mxu3 %vm57_vm2, %v7162_v41 }
 0x5b2   :  { %7163 = vmatmul.msk.f32.vlgmr.msra.gmra.mxu0 %vm57_vm2, %v7162_v41  ;;  %7164 = vmatmul.msk.f32.vlgmr.msra.gmra.mxu1 %vm57_vm2, %v7162_v41 }
 0x5b3   :  { %3327 = vmatpush.msrb.mxu1 %v9907_v25  ;;  %3308 = vmatpush.msrb.mxu0 %v9907_v25 }
 0x5b4   :  { %3351 = vmatpush.msrb.mxu2 %v9907_v25  ;;  %3367 = vmatpush.msrb.mxu3 %v9907_v25 }
 0x5b5   :  { %3328 = vmatpush.msrb.mxu1 %v9907_v25  ;;  %3309 = vmatpush.msrb.mxu0 %v9907_v25 }
 0x5b6   :  { %3352 = vmatpush.msrb.mxu2 %v9907_v25  ;;  %3368 = vmatpush.msrb.mxu3 %v9907_v25 }
 0x5b7   :  { %3329 = vmatpush.msrb.mxu1 %v9907_v25  ;;  %3310 = vmatpush.msrb.mxu0 %v9907_v25 }
 0x5b8   :  { %3353 = vmatpush.msrb.mxu2 %v9907_v25  ;;  %3369 = vmatpush.msrb.mxu3 %v9907_v25 }
 0x5b9   :  { %3330 = vmatpush.msrb.mxu1 %v9907_v25  ;;  %3311 = vmatpush.msrb.mxu0 %v9907_v25 }
 0x5ba   :  { %3354 = vmatpush.msrb.mxu2 %v9907_v25  ;;  %3370 = vmatpush.msrb.mxu3 %v9907_v25 }
 0x5bb   :  { %3331 = vmatpush.msrb.mxu1 %v9907_v25  ;;  %3312 = vmatpush.msrb.mxu0 %v9907_v25 }
 0x5bc   :  { %3355 = vmatpush.msrb.mxu2 %v9907_v25  ;;  %3371 = vmatpush.msrb.mxu3 %v9907_v25 }
 0x5bd   :  { %3332 = vmatpush.msrb.mxu1 %v9907_v25  ;;  %3313 = vmatpush.msrb.mxu0 %v9907_v25 }
 0x5be   :  { %3356 = vmatpush.msrb.mxu2 %v9907_v25  ;;  %3372 = vmatpush.msrb.mxu3 %v9907_v25 }
 0x5bf   :  { %3333 = vmatpush.msrb.mxu1 %v9907_v25  ;;  %3314 = vmatpush.msrb.mxu0 %v9907_v25 }
 0x5c0   :  { %3357 = vmatpush.msrb.mxu2 %v9907_v25  ;;  %3373 = vmatpush.msrb.mxu3 %v9907_v25 }
 0x5c1   :  { %3334 = vmatpush.msrb.mxu1 %v9907_v25  ;;  %3315 = vmatpush.msrb.mxu0 %v9907_v25 }
 0x5c2   :  { %3358 = vmatpush.msrb.mxu2 %v9907_v25  ;;  %3374 = vmatpush.msrb.mxu3 %v9907_v25 }
 0x5c3   :  { %3335 = vmatpush.msrb.mxu1 %v9907_v25  ;;  %3316 = vmatpush.msrb.mxu0 %v9907_v25 }
 0x5c4   :  { %3359 = vmatpush.msrb.mxu2 %v9907_v25  ;;  %3375 = vmatpush.msrb.mxu3 %v9907_v25 }
 0x5c5   :  { %3336 = vmatpush.msrb.mxu1 %v9907_v25  ;;  %3317 = vmatpush.msrb.mxu0 %v9907_v25 }
 0x5c6   :  { %3360 = vmatpush.msrb.mxu2 %v9907_v25  ;;  %3376 = vmatpush.msrb.mxu3 %v9907_v25 }
 0x5c7   :  { %3337 = vmatpush.msrb.mxu1 %v9907_v25  ;;  %3318 = vmatpush.msrb.mxu0 %v9907_v25 }
 0x5c8   :  { %3361 = vmatpush.msrb.mxu2 %v9907_v25  ;;  %3377 = vmatpush.msrb.mxu3 %v9907_v25 }
 0x5c9   :  { %3338 = vmatpush.msrb.mxu1 %v9907_v25  ;;  %3319 = vmatpush.msrb.mxu0 %v9907_v25 }
 0x5ca   :  { %3362 = vmatpush.msrb.mxu2 %v9907_v25  ;;  %3378 = vmatpush.msrb.mxu3 %v9907_v25 }
 0x5cb   :  { %3339 = vmatpush.msrb.mxu1 %v9907_v25  ;;  %3320 = vmatpush.msrb.mxu0 %v9907_v25 }
 0x5cc   :  { %3431 = vmatpush.msra.mxu2 %v9907_v25  ;;  %3379 = vmatpush.msrb.mxu3 %v9907_v25 }
 0x5cd   :  { %3340 = vmatpush.msrb.mxu1 %v9907_v25  ;;  %3321 = vmatpush.msrb.mxu0 %v9907_v25 }
 0x5ce   :  { %3432 = vmatpush.msra.mxu2 %v9907_v25  ;;  %3380 = vmatpush.msrb.mxu3 %v9907_v25 }
 0x5cf   :  { %3341 = vmatpush.msrb.mxu1 %v9907_v25  ;;  %3322 = vmatpush.msrb.mxu0 %v9907_v25 }
 0x5d0   :  { %3433 = vmatpush.msra.mxu2 %v9907_v25  ;;  %3381 = vmatpush.msrb.mxu3 %v9907_v25 }
 0x5d1   :  { %3342 = vmatpush.msrb.mxu1 %v9907_v25  ;;  %3391 = vmatpush.msra.mxu0 %v9907_v25 }
 0x5d2   :  { %3434 = vmatpush.msra.mxu2 %v9907_v25  ;;  %3382 = vmatpush.msrb.mxu3 %v9907_v25 }
 0x5d3   :  { %3411 = vmatpush.msra.mxu1 %v9907_v25  ;;  %3392 = vmatpush.msra.mxu0 %v9907_v25 }
 0x5d4   :  { %3435 = vmatpush.msra.mxu2 %v9907_v25  ;;  %3451 = vmatpush.msra.mxu3 %v9907_v25 }
 0x5d5   :  { %3412 = vmatpush.msra.mxu1 %v9907_v25  ;;  %3393 = vmatpush.msra.mxu0 %v9907_v25 }
 0x5d6   :  { %3436 = vmatpush.msra.mxu2 %v9907_v25  ;;  %3452 = vmatpush.msra.mxu3 %v9907_v25 }
 0x5d7   :  { %3413 = vmatpush.msra.mxu1 %v9907_v25  ;;  %3394 = vmatpush.msra.mxu0 %v9907_v25 }
 0x5d8   :  { %3437 = vmatpush.msra.mxu2 %v9907_v25  ;;  %3453 = vmatpush.msra.mxu3 %v9907_v25 }
 0x5d9   :  { %3414 = vmatpush.msra.mxu1 %v9907_v25  ;;  %3395 = vmatpush.msra.mxu0 %v9907_v25 }
 0x5da   :  { %3438 = vmatpush.msra.mxu2 %v9907_v25  ;;  %3454 = vmatpush.msra.mxu3 %v9907_v25 }
 0x5db   :  { %3415 = vmatpush.msra.mxu1 %v9907_v25  ;;  %3396 = vmatpush.msra.mxu0 %v9907_v25 }
 0x5dc   :  { %3439 = vmatpush.msra.mxu2 %v9907_v25  ;;  %3455 = vmatpush.msra.mxu3 %v9907_v25 }
 0x5dd   :  { %3416 = vmatpush.msra.mxu1 %v9907_v25  ;;  %3397 = vmatpush.msra.mxu0 %v9907_v25 }
 0x5de   :  { %3440 = vmatpush.msra.mxu2 %v9907_v25  ;;  %3456 = vmatpush.msra.mxu3 %v9907_v25 }
 0x5df   :  { %3417 = vmatpush.msra.mxu1 %v9907_v25  ;;  %3398 = vmatpush.msra.mxu0 %v9907_v25 }
 0x5e0   :  { %3441 = vmatpush.msra.mxu2 %v9907_v25  ;;  %3457 = vmatpush.msra.mxu3 %v9907_v25 }
 0x5e1   :  { %3418 = vmatpush.msra.mxu1 %v9907_v25  ;;  %3399 = vmatpush.msra.mxu0 %v9907_v25 }
 0x5e2   :  { %3442 = vmatpush.msra.mxu2 %v9907_v25  ;;  %3458 = vmatpush.msra.mxu3 %v9907_v25 }
 0x5e3   :  { %3419 = vmatpush.msra.mxu1 %v9907_v25  ;;  %3400 = vmatpush.msra.mxu0 %v9907_v25  ;;  %v2466_v60 = vpop.f32.mrf.mxu2  ;;  %v2486_v19 = vpop.f32.mrf.mxu3 }
 0x5e4   :  { %3443 = vmatpush.msra.mxu2 %v9907_v25  ;;  %3459 = vmatpush.msra.mxu3 %v9907_v25 }
 0x5e5   :  { %3420 = vmatpush.msra.mxu1 %v9907_v25  ;;  %3401 = vmatpush.msra.mxu0 %v9907_v25  ;;  %v2426_v62 = vpop.f32.mrf.mxu0 }
 0x5e6   :  { %v2446_v63 = vpop.f32.mrf.mxu1  ;;  %3444 = vmatpush.msra.mxu2 %v9907_v25  ;;  %3460 = vmatpush.msra.mxu3 %v9907_v25 }
 0x5e7   :  { %3421 = vmatpush.msra.mxu1 %v9907_v25  ;;  %3402 = vmatpush.msra.mxu0 %v9907_v25 }
 0x5e8   :  { %3445 = vmatpush.msra.mxu2 %v9907_v25  ;;  %3461 = vmatpush.msra.mxu3 %v9907_v25 }
 0x5e9   :  { %3422 = vmatpush.msra.mxu1 %v9907_v25  ;;  %3403 = vmatpush.msra.mxu0 %v9907_v25 }
 0x5ea   :  { %3446 = vmatpush.msra.mxu2 %v9907_v25  ;;  %3462 = vmatpush.msra.mxu3 %v9907_v25 }
 0x5eb   :  { %3423 = vmatpush.msra.mxu1 %v9907_v25  ;;  %3404 = vmatpush.msra.mxu0 %v9907_v25 }
 0x5ec   :  { %3463 = vmatpush.msra.mxu3 %v9907_v25 }
 0x5ed   :  { %3424 = vmatpush.msra.mxu1 %v9907_v25  ;;  %3405 = vmatpush.msra.mxu0 %v9907_v25  ;;  %v2549_v30 = vpop.f32.mrf.mxu2  ;;  %v2509_v20 = vpop.f32.mrf.mxu0 }
 0x5ee   :  { %3464 = vmatpush.msra.mxu3 %v9907_v25  ;;  %v2529_v2 = vpop.f32.mrf.mxu1  ;;  %v2569_v21 = vpop.f32.mrf.mxu3  ;;  %v2550_v13 = vadd.f32 %v2549_v30, %v2466_v60  ;;  %v2510_v14 = vadd.f32 %v2509_v20, %v2426_v62 }
 0x5ef   :  { %3425 = vmatpush.msra.mxu1 %v9907_v25  ;;  %3406 = vmatpush.msra.mxu0 %v9907_v25  ;;  %v2530_v28 = vadd.f32 %v2529_v2, %v2446_v63  ;;  %v2570_v6 = vadd.f32 %v2569_v21, %v2486_v19 }
 0x5f0   :  { %3465 = vmatpush.msra.mxu3 %v9907_v25 }
 0x5f1   :  { %3426 = vmatpush.msra.mxu1 %v9907_v25 }
 0x5f2   :  { %3466 = vmatpush.msra.mxu3 %v9907_v25 }
 0x5f5   :  { %v2650_v35 = vpop.f32.mrf.mxu2  ;;  %v2610_v39 = vpop.f32.mrf.mxu0 }
 0x5f6   :  { %v2630_v49 = vpop.f32.mrf.mxu1  ;;  %v2670_v50 = vpop.f32.mrf.mxu3  ;;  %v2675_v11 = vadd.f32 %v2650_v35, %v2550_v13  ;;  %v2673_v7 = vadd.f32 %v2610_v39, %v2510_v14 }
 0x5f7   :  { %v2674_v37 = vadd.f32 %v2630_v49, %v2530_v28  ;;  %v2676_v44 = vadd.f32 %v2670_v50, %v2570_v6 }
 0x5fd   :  { %v2755_v51 = vpop.f32.mrf.mxu2 }
 0x5fe   :  { %v2715_v52 = vpop.f32.mrf.mxu0  ;;  %v2735_v5 = vpop.f32.mrf.mxu1  ;;  %v2780_v61 = vadd.f32 %v2755_v51, %v2675_v11 }
 0x5ff   :  { %v2775_v31 = vpop.f32.mrf.mxu3  ;;  %v2778_v55 = vadd.f32 %v2715_v52, %v2673_v7  ;;  %v2779_v33 = vadd.f32 %v2735_v5, %v2674_v37 }
 0x600   :  { %v2781_v47 = vadd.f32 %v2775_v31, %v2676_v44 }
 0x606   :  { %v2860_v56 = vpop.f32.mrf.mxu2  ;;  %v2820_v12 = vpop.f32.mrf.mxu0 }
 0x607   :  { %v2840_v8 = vpop.f32.mrf.mxu1  ;;  %v2880_v23 = vpop.f32.mrf.mxu3  ;;  %v2885_v24 = vadd.f32 %v2860_v56, %v2780_v61  ;;  %v2883_v3 = vadd.f32 %v2820_v12, %v2778_v55  ;;  %v7167_v61 = vld [vmem:[%s9810_s2 + $0x10] sm:$0xff] }
 0x608   :  { %v2884_v43 = vadd.f32 %v2840_v8, %v2779_v33  ;;  %v2886_v0 = vadd.f32 %v2880_v23, %v2781_v47 }
 0x60e   :  { %v2965_v15 = vpop.f32.mrf.mxu2 }
 0x60f   :  { %v2990_v27 = vadd.f32 %v2965_v15, %v2885_v24 }
 0x613   :  { %v2985_v38 = vpop.f32.mrf.mxu3 }
 0x614   :  { %v2991_v59 = vadd.f32 %v2985_v38, %v2886_v0 }
 0x615   :  { %v2925_v16 = vpop.f32.mrf.mxu0 }
 0x616   :  { %v2945_v34 = vpop.f32.mrf.mxu1  ;;  %v3070_v26 = vpop.f32.mrf.mxu2  ;;  %v2988_v45 = vadd.f32 %v2925_v16, %v2883_v3 }
 0x617   :  { %v2989_v46 = vadd.f32 %v2945_v34, %v2884_v43  ;;  %v3095_v32 = vadd.f32 %v3070_v26, %v2990_v27 }
 0x61c   :  { %v3090_v53 = vpop.f32.mrf.mxu3 }
 0x61d   :  { %v3096_v63 = vadd.f32 %v3090_v53, %v2991_v59 }
 0x61e   :  { %v3030_v18 = vpop.f32.mrf.mxu0  ;;  %v3050_v54 = vpop.f32.mrf.mxu1 }
 0x61f   :  { %v3093_v41 = vadd.f32 %v3030_v18, %v2988_v45  ;;  %v3094_v17 = vadd.f32 %v3050_v54, %v2989_v46 }
 0x626   :  { %v3175_v36 = vpop.f32.mrf.mxu2  ;;  %v3135_v22 = vpop.f32.mrf.mxu0 }
 0x627   :  { %v3155_v4 = vpop.f32.mrf.mxu1  ;;  %v3200_v42 = vadd.f32 %v3175_v36, %v3095_v32  ;;  %v3195_v9 = vpop.f32.mrf.mxu3  ;;  %v3198_v40 = vadd.f32 %v3135_v22, %v3093_v41  ;;  %v7168_v36 = vld [vmem:[%s9811_s3 + $0x10] sm:$0xff] }
 0x628   :  { %v3199_v29 = vadd.f32 %v3155_v4, %v3094_v17  ;;  %v3201_v19 = vadd.f32 %v3195_v9, %v3096_v63 }
 0x62f   :  { %v3280_v1 = vpop.f32.mrf.mxu2  ;;  %v3240_v57 = vpop.f32.mrf.mxu0 }
 0x630   :  { %v3305_v48 = vadd.f32 %v3280_v1, %v3200_v42  ;;  %v3260_v58 = vpop.f32.mrf.mxu1  ;;  %v3303_v60 = vadd.f32 %v3240_v57, %v3198_v40 }
 0x631   :  { %v3304_v62 = vadd.f32 %v3260_v58, %v3199_v29 }
 0x632   :  { %3363 = vmatmul.f32.vlgmr.msrb.gmra.mxu2 %v3305_v48  ;;  %3323 = vmatmul.f32.vlgmr.msrb.gmra.mxu0 %v3303_v60  ;;  %v3389_v2 = vmul.f32 %v3305_v48, %v3305_v48  ;;  %v3387_v21 = vmul.f32 %v3303_v60, %v3303_v60 }
 0x633   :  { %3343 = vmatmul.f32.vlgmr.msrb.gmra.mxu1 %v3304_v62  ;;  %v3388_v35 = vmul.f32 %v3304_v62, %v3304_v62 }
 0x634   :  { %v3300_v30 = vpop.f32.mrf.mxu3 }
 0x635   :  { %v3306_v20 = vadd.f32 %v3300_v30, %v3201_v19 }
 0x637   :  { %3383 = vmatmul.f32.vlgmr.msrb.gmra.mxu3 %v3306_v20  ;;  %v3390_v39 = vmul.f32 %v3306_v20, %v3306_v20 }
 0x63a   :  { %3447 = vmatmul.f32.vlgmr.msra.gmra.mxu2 %v3389_v2  ;;  %3407 = vmatmul.f32.vlgmr.msra.gmra.mxu0 %v3387_v21 }
 0x63b   :  { %3427 = vmatmul.f32.vlgmr.msra.gmra.mxu1 %v3388_v35 }
 0x63f   :  { %3467 = vmatmul.f32.vlgmr.msra.gmra.mxu3 %v3390_v39  ;;  %v7170_v39 = vld [vmem:[%s9809_s1 + $0xd8] sm:$0xff] }
 0x6af   :  { %v3324_v49 = vpop.f32.mrf.mxu0 }
 0x6b0   :  { %v3344_v50 = vpop.f32.mrf.mxu1 }
 0x6b1   :  { %v3345_v52 = vadd.f32 %v3344_v50, %v3324_v49  ;;  %v7179_v50 = vld [vmem:[%s9812_s4 + $0x1] ss:$8 sm:$0xf] }
 0x6b5   :  { %v3364_v51 = vpop.f32.mrf.mxu2 }
 0x6b6   :  { %v3365_v31 = vadd.f32 %v3364_v51, %v3345_v52  ;;  %v8744_v52 = vperm.slane %v7179_v50, 2 }
 0x6b7   :  { %v3408_v56 = vpop.f32.mrf.mxu0 }
 0x6b8   :  { %v3428_v12 = vpop.f32.mrf.mxu1 }
 0x6b9   :  { %v3429_v15 = vadd.f32 %v3428_v12, %v3408_v56 }
 0x6ba   :  { %v3384_v5 = vpop.f32.mrf.mxu3 }
 0x6bb   :  { %v3385_v8 = vadd.f32 %v3384_v5, %v3365_v31 }
 0x6bd   :  { %v3448_v23 = vpop.f32.mrf.mxu2  ;;  %v3471_v16 = vmul.f32 0.001953125, %v3385_v8 }
 0x6be   :  { %v3449_v34 = vadd.f32 %v3448_v23, %v3429_v15 }
 0x6bf   :  { %v3473_v18 = vmul.f32 %v3471_v16, %v3471_v16 }
 0x6c2   :  { %v3468_v38 = vpop.f32.mrf.mxu3 }
 0x6c3   :  { %v3469_v26 = vadd.f32 %v3468_v38, %v3449_v34 }
 0x6c5   :  { %v3472_v54 = vmul.f32 0.001953125, %v3469_v26  ;;  %v7169_v26 = vld [vmem:[%s9809_s1 + $0xf8] sm:$0xff] }
 0x6c7   :  { %v3474_v13 = vsub.f32 %v3472_v54, %v3473_v18  ;;  %v7185_v18 = vld [vmem:[%s9812_s4 + $0x2] ss:$8 sm:$0xf]  ;;  %v8766_v54 = vperm.slane %v7179_v50, 3 }
 0x6c9   :  { %v3477_v14 = vadd.f32 1e-05, %v3474_v13  ;;  %v8770_v13 = vperm.slane %v7185_v18, 2 }
 0x6cb   :  { %7337 = vrsqrt.f32 %v3477_v14  ;;  %vm3484_vm9 = vweird.f32 %v3477_v14 }
 0x6d1   :  { %v7338_v28 = vpop.eup %7337 }
 0x6d2   :  { %v3479_v11 = vmul.f32 %v7338_v28, %v3477_v14  ;;  %vm3485_vm15 = vweird.f32 %v7338_v28  ;;  %v8772_v14 = vperm.slane %v7185_v18, 3 }
 0x6d3   :  { %vm3486_vm10 = vmor %vm3484_vm9, %vm3485_vm15 }
 0x6d4   :  { %v3480_v53 = vmul.f32 %v7338_v28, %v3479_v11 }
 0x6d6   :  { %v3481_v7 = vmul.f32 0.5, %v3480_v53 }
 0x6d8   :  { %v3482_v37 = vsub.f32 1.5, %v3481_v7 }
 0x6da   :  { %v3483_v6 = vmul.f32 %v7338_v28, %v3482_v37 }
 0x6dc   :  { %v3487_v55 = vsel %vm3486_vm10, %v7338_v28, %v3483_v6 }
 0x6dd   :  { %v3488_v33 = vmul.f32 %v7167_v61, %v3487_v55 }
 0x6df   :  { %3495 = vperm.xlu2 %7330, %v3488_v33   ;;  %v3491_v24 = vmul.f32 %v3488_v33, %v3471_v16  ;;  %v7180_v33 = vld [vmem:[%s9809_s1 + $0xe0] sm:$0xff] }
 0x6e1   :  { %v3492_v22 = vsub.f32 %v7168_v36, %v3491_v24  ;;  %v8793_v24 = vperm.slane %v7179_v50, 0 }
 0x6e3   :  { %3504 = vperm.xlu0 %7331, %v3492_v22   ;;  %v8795_v22 = vperm.slane %v7179_v50, 1 }
 0x739   :  { %v3496_v4 = vpop.permute.xlu2 %3495 }
 0x73a   :  { %v3498_v3 = vmul.f32 %v3496_v4, %v3303_v60  ;;  %v3499_v43 = vmul.f32 %v3496_v4, %v3304_v62  ;;  %v3500_v27 = vmul.f32 %v3496_v4, %v3305_v48  ;;  %v3501_v44 = vmul.f32 %v3496_v4, %v3306_v20  ;;  %v3525_v60 = vld [vmem:[%s9812_s4] ss:$8 sm:$0xf] }
 0x73b   :  { %v8724_v62 = vperm.slane %v3525_v60, 2  ;;  %v8726_v63 = vperm.slane %v3525_v60, 3  ;;  %v8742_v51 = vperm.slane %v3525_v60, 0  ;;  %v8746_v5 = vperm.slane %v3525_v60, 1 }
 0x73c   :  { %v8797_v4 = vperm.slane %v7185_v18, 0 }
 0x755   :  { %v3505_v45 = vpop.permute.xlu0 %3504 }
 0x756   :  { %v3507_v46 = vadd.f32 %v3505_v45, %v3498_v3  ;;  %v3508_v32 = vadd.f32 %v3505_v45, %v3499_v43  ;;  %v3509_v47 = vadd.f32 %v3505_v45, %v3500_v27  ;;  %v3510_v41 = vadd.f32 %v3505_v45, %v3501_v44 }
 0x757   :  { %v8799_v3 = vperm.slane %v7185_v18, 1 }
 0x758   :  { %v3511_v17 = vmul.f32 0.1, %v3507_v46  ;;  %v3512_v42 = vmul.f32 0.1, %v3508_v32  ;;  %v3513_v9 = vmul.f32 0.1, %v3509_v47 }
 0x759   :  { %v3514_v0 = vmul.f32 0.1, %v3510_v41 }
 0x75a   :  { %v8663_v40 = vmax.f32 %v3507_v46, %v3511_v17  ;;  %v8665_v29 = vmax.f32 %v3508_v32, %v3512_v42  ;;  %v3517_v1 = vmax.f32 %v3509_v47, %v3513_v9  ;;  %v7191_v9 = vld [vmem:[%s9812_s4 + $0x3] ss:$8 sm:$0xf] }
 0x75b   :  { %v3518_v57 = vmax.f32 %v3510_v41, %v3514_v0  ;;  %v7186_v0 = vld [vmem:[%s9809_s1 + $0xe8] sm:$0xff] }
 0x75c   :  { %3519 = vst [vmem:[#allocation2] sm:$0xff] %v8663_v40  ;;  %3530 = vrot.lane.b32.xlu2 %v3517_v1, %s7371_s22  ;;  %3528 = vrot.lane.b32.xlu1 %v8665_v29, %s7371_s22 }
 0x75d   :  { %3520 = vst [vmem:[#allocation2 + $0x8] sm:$0xff] %v8665_v29  ;;  %3532 = vrot.lane.b32.xlu0 %v3518_v57, %s7371_s22 }
 0x75e   :  { %3521 = vst [vmem:[#allocation2 + $0x10] sm:$0xff] %v3517_v1 }
 0x75f   :  { %3522 = vst [vmem:[#allocation2 + $0x18] sm:$0xff] %v3518_v57 }
 0x764   :  { %3722 = vrot.lane.b32.xlu2 %v8665_v29, %s7372_s23  ;;  %3526 = vrot.lane.b32.xlu1 %v8663_v40, %s7371_s22 }
 0x765   :  { %3724 = vrot.lane.b32.xlu0 %v3517_v1, %s7372_s23 }
 0x76c   :  { %3837 = vrot.lane.b32.xlu2 %v8665_v29, %s7373_s28  ;;  %3726 = vrot.lane.b32.xlu1 %v3518_v57, %s7372_s23 }
 0x76d   :  { %3839 = vrot.lane.b32.xlu0 %v3517_v1, %s7373_s28 }
 0x774   :  { %3841 = vrot.lane.b32.xlu2 %v3518_v57, %s7373_s28  ;;  %3720 = vrot.lane.b32.xlu1 %v8663_v40, %s7372_s23 }
 0x775   :  { %3952 = vrot.lane.b32.xlu0 %v8665_v29, %s7374_s0 }
 0x77c   :  { %3835 = vrot.lane.b32.xlu2 %v8663_v40, %s7373_s28  ;;  %3954 = vrot.lane.b32.xlu1 %v3517_v1, %s7374_s0 }
 0x77d   :  { %3956 = vrot.lane.b32.xlu0 %v3518_v57, %s7374_s0 }
 0x784   :  { %4071 = vrot.lane.b32.xlu2 %v3518_v57, %s7375_s29  ;;  %4069 = vrot.lane.b32.xlu1 %v3517_v1, %s7375_s29 }
 0x785   :  { %3950 = vrot.lane.b32.xlu0 %v8663_v40, %s7374_s0 }
 0x78c   :  { %4184 = vrot.lane.b32.xlu2 %v3517_v1, %s7376_s30  ;;  %4065 = vrot.lane.b32.xlu1 %v8663_v40, %s7375_s29 }
 0x78d   :  { %4186 = vrot.lane.b32.xlu0 %v3518_v57, %s7376_s30 }
 0x794   :  { %4180 = vrot.lane.b32.xlu2 %v8663_v40, %s7376_s30  ;;  %4067 = vrot.lane.b32.xlu1 %v8665_v29, %s7375_s29 }
 0x795   :  { %4299 = vrot.lane.b32.xlu0 %v3517_v1, %s7377_s6 }
 0x79c   :  { %4182 = vrot.lane.b32.xlu2 %v8665_v29, %s7376_s30  ;;  %4301 = vrot.lane.b32.xlu1 %v3518_v57, %s7377_s6 }
 0x79d   :  { %4295 = vrot.lane.b32.xlu0 %v8663_v40, %s7377_s6 }
 0x7a4   :  { %4416 = vrot.lane.b32.xlu2 %v3518_v57, %s7378_s7  ;;  %4414 = vrot.lane.b32.xlu1 %v3517_v1, %s7378_s7 }
 0x7a5   :  { %4297 = vrot.lane.b32.xlu0 %v8665_v29, %s7377_s6 }
 0x7ac   :  { %4412 = vrot.lane.b32.xlu2 %v8665_v29, %s7378_s7  ;;  %4410 = vrot.lane.b32.xlu1 %v8663_v40, %s7378_s7 }
 0x7b6   :  { %v3531_v48 = vpop.permute.xlu2 %3530 }
 0x7be   :  { %v8717_v58 = vpop.permute.xlu2 %3722 }
 0x7c6   :  { %v8719_v59 = vpop.permute.xlu2 %3837 }
 0x7ce   :  { %v3529_v19 = vpop.permute.xlu1 %3528  ;;  %v3842_v21 = vpop.permute.xlu2 %3841 }
 0x7cf   :  { %v3533_v30 = vpop.permute.xlu0 %3532  ;;  %v3535_v20 = vsel %vm38_vm0, %v3529_v19, %v3531_v48 }
 0x7d0   :  { %v3534_v2 = vsel %vm38_vm0, %v3531_v48, %v3533_v30  ;;  %v3549_v35 = vmul.f32 %v8724_v62, %v3535_v20  ;;  %v7192_v20 = vld [vmem:[%s9809_s1 + $0xf0] sm:$0xff] }
 0x7d1   :  { %v3550_v49 = vmul.f32 %v8726_v63, %v3534_v2  ;;  %v8845_v2 = vperm.slane %v7191_v9, 0 }
 0x7d2   :  { %3611 = vmatpush.msrb.mxu2 %v3549_v35 }
 0x7d3   :  { %3631 = vmatpush.msrb.mxu3 %v3550_v49  ;;  %7173 = vmatmul.msk.f32.vlgmr.msrb.gmra.mxu2 %vm57_vm2, %v7170_v39 }
 0x7d4   :  { %7174 = vmatmul.msk.f32.vlgmr.msrb.gmra.mxu3 %vm57_vm2, %v7170_v39  ;;  %3694 = vmatpush.msra.mxu2 %v3517_v1 }
 0x7d5   :  { %3714 = vmatpush.msra.mxu3 %v3518_v57 }
 0x7d6   :  { %v3527_v31 = vpop.permute.xlu1 %3526  ;;  %v3836_v38 = vpop.permute.xlu2 %3835 }
 0x7d7   :  { %v3725_v56 = vpop.permute.xlu0 %3724  ;;  %v3536_v12 = vsel %vm38_vm0, %v3527_v31, %v3529_v19  ;;  %v3537_v8 = vsel %vm38_vm0, %v3533_v30, %v3527_v31  ;;  %v3845_v43 = vsel %vm351_vm3, %v3836_v38, %v8719_v59  ;;  %v3846_v27 = vsel %vm351_vm3, %v3842_v21, %v3836_v38  ;;  %v7197_v30 = vld [vmem:[%s9812_s4 + $0x5] ss:$8 sm:$0xf] }
 0x7d8   :  { %v3729_v23 = vsel %vm234_vm1, %v8717_v58, %v3725_v56  ;;  %v3547_v15 = vmul.f32 %v8742_v51, %v3537_v8  ;;  %v3548_v34 = vmul.f32 %v8746_v5, %v3536_v12  ;;  %v3856_v17 = vmul.f32 %v8797_v4, %v3846_v27 }
 0x7d9   :  { %v3743_v16 = vmul.f32 %v8744_v52, %v3729_v23  ;;  %v3857_v42 = vmul.f32 %v8799_v3, %v3845_v43  ;;  %v8849_v35 = vperm.slane %v7197_v30, 2  ;;  %v8870_v38 = vperm.slane %v7197_v30, 3 }
 0x7da   :  { %3571 = vmatpush.msrb.mxu0 %v3547_v15  ;;  %3591 = vmatpush.msrb.mxu1 %v3548_v34  ;;  %v7203_v34 = vld [vmem:[%s9812_s4 + $0x6] ss:$8 sm:$0xf]  ;;  %v8892_v43 = vperm.slane %v7197_v30, 0  ;;  %v8894_v27 = vperm.slane %v7197_v30, 1 }
 0x7db   :  { %3805 = vmatpush.msrb.mxu2 %v3743_v16  ;;  %7171 = vmatmul.msk.f32.vlgmr.msrb.gmra.mxu0 %vm57_vm2, %v7170_v39  ;;  %9912 = vst [vmem:[#allocation8_spill] sm:$0xff] %v8849_v35  ;;  %v7198_v16 = vld [vmem:[%s9809_s1 + $0x100] sm:$0xff]  ;;  %v8875_v18 = vperm.slane %v7203_v34, 3 }
 0x7dc   :  { %7172 = vmatmul.msk.f32.vlgmr.msrb.gmra.mxu1 %vm57_vm2, %v7170_v39  ;;  %3654 = vmatpush.msra.mxu0 %v8663_v40  ;;  %v8825_v40 = vperm.slane %v7191_v9, 2  ;;  %9913 = vst [vmem:[#allocation6_spill] sm:$0xff] %v8870_v38 }
 0x7dd   :  { %3674 = vmatpush.msra.mxu1 %v8665_v29  ;;  %7177 = vmatmul.msk.f32.vlgmr.msra.gmra.mxu2 %vm57_vm2, %v7169_v26  ;;  %v8827_v29 = vperm.slane %v7191_v9, 3  ;;  %9915 = vst [vmem:[#allocation11_spill] sm:$0xff] %v8875_v18 }
 0x7de   :  { %7178 = vmatmul.msk.f32.vlgmr.msra.gmra.mxu3 %vm57_vm2, %v7169_v26  ;;  %v3727_v28 = vpop.permute.xlu1 %3726  ;;  %v8789_v36 = vpop.permute.xlu2 %4071  ;;  %9916 = vst [vmem:[#allocation12_spill] sm:$0xff] %v8892_v43 }
 0x7df   :  { %v3840_v11 = vpop.permute.xlu0 %3839  ;;  %v3728_v53 = vsel %vm234_vm1, %v3725_v56, %v3727_v28  ;;  %9917 = vst [vmem:[#allocation9_spill] sm:$0xff] %v8894_v27 }
 0x7e0   :  { %v3843_v7 = vsel %vm351_vm3, %v3840_v11, %v3842_v21  ;;  %v3844_v37 = vsel %vm351_vm3, %v8719_v59, %v3840_v11  ;;  %v3744_v61 = vmul.f32 %v8766_v54, %v3728_v53  ;;  %v8847_v21 = vperm.slane %v7191_v9, 1 }
 0x7e1   :  { %v3858_v6 = vmul.f32 %v8770_v13, %v3844_v37  ;;  %v3859_v55 = vmul.f32 %v8772_v14, %v3843_v7 }
 0x7e2   :  { %3825 = vmatpush.msrb.mxu3 %v3744_v61  ;;  %9911 = vst [vmem:[#allocation5_spill] sm:$0xff] %v8847_v21 }
 0x7e3   :  { %3920 = vmatpush.msra.mxu2 %v3858_v6  ;;  %7175 = vmatmul.msk.f32.vlgmr.msra.gmra.mxu0 %vm57_vm2, %v7169_v26 }
 0x7e4   :  { %3940 = vmatpush.msra.mxu3 %v3859_v55  ;;  %7176 = vmatmul.msk.f32.vlgmr.msra.gmra.mxu1 %vm57_vm2, %v7169_v26  ;;  %v8873_v26 = vperm.slane %v7203_v34, 2 }
 0x7e5   :  { %7183 = vmatmul.msk.f32.vlgmr.msrb.gmra.mxu2 %vm57_vm2, %v7180_v33 }
 0x7e6   :  { %7184 = vmatmul.msk.f32.vlgmr.msrb.gmra.mxu3 %vm57_vm2, %v7180_v33  ;;  %v3721_v44 = vpop.permute.xlu1 %3720  ;;  %v4185_v1 = vpop.permute.xlu2 %4184  ;;  %9914 = vst [vmem:[#allocation7_spill] sm:$0xff] %v8873_v26 }
 0x7e7   :  { %v3953_v45 = vpop.permute.xlu0 %3952  ;;  %v3730_v46 = vsel %vm234_vm1, %v3721_v44, %v8717_v58  ;;  %v3731_v32 = vsel %vm234_vm1, %v3727_v28, %v3721_v44  ;;  %v8896_v44 = vperm.slane %v7203_v34, 0 }
 0x7e8   :  { %v3741_v47 = vmul.f32 %v8793_v24, %v3731_v32  ;;  %v3742_v41 = vmul.f32 %v8795_v22, %v3730_v46 }
 0x7e9   :  { %9918 = vst [vmem:[#allocation10_spill] sm:$0xff] %v8896_v44 }
 0x7ea   :  { %3765 = vmatpush.msrb.mxu0 %v3741_v47  ;;  %3785 = vmatpush.msrb.mxu1 %v3742_v41 }
 0x7eb   :  { %7181 = vmatmul.msk.f32.vlgmr.msrb.gmra.mxu0 %vm57_vm2, %v7180_v33 }
 0x7ec   :  { %3880 = vmatpush.msra.mxu0 %v3856_v17  ;;  %3900 = vmatpush.msra.mxu1 %v3857_v42 }
 0x7ed   :  { %7182 = vmatmul.msk.f32.vlgmr.msrb.gmra.mxu1 %vm57_vm2, %v7180_v33  ;;  %7189 = vmatmul.msk.f32.vlgmr.msra.gmra.mxu2 %vm57_vm2, %v7186_v0 }
 0x7ee   :  { %7190 = vmatmul.msk.f32.vlgmr.msra.gmra.mxu3 %vm57_vm2, %v7186_v0  ;;  %v3955_v57 = vpop.permute.xlu1 %3954  ;;  %v4181_v31 = vpop.permute.xlu2 %4180 }
 0x7ef   :  { %v3957_v48 = vpop.permute.xlu0 %3956  ;;  %v3959_v58 = vsel %vm468_vm4, %v3953_v45, %v3955_v57 }
 0x7f0   :  { %v3958_v59 = vsel %vm468_vm4, %v3955_v57, %v3957_v48  ;;  %v3973_v60 = vmul.f32 %v8825_v40, %v3959_v58  ;;  %v7209_v57 = vld [vmem:[%s9812_s4 + $0x7] ss:$8 sm:$0xf] }
 0x7f1   :  { %v3974_v19 = vmul.f32 %v8827_v29, %v3958_v59  ;;  %v8918_v59 = vperm.slane %v7209_v57, 2 }
 0x7f2   :  { %4035 = vmatpush.msrb.mxu2 %v3973_v60  ;;  %v8921_v60 = vperm.slane %v7209_v57, 3 }
 0x7f3   :  { %4055 = vmatpush.msrb.mxu3 %v3974_v19  ;;  %7187 = vmatmul.msk.f32.vlgmr.msra.gmra.mxu0 %vm57_vm2, %v7186_v0  ;;  %9920 = vst [vmem:[#allocation13_spill] sm:$0xff] %v8918_v59 }
 0x7f4   :  { %9921 = vst [vmem:[#allocation15_spill] sm:$0xff] %v8921_v60 }
 0x7f5   :  { %7188 = vmatmul.msk.f32.vlgmr.msra.gmra.mxu1 %vm57_vm2, %v7186_v0  ;;  %7195 = vmatmul.msk.f32.vlgmr.msrb.gmra.mxu2 %vm57_vm2, %v7192_v20 }
 0x7f6   :  { %7196 = vmatmul.msk.f32.vlgmr.msrb.gmra.mxu3 %vm57_vm2, %v7192_v20  ;;  %v4070_v39 = vpop.permute.xlu1 %4069  ;;  %v4183_v33 = vpop.permute.xlu2 %4182 }
 0x7f7   :  { %v3951_v49 = vpop.permute.xlu0 %3950  ;;  %v4073_v50 = vsel %vm585_vm5, %v4070_v39, %v8789_v36  ;;  %v4189_v32 = vsel %vm702_vm6, %v4183_v33, %v4185_v1  ;;  %v4190_v47 = vsel %vm702_vm6, %v4181_v31, %v4183_v33 }
 0x7f8   :  { %v3960_v56 = vsel %vm468_vm4, %v3951_v49, %v3953_v45  ;;  %v3961_v12 = vsel %vm468_vm4, %v3957_v48, %v3951_v49  ;;  %v4088_v15 = vmul.f32 %v8849_v35, %v4073_v50  ;;  %v8898_v45 = vperm.slane %v7203_v34, 1 }
 0x7f9   :  { %v3971_v8 = vmul.f32 %v8845_v2, %v3961_v12  ;;  %v3972_v23 = vmul.f32 %v8847_v21, %v3960_v56  ;;  %v7215_v56 = vld [vmem:[%s9812_s4 + $0x20] ss:$8 sm:$0xf] }
 0x7fa   :  { %4150 = vmatpush.msra.mxu2 %v4088_v15  ;;  %9919 = vst [vmem:[#allocation14_spill] sm:$0xff] %v8898_v45  ;;  %v4202_v48 = vmul.f32 %v8898_v45, %v4189_v32  ;;  %v8938_v12 = vperm.slane %v7215_v56, 2  ;;  %v8945_v15 = vperm.slane %v7215_v56, 1  ;;  %v8966_v32 = vperm.slane %v7215_v56, 3 }
 0x7fb   :  { %3995 = vmatpush.msrb.mxu0 %v3971_v8  ;;  %4015 = vmatpush.msrb.mxu1 %v3972_v23  ;;  %v8941_v8 = vperm.slane %v7209_v57, 0  ;;  %v8943_v23 = vperm.slane %v7209_v57, 1 }
 0x7fc   :  { %7193 = vmatmul.msk.f32.vlgmr.msrb.gmra.mxu0 %vm57_vm2, %v7192_v20  ;;  %9922 = vst [vmem:[#allocation18_spill] sm:$0xff] %v8938_v12 }
 0x7fd   :  { %7194 = vmatmul.msk.f32.vlgmr.msrb.gmra.mxu1 %vm57_vm2, %v7192_v20  ;;  %7201 = vmatmul.msk.f32.vlgmr.msra.gmra.mxu2 %vm57_vm2, %v7198_v16  ;;  %9923 = vst [vmem:[#allocation17_spill] sm:$0xff] %v8941_v8 }
 0x7fe   :  { %v4066_v28 = vpop.permute.xlu1 %4065  ;;  %v4417_v58 = vpop.permute.xlu2 %4416  ;;  %9924 = vst [vmem:[#allocation16_spill] sm:$0xff] %v8943_v23 }
 0x7ff   :  { %v4187_v11 = vpop.permute.xlu0 %4186  ;;  %v4076_v53 = vsel %vm585_vm5, %v8789_v36, %v4066_v28  ;;  %v7204_v36 = vld [vmem:[%s9809_s1 + $0x108] sm:$0xff]  ;;  %9925 = vst [vmem:[#allocation19_spill] sm:$0xff] %v8945_v15 }
 0x800   :  { %v4188_v7 = vsel %vm702_vm6, %v4185_v1, %v4187_v11  ;;  %v4191_v37 = vsel %vm702_vm6, %v4187_v11, %v4181_v31  ;;  %v4089_v61 = vmul.f32 %v8870_v38, %v4076_v53  ;;  %v4201_v1 = vmul.f32 %v8896_v44, %v4190_v47  ;;  %v7210_v31 = vld [vmem:[%s9809_s1 + $0x110] sm:$0xff]  ;;  %9927 = vst [vmem:[#allocation21_spill] sm:$0xff] %v8966_v32 }
 0x801   :  { %v4203_v6 = vmul.f32 %v8873_v26, %v4188_v7  ;;  %v4204_v55 = vmul.f32 %v8875_v18, %v4191_v37 }
 0x802   :  { %4170 = vmatpush.msra.mxu3 %v4089_v61 }
 0x803   :  { %4265 = vmatpush.msrb.mxu2 %v4203_v6  ;;  %7202 = vmatmul.msk.f32.vlgmr.msra.gmra.mxu3 %vm57_vm2, %v7198_v16 }
 0x804   :  { %4285 = vmatpush.msrb.mxu3 %v4204_v55 }
 0x805   :  { %7207 = vmatmul.msk.f32.vlgmr.msrb.gmra.mxu2 %vm57_vm2, %v7204_v36 }
 0x806   :  { %v4068_v46 = vpop.permute.xlu1 %4067 }
 0x807   :  { %v4300_v41 = vpop.permute.xlu0 %4299  ;;  %v4074_v17 = vsel %vm585_vm5, %v4068_v46, %v4070_v39  ;;  %v4075_v42 = vsel %vm585_vm5, %v4066_v28, %v4068_v46  ;;  %v8964_v46 = vperm.slane %v7215_v56, 0 }
 0x808   :  { %v4086_v9 = vmul.f32 %v8892_v43, %v4075_v42  ;;  %v4087_v0 = vmul.f32 %v8894_v27, %v4074_v17 }
 0x809   :  { %9926 = vst [vmem:[#allocation20_spill] sm:$0xff] %v8964_v46 }
 0x80a   :  { %4110 = vmatpush.msra.mxu0 %v4086_v9  ;;  %4130 = vmatpush.msra.mxu1 %v4087_v0 }
 0x80b   :  { %7199 = vmatmul.msk.f32.vlgmr.msra.gmra.mxu0 %vm57_vm2, %v7198_v16  ;;  %7200 = vmatmul.msk.f32.vlgmr.msra.gmra.mxu1 %vm57_vm2, %v7198_v16  ;;  %v4413_v16 = vpop.permute.xlu2 %4412 }
 0x80c   :  { %4225 = vmatpush.msrb.mxu0 %v4201_v1  ;;  %4245 = vmatpush.msrb.mxu1 %v4202_v48 }
 0x80d   :  { %7208 = vmatmul.msk.f32.vlgmr.msrb.gmra.mxu3 %vm57_vm2, %v7204_v36 }
 0x80e   :  { %v4302_v19 = vpop.permute.xlu1 %4301 }
 0x80f   :  { %v4296_v30 = vpop.permute.xlu0 %4295  ;;  %v4303_v20 = vsel %vm819_vm7, %v4300_v41, %v4302_v19 }
 0x810   :  { %v4306_v39 = vsel %vm819_vm7, %v4302_v19, %v4296_v30  ;;  %v4318_v49 = vmul.f32 %v8918_v59, %v4303_v20 }
 0x811   :  { %v4319_v50 = vmul.f32 %v8921_v60, %v4306_v39 }
 0x812   :  { %4380 = vmatpush.msra.mxu2 %v4318_v49 }
 0x813   :  { %4400 = vmatpush.msra.mxu3 %v4319_v50  ;;  %7205 = vmatmul.msk.f32.vlgmr.msrb.gmra.mxu0 %vm57_vm2, %v7204_v36 }
 0x814   :  { %7206 = vmatmul.msk.f32.vlgmr.msrb.gmra.mxu1 %vm57_vm2, %v7204_v36  ;;  %7213 = vmatmul.msk.f32.vlgmr.msra.gmra.mxu2 %vm57_vm2, %v7210_v31  ;;  %v7216_v36 = vld [vmem:[%s9809_s1 + $0x118] sm:$0xff] }
 0x815   :  { %7214 = vmatmul.msk.f32.vlgmr.msra.gmra.mxu3 %vm57_vm2, %v7210_v31 }
 0x816   :  { %v4415_v34 = vpop.permute.xlu1 %4414 }
 0x817   :  { %v4298_v28 = vpop.permute.xlu0 %4297  ;;  %v4418_v11 = vsel %vm936_vm8, %v4415_v34, %v4417_v58  ;;  %v4419_v53 = vsel %vm936_vm8, %v4413_v16, %v4415_v34 }
 0x818   :  { %v4304_v7 = vsel %vm819_vm7, %v4298_v28, %v4300_v41  ;;  %v4305_v37 = vsel %vm819_vm7, %v4296_v30, %v4298_v28  ;;  %v4433_v61 = vmul.f32 %v8938_v12, %v4418_v11  ;;  %v4432_v33 = vmul.f32 %v8945_v15, %v4419_v53 }
 0x819   :  { %v4316_v6 = vmul.f32 %v8941_v8, %v4305_v37  ;;  %v4317_v55 = vmul.f32 %v8943_v23, %v4304_v7 }
 0x81a   :  { %4495 = vmatpush.msrb.mxu2 %v4433_v61 }
 0x81b   :  { %4340 = vmatpush.msra.mxu0 %v4316_v6  ;;  %4360 = vmatpush.msra.mxu1 %v4317_v55 }
 0x81c   :  { %7211 = vmatmul.msk.f32.vlgmr.msra.gmra.mxu0 %vm57_vm2, %v7210_v31  ;;  %7212 = vmatmul.msk.f32.vlgmr.msra.gmra.mxu1 %vm57_vm2, %v7210_v31 }
 0x81d   :  { %4475 = vmatpush.msrb.mxu1 %v4432_v33  ;;  %7219 = vmatmul.msk.f32.vlgmr.msrb.gmra.mxu2 %vm57_vm2, %v7216_v36 }
 0x81e   :  { %v4411_v47 = vpop.permute.xlu1 %4410  ;;  %4564 = vmatpush.msra.mxu2 %v9907_v25 }
 0x81f   :  { %4544 = vmatpush.msra.mxu1 %v9907_v25  ;;  %v4420_v41 = vsel %vm936_vm8, %v4411_v47, %v4413_v16  ;;  %v4421_v17 = vsel %vm936_vm8, %v4417_v58, %v4411_v47 }
 0x820   :  { %v4431_v42 = vmul.f32 %v8964_v46, %v4420_v41  ;;  %v4434_v9 = vmul.f32 %v8966_v32, %v4421_v17  ;;  %4565 = vmatpush.msra.mxu2 %v9907_v25 }
 0x821   :  { %4545 = vmatpush.msra.mxu1 %v9907_v25 }
 0x822   :  { %4455 = vmatpush.msrb.mxu0 %v4431_v42  ;;  %4515 = vmatpush.msrb.mxu3 %v4434_v9 }
 0x823   :  { %7220 = vmatmul.msk.f32.vlgmr.msrb.gmra.mxu3 %vm57_vm2, %v7216_v36  ;;  %4566 = vmatpush.msra.mxu2 %v9907_v25 }
 0x824   :  { %4524 = vmatpush.msra.mxu0 %v9907_v25  ;;  %7218 = vmatmul.msk.f32.vlgmr.msrb.gmra.mxu1 %vm57_vm2, %v7216_v36 }
 0x825   :  { %7217 = vmatmul.msk.f32.vlgmr.msrb.gmra.mxu0 %vm57_vm2, %v7216_v36  ;;  %4546 = vmatpush.msra.mxu1 %v9907_v25 }
 0x826   :  { %4525 = vmatpush.msra.mxu0 %v9907_v25  ;;  %4584 = vmatpush.msra.mxu3 %v9907_v25 }
 0x827   :  { %4567 = vmatpush.msra.mxu2 %v9907_v25  ;;  %4547 = vmatpush.msra.mxu1 %v9907_v25 }
 0x828   :  { %4526 = vmatpush.msra.mxu0 %v9907_v25  ;;  %4585 = vmatpush.msra.mxu3 %v9907_v25 }
 0x829   :  { %4568 = vmatpush.msra.mxu2 %v9907_v25  ;;  %4548 = vmatpush.msra.mxu1 %v9907_v25 }
 0x82a   :  { %4527 = vmatpush.msra.mxu0 %v9907_v25  ;;  %4586 = vmatpush.msra.mxu3 %v9907_v25 }
 0x82b   :  { %4569 = vmatpush.msra.mxu2 %v9907_v25  ;;  %4549 = vmatpush.msra.mxu1 %v9907_v25 }
 0x82c   :  { %4528 = vmatpush.msra.mxu0 %v9907_v25  ;;  %4587 = vmatpush.msra.mxu3 %v9907_v25 }
 0x82d   :  { %4570 = vmatpush.msra.mxu2 %v9907_v25  ;;  %4550 = vmatpush.msra.mxu1 %v9907_v25 }
 0x82e   :  { %4529 = vmatpush.msra.mxu0 %v9907_v25  ;;  %4588 = vmatpush.msra.mxu3 %v9907_v25 }
 0x82f   :  { %4571 = vmatpush.msra.mxu2 %v9907_v25  ;;  %4551 = vmatpush.msra.mxu1 %v9907_v25 }
 0x830   :  { %4530 = vmatpush.msra.mxu0 %v9907_v25  ;;  %4589 = vmatpush.msra.mxu3 %v9907_v25 }
 0x831   :  { %4572 = vmatpush.msra.mxu2 %v9907_v25  ;;  %4552 = vmatpush.msra.mxu1 %v9907_v25 }
 0x832   :  { %4531 = vmatpush.msra.mxu0 %v9907_v25  ;;  %4590 = vmatpush.msra.mxu3 %v9907_v25 }
 0x833   :  { %4573 = vmatpush.msra.mxu2 %v9907_v25  ;;  %4553 = vmatpush.msra.mxu1 %v9907_v25 }
 0x834   :  { %4532 = vmatpush.msra.mxu0 %v9907_v25  ;;  %4591 = vmatpush.msra.mxu3 %v9907_v25 }
 0x835   :  { %4574 = vmatpush.msra.mxu2 %v9907_v25  ;;  %4554 = vmatpush.msra.mxu1 %v9907_v25 }
 0x836   :  { %4533 = vmatpush.msra.mxu0 %v9907_v25  ;;  %4592 = vmatpush.msra.mxu3 %v9907_v25 }
 0x837   :  { %4575 = vmatpush.msra.mxu2 %v9907_v25  ;;  %4555 = vmatpush.msra.mxu1 %v9907_v25 }
 0x838   :  { %4534 = vmatpush.msra.mxu0 %v9907_v25  ;;  %4593 = vmatpush.msra.mxu3 %v9907_v25 }
 0x839   :  { %4576 = vmatpush.msra.mxu2 %v9907_v25  ;;  %4556 = vmatpush.msra.mxu1 %v9907_v25 }
 0x83a   :  { %4535 = vmatpush.msra.mxu0 %v9907_v25  ;;  %4594 = vmatpush.msra.mxu3 %v9907_v25 }
 0x83b   :  { %4577 = vmatpush.msra.mxu2 %v9907_v25  ;;  %4557 = vmatpush.msra.mxu1 %v9907_v25 }
 0x83c   :  { %4536 = vmatpush.msra.mxu0 %v9907_v25  ;;  %4595 = vmatpush.msra.mxu3 %v9907_v25 }
 0x83d   :  { %4578 = vmatpush.msra.mxu2 %v9907_v25  ;;  %4558 = vmatpush.msra.mxu1 %v9907_v25 }
 0x83e   :  { %4537 = vmatpush.msra.mxu0 %v9907_v25  ;;  %4596 = vmatpush.msra.mxu3 %v9907_v25 }
 0x83f   :  { %4579 = vmatpush.msra.mxu2 %v9907_v25  ;;  %4559 = vmatpush.msra.mxu1 %v9907_v25 }
 0x840   :  { %4538 = vmatpush.msra.mxu0 %v9907_v25  ;;  %4597 = vmatpush.msra.mxu3 %v9907_v25 }
 0x841   :  { %4648 = vmatpush.msrb.mxu2 %v9907_v25  ;;  %4628 = vmatpush.msrb.mxu1 %v9907_v25 }
 0x842   :  { %4539 = vmatpush.msra.mxu0 %v9907_v25  ;;  %4598 = vmatpush.msra.mxu3 %v9907_v25 }
 0x843   :  { %4649 = vmatpush.msrb.mxu2 %v9907_v25  ;;  %4629 = vmatpush.msrb.mxu1 %v9907_v25 }
 0x844   :  { %4608 = vmatpush.msrb.mxu0 %v9907_v25  ;;  %4599 = vmatpush.msra.mxu3 %v9907_v25 }
 0x845   :  { %4650 = vmatpush.msrb.mxu2 %v9907_v25  ;;  %4630 = vmatpush.msrb.mxu1 %v9907_v25 }
 0x846   :  { %4609 = vmatpush.msrb.mxu0 %v9907_v25  ;;  %4668 = vmatpush.msrb.mxu3 %v9907_v25 }
 0x847   :  { %4651 = vmatpush.msrb.mxu2 %v9907_v25  ;;  %4631 = vmatpush.msrb.mxu1 %v9907_v25 }
 0x848   :  { %4610 = vmatpush.msrb.mxu0 %v9907_v25  ;;  %4669 = vmatpush.msrb.mxu3 %v9907_v25 }
 0x849   :  { %4652 = vmatpush.msrb.mxu2 %v9907_v25  ;;  %4632 = vmatpush.msrb.mxu1 %v9907_v25 }
 0x84a   :  { %4611 = vmatpush.msrb.mxu0 %v9907_v25  ;;  %4670 = vmatpush.msrb.mxu3 %v9907_v25 }
 0x84b   :  { %4653 = vmatpush.msrb.mxu2 %v9907_v25  ;;  %4633 = vmatpush.msrb.mxu1 %v9907_v25 }
 0x84c   :  { %4612 = vmatpush.msrb.mxu0 %v9907_v25  ;;  %4671 = vmatpush.msrb.mxu3 %v9907_v25 }
 0x84d   :  { %4654 = vmatpush.msrb.mxu2 %v9907_v25  ;;  %4634 = vmatpush.msrb.mxu1 %v9907_v25 }
 0x84e   :  { %4613 = vmatpush.msrb.mxu0 %v9907_v25  ;;  %4672 = vmatpush.msrb.mxu3 %v9907_v25 }
 0x84f   :  { %4655 = vmatpush.msrb.mxu2 %v9907_v25  ;;  %4635 = vmatpush.msrb.mxu1 %v9907_v25 }
 0x850   :  { %4614 = vmatpush.msrb.mxu0 %v9907_v25  ;;  %4673 = vmatpush.msrb.mxu3 %v9907_v25 }
 0x851   :  { %4656 = vmatpush.msrb.mxu2 %v9907_v25  ;;  %4636 = vmatpush.msrb.mxu1 %v9907_v25 }
 0x852   :  { %4615 = vmatpush.msrb.mxu0 %v9907_v25  ;;  %4674 = vmatpush.msrb.mxu3 %v9907_v25 }
 0x853   :  { %4657 = vmatpush.msrb.mxu2 %v9907_v25  ;;  %4637 = vmatpush.msrb.mxu1 %v9907_v25 }
 0x854   :  { %4616 = vmatpush.msrb.mxu0 %v9907_v25  ;;  %4675 = vmatpush.msrb.mxu3 %v9907_v25 }
 0x855   :  { %4658 = vmatpush.msrb.mxu2 %v9907_v25  ;;  %4638 = vmatpush.msrb.mxu1 %v9907_v25 }
 0x856   :  { %4617 = vmatpush.msrb.mxu0 %v9907_v25  ;;  %v3613_v0 = vpop.f32.mrf.mxu2  ;;  %4676 = vmatpush.msrb.mxu3 %v9907_v25 }
 0x857   :  { %4659 = vmatpush.msrb.mxu2 %v9907_v25  ;;  %4639 = vmatpush.msrb.mxu1 %v9907_v25  ;;  %v3633_v48 = vpop.f32.mrf.mxu3 }
 0x858   :  { %4618 = vmatpush.msrb.mxu0 %v9907_v25  ;;  %v3573_v57 = vpop.f32.mrf.mxu0  ;;  %4677 = vmatpush.msrb.mxu3 %v9907_v25 }
 0x859   :  { %4660 = vmatpush.msrb.mxu2 %v9907_v25  ;;  %v3593_v1 = vpop.f32.mrf.mxu1  ;;  %4640 = vmatpush.msrb.mxu1 %v9907_v25 }
 0x85a   :  { %4619 = vmatpush.msrb.mxu0 %v9907_v25  ;;  %4678 = vmatpush.msrb.mxu3 %v9907_v25 }
 0x85b   :  { %4661 = vmatpush.msrb.mxu2 %v9907_v25  ;;  %4641 = vmatpush.msrb.mxu1 %v9907_v25 }
 0x85c   :  { %4620 = vmatpush.msrb.mxu0 %v9907_v25  ;;  %4679 = vmatpush.msrb.mxu3 %v9907_v25 }
 0x85d   :  { %4662 = vmatpush.msrb.mxu2 %v9907_v25  ;;  %4642 = vmatpush.msrb.mxu1 %v9907_v25 }
 0x85e   :  { %4621 = vmatpush.msrb.mxu0 %v9907_v25  ;;  %4680 = vmatpush.msrb.mxu3 %v9907_v25 }
 0x85f   :  { %4663 = vmatpush.msrb.mxu2 %v9907_v25  ;;  %4643 = vmatpush.msrb.mxu1 %v9907_v25 }
 0x860   :  { %4622 = vmatpush.msrb.mxu0 %v9907_v25  ;;  %v3696_v58 = vpop.f32.mrf.mxu2  ;;  %v3656_v19 = vpop.f32.mrf.mxu0  ;;  %4681 = vmatpush.msrb.mxu3 %v9907_v25 }
 0x861   :  { %v3676_v30 = vpop.f32.mrf.mxu1  ;;  %v3716_v20 = vpop.f32.mrf.mxu3  ;;  %v3697_v41 = vadd.f32 %v3696_v58, %v3613_v0  ;;  %v3657_v42 = vadd.f32 %v3656_v19, %v3573_v57 }
 0x862   :  { %4623 = vmatpush.msrb.mxu0 %v9907_v25  ;;  %4682 = vmatpush.msrb.mxu3 %v9907_v25  ;;  %v3677_v9 = vadd.f32 %v3676_v30, %v3593_v1  ;;  %v3717_v8 = vadd.f32 %v3716_v20, %v3633_v48 }
 0x864   :  { %4683 = vmatpush.msrb.mxu3 %v9907_v25 }
 0x868   :  { %v3807_v39 = vpop.f32.mrf.mxu2  ;;  %v3767_v49 = vpop.f32.mrf.mxu0 }
 0x869   :  { %v3827_v31 = vpop.f32.mrf.mxu3  ;;  %v3832_v46 = vadd.f32 %v3807_v39, %v3697_v41  ;;  %v3830_v25 = vadd.f32 %v3767_v49, %v3657_v42 }
 0x86a   :  { %v3787_v50 = vpop.f32.mrf.mxu1  ;;  %v3833_v43 = vadd.f32 %v3827_v31, %v3717_v8 }
 0x86b   :  { %v3831_v23 = vadd.f32 %v3787_v50, %v3677_v9 }
 0x870   :  { %v3922_v56 = vpop.f32.mrf.mxu2  ;;  %v3882_v16 = vpop.f32.mrf.mxu0 }
 0x871   :  { %v3942_v28 = vpop.f32.mrf.mxu3  ;;  %v3947_v32 = vadd.f32 %v3922_v56, %v3832_v46  ;;  %v3945_v60 = vadd.f32 %v3882_v16, %v3830_v25 }
 0x872   :  { %v3902_v34 = vpop.f32.mrf.mxu1  ;;  %v3948_v57 = vadd.f32 %v3942_v28, %v3833_v43 }
 0x873   :  { %v3946_v45 = vadd.f32 %v3902_v34, %v3831_v23 }
 0x878   :  { %v4037_v11 = vpop.f32.mrf.mxu2 }
 0x879   :  { %v3997_v53 = vpop.f32.mrf.mxu0  ;;  %v4057_v37 = vpop.f32.mrf.mxu3  ;;  %v4062_v44 = vadd.f32 %v4037_v11, %v3947_v32 }
 0x87a   :  { %v4017_v7 = vpop.f32.mrf.mxu1  ;;  %v4060_v26 = vadd.f32 %v3997_v53, %v3945_v60  ;;  %v4063_v49 = vadd.f32 %v4057_v37, %v3948_v57 }
 0x87b   :  { %v4061_v27 = vadd.f32 %v4017_v7, %v3946_v45 }
 0x880   :  { %v4152_v61 = vpop.f32.mrf.mxu2 }
 0x881   :  { %v4177_v21 = vadd.f32 %v4152_v61, %v4062_v44 }
 0x886   :  { %v4172_v33 = vpop.f32.mrf.mxu3 }
 0x887   :  { %v4178_v23 = vadd.f32 %v4172_v33, %v4063_v49 }
 0x888   :  { %v4112_v6 = vpop.f32.mrf.mxu0  ;;  %v4132_v55 = vpop.f32.mrf.mxu1 }
 0x889   :  { %v4267_v36 = vpop.f32.mrf.mxu2  ;;  %v4175_v0 = vadd.f32 %v4112_v6, %v4060_v26  ;;  %v4176_v58 = vadd.f32 %v4132_v55, %v4061_v27 }
 0x88a   :  { %v4292_v1 = vadd.f32 %v4267_v36, %v4177_v21 }
 0x890   :  { %v4227_v47 = vpop.f32.mrf.mxu0  ;;  %v4287_v15 = vpop.f32.mrf.mxu3 }
 0x891   :  { %v4247_v17 = vpop.f32.mrf.mxu1  ;;  %v4290_v19 = vadd.f32 %v4227_v47, %v4175_v0  ;;  %v4293_v44 = vadd.f32 %v4287_v15, %v4178_v23 }
 0x892   :  { %v4291_v30 = vadd.f32 %v4247_v17, %v4176_v58 }
 0x897   :  { %v4382_v12 = vpop.f32.mrf.mxu2 }
 0x898   :  { %v4402_v39 = vpop.f32.mrf.mxu3  ;;  %v4407_v48 = vadd.f32 %v4382_v12, %v4292_v1 }
 0x899   :  { %v4342_v59 = vpop.f32.mrf.mxu0  ;;  %v4362_v18 = vpop.f32.mrf.mxu1  ;;  %v4408_v21 = vadd.f32 %v4402_v39, %v4293_v44 }
 0x89a   :  { %v4405_v46 = vadd.f32 %v4342_v59, %v4290_v19  ;;  %v4406_v20 = vadd.f32 %v4362_v18, %v4291_v30  ;;  %v7221_v19 = vld [vmem:[%s9810_s2 + $0x18] sm:$0xff] }
 0x8a0   :  { %v4497_v25 = vpop.f32.mrf.mxu2 }
 0x8a1   :  { %v4522_v32 = vadd.f32 %v4497_v25, %v4407_v48  ;;  %v4477_v56 = vpop.f32.mrf.mxu1  ;;  %v7222_v48 = vld [vmem:[%s9811_s3 + $0x18] sm:$0xff] }
 0x8a2   :  { %v4457_v50 = vpop.f32.mrf.mxu0  ;;  %v4521_v45 = vadd.f32 %v4477_v56, %v4406_v20 }
 0x8a3   :  { %v9106_v60 = vadd.f32 %v4457_v50, %v4405_v46  ;;  %4580 = vmatmul.f32.vlgmr.msra.gmra.mxu2 %v4522_v32  ;;  %v4606_v27 = vmul.f32 %v4522_v32, %v4522_v32 }
 0x8a4   :  { %4560 = vmatmul.f32.vlgmr.msra.gmra.mxu1 %v4521_v45  ;;  %v4605_v59 = vmul.f32 %v4521_v45, %v4521_v45 }
 0x8a5   :  { %4540 = vmatmul.f32.vlgmr.msra.gmra.mxu0 %v9106_v60  ;;  %v4604_v18 = vmul.f32 %v9106_v60, %v9106_v60 }
 0x8a6   :  { %v4517_v26 = vpop.f32.mrf.mxu3 }
 0x8a7   :  { %v4523_v43 = vadd.f32 %v4517_v26, %v4408_v21 }
 0x8a9   :  { %4600 = vmatmul.f32.vlgmr.msra.gmra.mxu3 %v4523_v43  ;;  %v4607_v12 = vmul.f32 %v4523_v43, %v4523_v43 }
 0x8ab   :  { %4664 = vmatmul.f32.vlgmr.msrb.gmra.mxu2 %v4606_v27 }
 0x8ac   :  { %4644 = vmatmul.f32.vlgmr.msrb.gmra.mxu1 %v4605_v59 }
 0x8ad   :  { %4624 = vmatmul.f32.vlgmr.msrb.gmra.mxu0 %v4604_v18 }
 0x8b1   :  { %4684 = vmatmul.f32.vlgmr.msrb.gmra.mxu3 %v4607_v12 }
 0x921   :  { %v4561_v15 = vpop.f32.mrf.mxu1 }
 0x922   :  { %v4541_v8 = vpop.f32.mrf.mxu0 }
 0x923   :  { %v4562_v16 = vadd.f32 %v4561_v15, %v4541_v8 }
 0x926   :  { %v4581_v31 = vpop.f32.mrf.mxu2 }
 0x927   :  { %v4582_v28 = vadd.f32 %v4581_v31, %v4562_v16 }
 0x929   :  { %v4645_v53 = vpop.f32.mrf.mxu1 }
 0x92a   :  { %v4625_v11 = vpop.f32.mrf.mxu0 }
 0x92b   :  { %v4646_v61 = vadd.f32 %v4645_v53, %v4625_v11  ;;  %v7224_v53 = vld [vmem:[%s9809_s1 + $0x120] sm:$0xff] }
 0x92c   :  { %v4601_v34 = vpop.f32.mrf.mxu3 }
 0x92d   :  { %v4602_v7 = vadd.f32 %v4601_v34, %v4582_v28 }
 0x92e   :  { %v4665_v37 = vpop.f32.mrf.mxu2 }
 0x92f   :  { %v4688_v6 = vmul.f32 0.001953125, %v4602_v7  ;;  %v4666_v55 = vadd.f32 %v4665_v37, %v4646_v61  ;;  %v7223_v37 = vld [vmem:[%s9809_s1 + $0x140] sm:$0xff] }
 0x931   :  { %v4690_v47 = vmul.f32 %v4688_v6, %v4688_v6 }
 0x934   :  { %v4685_v33 = vpop.f32.mrf.mxu3 }
 0x935   :  { %v4686_v36 = vadd.f32 %v4685_v33, %v4666_v55 }
 0x937   :  { %v4689_v41 = vmul.f32 0.001953125, %v4686_v36 }
 0x939   :  { %v4691_v17 = vsub.f32 %v4689_v41, %v4690_v47 }
 0x93b   :  { %v4694_v42 = vadd.f32 1e-05, %v4691_v17 }
 0x93d   :  { %7339 = vrsqrt.f32 %v4694_v42  ;;  %vm4701_vm12 = vweird.f32 %v4694_v42 }
 0x943   :  { %v7340_v9 = vpop.eup %7339 }
 0x944   :  { %v4696_v0 = vmul.f32 %v7340_v9, %v4694_v42  ;;  %vm4702_vm11 = vweird.f32 %v7340_v9 }
 0x945   :  { %vm4703_vm13 = vmor %vm4701_vm12, %vm4702_vm11 }
 0x946   :  { %v4697_v58 = vmul.f32 %v7340_v9, %v4696_v0 }
 0x948   :  { %v4698_v57 = vmul.f32 0.5, %v4697_v58 }
 0x94a   :  { %v4699_v1 = vsub.f32 1.5, %v4698_v57 }
 0x94c   :  { %v4700_v30 = vmul.f32 %v7340_v9, %v4699_v1 }
 0x94e   :  { %v4704_v39 = vsel %vm4703_vm13, %v7340_v9, %v4700_v30 }
 0x94f   :  { %v4705_v49 = vmul.f32 %v7221_v19, %v4704_v39 }
 0x951   :  { %4712 = vperm.xlu0 %7331, %v4705_v49   ;;  %v4708_v46 = vmul.f32 %v4705_v49, %v4688_v6 }
 0x953   :  { %v4709_v20 = vsub.f32 %v7222_v48, %v4708_v46 }
 0x955   :  { %4721 = vperm.xlu1 %7332, %v4709_v20   ;;  %v7233_v20 = vld [vmem:[%s9809_s1 + $0x128] sm:$0xff] }
 0x9c3   :  { %v4713_v25 = vpop.permute.xlu0 %4712 }
 0x9c4   :  { %v4716_v23 = vmul.f32 %v4713_v25, %v4521_v45  ;;  %v4717_v50 = vmul.f32 %v4713_v25, %v4522_v32  ;;  %v4718_v56 = vmul.f32 %v4713_v25, %v4523_v43  ;;  %v4715_v18 = vmul.f32 %v4713_v25, %v9106_v60 }
 0x9c7   :  { %v4722_v44 = vpop.permute.xlu1 %4721 }
 0x9c8   :  { %v4725_v21 = vadd.f32 %v4722_v44, %v4716_v23  ;;  %v4726_v26 = vadd.f32 %v4722_v44, %v4717_v50  ;;  %v4727_v27 = vadd.f32 %v4722_v44, %v4718_v56  ;;  %v4724_v15 = vadd.f32 %v4722_v44, %v4715_v18 }
 0x9ca   :  { %v4729_v59 = vmul.f32 0.1, %v4725_v21  ;;  %v4730_v12 = vmul.f32 0.1, %v4726_v26  ;;  %v4731_v8 = vmul.f32 0.1, %v4727_v27 }
 0x9cb   :  { %v4728_v32 = vmul.f32 0.1, %v4724_v15 }
 0x9cc   :  { %v4733_v31 = vmax.f32 %v4725_v21, %v4729_v59  ;;  %v9118_v16 = vmax.f32 %v4726_v26, %v4730_v12  ;;  %v9120_v34 = vmax.f32 %v4727_v27, %v4731_v8  ;;  %v7238_v8 = vld [vmem:[%s9809_s1 + $0x130] sm:$0xff] }
 0x9cd   :  { %v4732_v45 = vmax.f32 %v4724_v15, %v4728_v32 }
 0x9ce   :  { %4742 = vrot.lane.b32.xlu0 %v9118_v16, %s7371_s22  ;;  %4740 = vrot.lane.b32.xlu2 %v4733_v31, %s7371_s22 }
 0x9cf   :  { %4744 = vrot.lane.b32.xlu1 %v9120_v34, %s7371_s22 }
 0x9d6   :  { %4924 = vrot.lane.b32.xlu0 %v4733_v31, %s7372_s23  ;;  %4738 = vrot.lane.b32.xlu2 %v4732_v45, %s7371_s22 }
 0x9d7   :  { %4926 = vrot.lane.b32.xlu1 %v9118_v16, %s7372_s23 }
 0x9de   :  { %5029 = vrot.lane.b32.xlu0 %v4733_v31, %s7373_s28  ;;  %4928 = vrot.lane.b32.xlu2 %v9120_v34, %s7372_s23 }
 0x9df   :  { %5031 = vrot.lane.b32.xlu1 %v9118_v16, %s7373_s28 }
 0x9e6   :  { %5033 = vrot.lane.b32.xlu0 %v9120_v34, %s7373_s28  ;;  %4922 = vrot.lane.b32.xlu2 %v4732_v45, %s7372_s23 }
 0x9e7   :  { %5134 = vrot.lane.b32.xlu1 %v4733_v31, %s7374_s0 }
 0x9ee   :  { %5027 = vrot.lane.b32.xlu0 %v4732_v45, %s7373_s28  ;;  %5136 = vrot.lane.b32.xlu2 %v9118_v16, %s7374_s0 }
 0x9ef   :  { %5138 = vrot.lane.b32.xlu1 %v9120_v34, %s7374_s0 }
 0x9f6   :  { %5243 = vrot.lane.b32.xlu0 %v9120_v34, %s7375_s29  ;;  %5241 = vrot.lane.b32.xlu2 %v9118_v16, %s7375_s29 }
 0x9f7   :  { %5132 = vrot.lane.b32.xlu1 %v4732_v45, %s7374_s0 }
 0x9fe   :  { %5346 = vrot.lane.b32.xlu0 %v9118_v16, %s7376_s30  ;;  %5237 = vrot.lane.b32.xlu2 %v4732_v45, %s7375_s29 }
 0x9ff   :  { %5348 = vrot.lane.b32.xlu1 %v9120_v34, %s7376_s30 }
 0xa06   :  { %5342 = vrot.lane.b32.xlu0 %v4732_v45, %s7376_s30  ;;  %5239 = vrot.lane.b32.xlu2 %v4733_v31, %s7375_s29 }
 0xa07   :  { %5451 = vrot.lane.b32.xlu1 %v9118_v16, %s7377_s6 }
 0xa0e   :  { %5344 = vrot.lane.b32.xlu0 %v4733_v31, %s7376_s30  ;;  %5453 = vrot.lane.b32.xlu2 %v9120_v34, %s7377_s6 }
 0xa0f   :  { %5447 = vrot.lane.b32.xlu1 %v4732_v45, %s7377_s6 }
 0xa16   :  { %5558 = vrot.lane.b32.xlu0 %v9120_v34, %s7378_s7  ;;  %5556 = vrot.lane.b32.xlu2 %v9118_v16, %s7378_s7 }
 0xa17   :  { %5449 = vrot.lane.b32.xlu1 %v4733_v31, %s7377_s6 }
 0xa1e   :  { %5554 = vrot.lane.b32.xlu0 %v4733_v31, %s7378_s7  ;;  %5552 = vrot.lane.b32.xlu2 %v4732_v45, %s7378_s7 }
 0xa28   :  { %v4741_v60 = vpop.permute.xlu2 %4740 }
 0xa30   :  { %v4739_v43 = vpop.permute.xlu2 %4738 }
 0xa31   :  { %v4748_v28 = vsel %vm38_vm0, %v4739_v43, %v4741_v60 }
 0xa32   :  { %v4751_v11 = vmul.f32 %v4748_v28, %v8746_v5 }
 0xa34   :  { %4794 = vmatpush.msra.mxu1 %v4751_v11  ;;  %v7243_v11 = vld [vmem:[%s9809_s1 + $0x138] sm:$0xff] }
 0xa35   :  { %7226 = vmatmul.msk.f32.vlgmr.msra.gmra.mxu1 %vm57_vm2, %v7224_v53 }
 0xa36   :  { %4877 = vmatpush.msrb.mxu1 %v4733_v31 }
 0xa38   :  { %v4929_v7 = vpop.permute.xlu2 %4928 }
 0xa3d   :  { %7230 = vmatmul.msk.f32.vlgmr.msrb.gmra.mxu1 %vm57_vm2, %v7223_v37 }
 0xa40   :  { %v4743_v61 = vpop.permute.xlu0 %4742  ;;  %v4923_v6 = vpop.permute.xlu2 %4922 }
 0xa41   :  { %v4745_v55 = vpop.permute.xlu1 %4744  ;;  %v4747_v33 = vsel %vm38_vm0, %v4741_v60, %v4743_v61  ;;  %v4933_v9 = vsel %vm234_vm1, %v4929_v7, %v4923_v6 }
 0xa42   :  { %v4749_v36 = vsel %vm38_vm0, %v4745_v55, %v4739_v43  ;;  %v4746_v47 = vsel %vm38_vm0, %v4743_v61, %v4745_v55  ;;  %v4752_v41 = vmul.f32 %v4747_v33, %v8724_v62  ;;  %v4934_v0 = vmul.f32 %v4933_v9, %v8793_v24  ;;  %v9928_v9 = vld [vmem:[#allocation5_spill] sm:$0xff] }
 0xa43   :  { %v4750_v17 = vmul.f32 %v4749_v36, %v8742_v51  ;;  %v4753_v42 = vmul.f32 %v4746_v47, %v8726_v63 }
 0xa44   :  { %4814 = vmatpush.msra.mxu2 %v4752_v41 }
 0xa45   :  { %4774 = vmatpush.msra.mxu0 %v4750_v17  ;;  %4834 = vmatpush.msra.mxu3 %v4753_v42 }
 0xa46   :  { %7227 = vmatmul.msk.f32.vlgmr.msra.gmra.mxu2 %vm57_vm2, %v7224_v53  ;;  %7228 = vmatmul.msk.f32.vlgmr.msra.gmra.mxu3 %vm57_vm2, %v7224_v53 }
 0xa47   :  { %4857 = vmatpush.msrb.mxu0 %v4732_v45  ;;  %4897 = vmatpush.msrb.mxu2 %v9118_v16 }
 0xa48   :  { %4917 = vmatpush.msrb.mxu3 %v9120_v34  ;;  %7225 = vmatmul.msk.f32.vlgmr.msra.gmra.mxu0 %vm57_vm2, %v7224_v53  ;;  %v4925_v58 = vpop.permute.xlu0 %4924  ;;  %v5137_v57 = vpop.permute.xlu2 %5136 }
 0xa49   :  { %4958 = vmatpush.msra.mxu0 %v4934_v0  ;;  %v4927_v1 = vpop.permute.xlu1 %4926  ;;  %v4932_v19 = vsel %vm234_vm1, %v4923_v6, %v4925_v58 }
 0xa4a   :  { %v4930_v30 = vsel %vm234_vm1, %v4927_v1, %v4929_v7  ;;  %v4931_v39 = vsel %vm234_vm1, %v4925_v58, %v4927_v1  ;;  %v4935_v49 = vmul.f32 %v4932_v19, %v8795_v22  ;;  %v9929_v58 = vld [vmem:[#allocation12_spill] sm:$0xff]  ;;  %v9930_v1 = vld [vmem:[#allocation9_spill] sm:$0xff] }
 0xa4b   :  { %v4937_v48 = vmul.f32 %v4930_v30, %v8766_v54  ;;  %v4936_v46 = vmul.f32 %v4931_v39, %v8744_v52  ;;  %v7248_v30 = vld [vmem:[%s9809_s1 + $0x148] sm:$0xff] }
 0xa4c   :  { %4978 = vmatpush.msra.mxu1 %v4935_v49 }
 0xa4d   :  { %4998 = vmatpush.msra.mxu2 %v4936_v46  ;;  %5018 = vmatpush.msra.mxu3 %v4937_v48  ;;  %v9931_v46 = vld [vmem:[#allocation7_spill] sm:$0xff] }
 0xa4e   :  { %7231 = vmatmul.msk.f32.vlgmr.msrb.gmra.mxu2 %vm57_vm2, %v7223_v37  ;;  %7232 = vmatmul.msk.f32.vlgmr.msrb.gmra.mxu3 %vm57_vm2, %v7223_v37 }
 0xa4f   :  { %7235 = vmatmul.msk.f32.vlgmr.msra.gmra.mxu1 %vm57_vm2, %v7233_v20 }
 0xa50   :  { %v5030_v25 = vpop.permute.xlu0 %5029  ;;  %7229 = vmatmul.msk.f32.vlgmr.msrb.gmra.mxu0 %vm57_vm2, %v7223_v37  ;;  %v5242_v56 = vpop.permute.xlu2 %5241 }
 0xa51   :  { %v5032_v23 = vpop.permute.xlu1 %5031 }
 0xa52   :  { %v5036_v50 = vsel %vm351_vm3, %v5030_v25, %v5032_v23 }
 0xa53   :  { %v5041_v44 = vmul.f32 %v5036_v50, %v8770_v13 }
 0xa55   :  { %5103 = vmatpush.msrb.mxu2 %v5041_v44 }
 0xa56   :  { %7236 = vmatmul.msk.f32.vlgmr.msra.gmra.mxu2 %vm57_vm2, %v7233_v20  ;;  %7237 = vmatmul.msk.f32.vlgmr.msra.gmra.mxu3 %vm57_vm2, %v7233_v20 }
 0xa58   :  { %v5034_v21 = vpop.permute.xlu0 %5033  ;;  %7234 = vmatmul.msk.f32.vlgmr.msra.gmra.mxu0 %vm57_vm2, %v7233_v20  ;;  %v5238_v15 = vpop.permute.xlu2 %5237 }
 0xa59   :  { %v5135_v26 = vpop.permute.xlu1 %5134  ;;  %v5035_v27 = vsel %vm351_vm3, %v5032_v23, %v5034_v21  ;;  %v7253_v23 = vld [vmem:[%s9809_s1 + $0x150] sm:$0xff] }
 0xa5a   :  { %v5141_v18 = vsel %vm468_vm4, %v5135_v26, %v5137_v57  ;;  %v5042_v59 = vmul.f32 %v5035_v27, %v8772_v14 }
 0xa5b   :  { %v5146_v12 = vmul.f32 %v5141_v18, %v8825_v40  ;;  %v9933_v18 = vld [vmem:[#allocation13_spill] sm:$0xff] }
 0xa5c   :  { %5123 = vmatpush.msrb.mxu3 %v5042_v59 }
 0xa5d   :  { %5208 = vmatpush.msra.mxu2 %v5146_v12  ;;  %v7258_v12 = vld [vmem:[%s9809_s1 + $0x158] sm:$0xff] }
 0xa5e   :  { %7241 = vmatmul.msk.f32.vlgmr.msrb.gmra.mxu2 %vm57_vm2, %v7238_v8  ;;  %7242 = vmatmul.msk.f32.vlgmr.msrb.gmra.mxu3 %vm57_vm2, %v7238_v8 }
 0xa60   :  { %v5028_v31 = vpop.permute.xlu0 %5027  ;;  %v5240_v53 = vpop.permute.xlu2 %5239 }
 0xa61   :  { %v5139_v16 = vpop.permute.xlu1 %5138  ;;  %v5037_v34 = vsel %vm351_vm3, %v5028_v31, %v5030_v25  ;;  %v5038_v32 = vsel %vm351_vm3, %v5034_v21, %v5028_v31  ;;  %v5246_v37 = vsel %vm585_vm5, %v5240_v53, %v5242_v56  ;;  %v5247_v61 = vsel %vm585_vm5, %v5238_v15, %v5240_v53 }
 0xa62   :  { %v5140_v45 = vsel %vm468_vm4, %v5137_v57, %v5139_v16  ;;  %v5039_v60 = vmul.f32 %v5038_v32, %v8797_v4  ;;  %v5040_v43 = vmul.f32 %v5037_v34, %v8799_v3  ;;  %v5249_v57 = vmul.f32 %v5247_v61, %v9929_v58 }
 0xa63   :  { %v5147_v28 = vmul.f32 %v5140_v45, %v8827_v29  ;;  %v5250_v19 = vmul.f32 %v5246_v37, %v9930_v1  ;;  %v9934_v45 = vld [vmem:[#allocation10_spill] sm:$0xff] }
 0xa64   :  { %5063 = vmatpush.msrb.mxu0 %v5039_v60  ;;  %5083 = vmatpush.msrb.mxu1 %v5040_v43  ;;  %v9935_v43 = vld [vmem:[#allocation14_spill] sm:$0xff] }
 0xa65   :  { %5228 = vmatpush.msra.mxu3 %v5147_v28  ;;  %7239 = vmatmul.msk.f32.vlgmr.msrb.gmra.mxu0 %vm57_vm2, %v7238_v8 }
 0xa66   :  { %7240 = vmatmul.msk.f32.vlgmr.msrb.gmra.mxu1 %vm57_vm2, %v7238_v8  ;;  %7246 = vmatmul.msk.f32.vlgmr.msra.gmra.mxu2 %vm57_vm2, %v7243_v11 }
 0xa67   :  { %7247 = vmatmul.msk.f32.vlgmr.msra.gmra.mxu3 %vm57_vm2, %v7243_v11 }
 0xa68   :  { %v5244_v7 = vpop.permute.xlu0 %5243  ;;  %v5454_v25 = vpop.permute.xlu2 %5453 }
 0xa69   :  { %v5133_v6 = vpop.permute.xlu1 %5132  ;;  %v5245_v55 = vsel %vm585_vm5, %v5242_v56, %v5244_v7  ;;  %v5248_v33 = vsel %vm585_vm5, %v5244_v7, %v5238_v15 }
 0xa6a   :  { %v5142_v36 = vsel %vm468_vm4, %v5133_v6, %v5135_v26  ;;  %v5143_v47 = vsel %vm468_vm4, %v5139_v16, %v5133_v6  ;;  %v5251_v41 = vmul.f32 %v5245_v55, %v8849_v35  ;;  %v5252_v17 = vmul.f32 %v5248_v33, %v8870_v38  ;;  %v9932_v26 = vld [vmem:[#allocation11_spill] sm:$0xff] }
 0xa6b   :  { %v5144_v42 = vmul.f32 %v5143_v47, %v8845_v2  ;;  %v5145_v0 = vmul.f32 %v5142_v36, %v9928_v9  ;;  %v9937_v47 = vld [vmem:[#allocation18_spill] sm:$0xff] }
 0xa6c   :  { %5313 = vmatpush.msrb.mxu2 %v5251_v41  ;;  %5333 = vmatpush.msrb.mxu3 %v5252_v17  ;;  %v9938_v17 = vld [vmem:[#allocation21_spill] sm:$0xff] }
 0xa6d   :  { %5168 = vmatpush.msra.mxu0 %v5144_v42  ;;  %5188 = vmatpush.msra.mxu1 %v5145_v0  ;;  %v9939_v0 = vld [vmem:[#allocation17_spill] sm:$0xff] }
 0xa6e   :  { %7244 = vmatmul.msk.f32.vlgmr.msra.gmra.mxu0 %vm57_vm2, %v7243_v11  ;;  %7245 = vmatmul.msk.f32.vlgmr.msra.gmra.mxu1 %vm57_vm2, %v7243_v11  ;;  %v9936_v11 = vld [vmem:[#allocation15_spill] sm:$0xff] }
 0xa6f   :  { %5273 = vmatpush.msrb.mxu0 %v5249_v57  ;;  %5293 = vmatpush.msrb.mxu1 %v5250_v19  ;;  %v9940_v19 = vld [vmem:[#allocation16_spill] sm:$0xff] }
 0xa70   :  { %7251 = vmatmul.msk.f32.vlgmr.msrb.gmra.mxu2 %vm57_vm2, %v7248_v30  ;;  %7252 = vmatmul.msk.f32.vlgmr.msrb.gmra.mxu3 %vm57_vm2, %v7248_v30  ;;  %v5347_v39 = vpop.permute.xlu0 %5346  ;;  %v5557_v8 = vpop.permute.xlu2 %5556 }
 0xa71   :  { %v5349_v49 = vpop.permute.xlu1 %5348 }
 0xa72   :  { %v5350_v48 = vsel %vm702_vm6, %v5347_v39, %v5349_v49 }
 0xa73   :  { %v5356_v20 = vmul.f32 %v5350_v48, %v9931_v46  ;;  %v9941_v48 = vmov 1.0  }
 0xa75   :  { %5418 = vmatpush.msra.mxu2 %v5356_v20 }
 0xa76   :  { %7249 = vmatmul.msk.f32.vlgmr.msrb.gmra.mxu0 %vm57_vm2, %v7248_v30  ;;  %7250 = vmatmul.msk.f32.vlgmr.msrb.gmra.mxu1 %vm57_vm2, %v7248_v30 }
 0xa78   :  { %7256 = vmatmul.msk.f32.vlgmr.msra.gmra.mxu2 %vm57_vm2, %v7253_v23  ;;  %v5343_v50 = vpop.permute.xlu0 %5342  ;;  %v5553_v7 = vpop.permute.xlu2 %5552 }
 0xa79   :  { %v5452_v56 = vpop.permute.xlu1 %5451  ;;  %v5353_v44 = vsel %vm702_vm6, %v5349_v49, %v5343_v50 }
 0xa7a   :  { %v5455_v21 = vsel %vm819_vm7, %v5452_v56, %v5454_v25  ;;  %v5357_v27 = vmul.f32 %v5353_v44, %v9932_v26 }
 0xa7b   :  { %v5461_v59 = vmul.f32 %v5455_v21, %v9933_v18 }
 0xa7c   :  { %5438 = vmatpush.msra.mxu3 %v5357_v27 }
 0xa7d   :  { %5523 = vmatpush.msrb.mxu2 %v5461_v59  ;;  %7257 = vmatmul.msk.f32.vlgmr.msra.gmra.mxu3 %vm57_vm2, %v7253_v23 }
 0xa80   :  { %7261 = vmatmul.msk.f32.vlgmr.msrb.gmra.mxu2 %vm57_vm2, %v7258_v12  ;;  %v5345_v15 = vpop.permute.xlu0 %5344 }
 0xa81   :  { %v5448_v31 = vpop.permute.xlu1 %5447  ;;  %v5351_v16 = vsel %vm702_vm6, %v5345_v15, %v5347_v39  ;;  %v5352_v34 = vsel %vm702_vm6, %v5343_v50, %v5345_v15  ;;  %v7263_v39 = vld [vmem:[%s9809_s1 + $0x160] sm:$0xff] }
 0xa82   :  { %v5458_v32 = vsel %vm819_vm7, %v5454_v25, %v5448_v31  ;;  %v5354_v60 = vmul.f32 %v5352_v34, %v9934_v45  ;;  %v5355_v28 = vmul.f32 %v5351_v16, %v9935_v43 }
 0xa83   :  { %v5462_v53 = vmul.f32 %v5458_v32, %v9936_v11 }
 0xa84   :  { %5378 = vmatpush.msra.mxu0 %v5354_v60  ;;  %5398 = vmatpush.msra.mxu1 %v5355_v28 }
 0xa85   :  { %5543 = vmatpush.msrb.mxu3 %v5462_v53  ;;  %7254 = vmatmul.msk.f32.vlgmr.msra.gmra.mxu0 %vm57_vm2, %v7253_v23 }
 0xa86   :  { %7255 = vmatmul.msk.f32.vlgmr.msra.gmra.mxu1 %vm57_vm2, %v7253_v23  ;;  %7262 = vmatmul.msk.f32.vlgmr.msrb.gmra.mxu3 %vm57_vm2, %v7258_v12  ;;  %v9942_v23 = vld [vmem:[#allocation20_spill] sm:$0xff] }
 0xa88   :  { %v5559_v37 = vpop.permute.xlu0 %5558 }
 0xa89   :  { %v5450_v61 = vpop.permute.xlu1 %5449  ;;  %v5560_v6 = vsel %vm936_vm8, %v5557_v8, %v5559_v37  ;;  %v5563_v55 = vsel %vm936_vm8, %v5559_v37, %v5553_v7 }
 0xa8a   :  { %v5456_v33 = vsel %vm819_vm7, %v5450_v61, %v5452_v56  ;;  %v5457_v36 = vsel %vm819_vm7, %v5448_v31, %v5450_v61  ;;  %v5566_v41 = vmul.f32 %v5560_v6, %v9937_v47  ;;  %v5567_v42 = vmul.f32 %v5563_v55, %v9938_v17  ;;  %v9943_v56 = vld [vmem:[#allocation19_spill] sm:$0xff] }
 0xa8b   :  { %v5459_v57 = vmul.f32 %v5457_v36, %v9939_v0  ;;  %v5460_v30 = vmul.f32 %v5456_v33, %v9940_v19 }
 0xa8c   :  { %5628 = vmatpush.msra.mxu2 %v5566_v41  ;;  %5648 = vmatpush.msra.mxu3 %v5567_v42 }
 0xa8d   :  { %5483 = vmatpush.msrb.mxu0 %v5459_v57  ;;  %5503 = vmatpush.msrb.mxu1 %v5460_v30 }
 0xa8e   :  { %7259 = vmatmul.msk.f32.vlgmr.msrb.gmra.mxu0 %vm57_vm2, %v7258_v12  ;;  %7260 = vmatmul.msk.f32.vlgmr.msrb.gmra.mxu1 %vm57_vm2, %v7258_v12 }
 0xa8f   :  { %7266 = vmatmul.msk.f32.vlgmr.msra.gmra.mxu2 %vm57_vm2, %v7263_v39  ;;  %7267 = vmatmul.msk.f32.vlgmr.msra.gmra.mxu3 %vm57_vm2, %v7263_v39 }
 0xa90   :  { %v5555_v49 = vpop.permute.xlu0 %5554  ;;  %5697 = vmatpush.msrb.mxu2 %v9941_v48  ;;  %5717 = vmatpush.msrb.mxu3 %v9941_v48 }
 0xa91   :  { %v5561_v20 = vsel %vm936_vm8, %v5555_v49, %v5557_v8  ;;  %v5562_v25 = vsel %vm936_vm8, %v5553_v7, %v5555_v49 }
 0xa92   :  { %v5564_v50 = vmul.f32 %v5562_v25, %v9942_v23  ;;  %v5565_v44 = vmul.f32 %v5561_v20, %v9943_v56  ;;  %5698 = vmatpush.msrb.mxu2 %v9941_v48  ;;  %5718 = vmatpush.msrb.mxu3 %v9941_v48 }
 0xa94   :  { %5588 = vmatpush.msra.mxu0 %v5564_v50  ;;  %5608 = vmatpush.msra.mxu1 %v5565_v44 }
 0xa95   :  { %5699 = vmatpush.msrb.mxu2 %v9941_v48  ;;  %5719 = vmatpush.msrb.mxu3 %v9941_v48 }
 0xa96   :  { %5657 = vmatpush.msrb.mxu0 %v9941_v48  ;;  %5677 = vmatpush.msrb.mxu1 %v9941_v48 }
 0xa97   :  { %7264 = vmatmul.msk.f32.vlgmr.msra.gmra.mxu0 %vm57_vm2, %v7263_v39  ;;  %7265 = vmatmul.msk.f32.vlgmr.msra.gmra.mxu1 %vm57_vm2, %v7263_v39 }
 0xa98   :  { %5658 = vmatpush.msrb.mxu0 %v9941_v48  ;;  %5678 = vmatpush.msrb.mxu1 %v9941_v48 }
 0xa99   :  { %5700 = vmatpush.msrb.mxu2 %v9941_v48  ;;  %5720 = vmatpush.msrb.mxu3 %v9941_v48 }
 0xa9a   :  { %5659 = vmatpush.msrb.mxu0 %v9941_v48  ;;  %5679 = vmatpush.msrb.mxu1 %v9941_v48 }
 0xa9b   :  { %5701 = vmatpush.msrb.mxu2 %v9941_v48  ;;  %5721 = vmatpush.msrb.mxu3 %v9941_v48 }
 0xa9c   :  { %5660 = vmatpush.msrb.mxu0 %v9941_v48  ;;  %5680 = vmatpush.msrb.mxu1 %v9941_v48 }
 0xa9d   :  { %5702 = vmatpush.msrb.mxu2 %v9941_v48  ;;  %5722 = vmatpush.msrb.mxu3 %v9941_v48 }
 0xa9e   :  { %5661 = vmatpush.msrb.mxu0 %v9941_v48  ;;  %5681 = vmatpush.msrb.mxu1 %v9941_v48 }
 0xa9f   :  { %5703 = vmatpush.msrb.mxu2 %v9941_v48  ;;  %5723 = vmatpush.msrb.mxu3 %v9941_v48 }
 0xaa0   :  { %5662 = vmatpush.msrb.mxu0 %v9941_v48  ;;  %5682 = vmatpush.msrb.mxu1 %v9941_v48 }
 0xaa1   :  { %5704 = vmatpush.msrb.mxu2 %v9941_v48  ;;  %5724 = vmatpush.msrb.mxu3 %v9941_v48 }
 0xaa2   :  { %5663 = vmatpush.msrb.mxu0 %v9941_v48  ;;  %5683 = vmatpush.msrb.mxu1 %v9941_v48 }
 0xaa3   :  { %5705 = vmatpush.msrb.mxu2 %v9941_v48  ;;  %5725 = vmatpush.msrb.mxu3 %v9941_v48 }
 0xaa4   :  { %5664 = vmatpush.msrb.mxu0 %v9941_v48  ;;  %5684 = vmatpush.msrb.mxu1 %v9941_v48 }
 0xaa5   :  { %5706 = vmatpush.msrb.mxu2 %v9941_v48  ;;  %5726 = vmatpush.msrb.mxu3 %v9941_v48 }
 0xaa6   :  { %5665 = vmatpush.msrb.mxu0 %v9941_v48  ;;  %5685 = vmatpush.msrb.mxu1 %v9941_v48 }
 0xaa7   :  { %5707 = vmatpush.msrb.mxu2 %v9941_v48  ;;  %5727 = vmatpush.msrb.mxu3 %v9941_v48 }
 0xaa8   :  { %5666 = vmatpush.msrb.mxu0 %v9941_v48  ;;  %5686 = vmatpush.msrb.mxu1 %v9941_v48 }
 0xaa9   :  { %5708 = vmatpush.msrb.mxu2 %v9941_v48  ;;  %5728 = vmatpush.msrb.mxu3 %v9941_v48 }
 0xaaa   :  { %5667 = vmatpush.msrb.mxu0 %v9941_v48  ;;  %5687 = vmatpush.msrb.mxu1 %v9941_v48 }
 0xaab   :  { %5709 = vmatpush.msrb.mxu2 %v9941_v48  ;;  %5729 = vmatpush.msrb.mxu3 %v9941_v48 }
 0xaac   :  { %5668 = vmatpush.msrb.mxu0 %v9941_v48  ;;  %5688 = vmatpush.msrb.mxu1 %v9941_v48 }
 0xaad   :  { %5710 = vmatpush.msrb.mxu2 %v9941_v48  ;;  %5730 = vmatpush.msrb.mxu3 %v9941_v48 }
 0xaae   :  { %5669 = vmatpush.msrb.mxu0 %v9941_v48  ;;  %5689 = vmatpush.msrb.mxu1 %v9941_v48 }
 0xaaf   :  { %5711 = vmatpush.msrb.mxu2 %v9941_v48  ;;  %5731 = vmatpush.msrb.mxu3 %v9941_v48 }
 0xab0   :  { %5670 = vmatpush.msrb.mxu0 %v9941_v48  ;;  %5690 = vmatpush.msrb.mxu1 %v9941_v48 }
 0xab1   :  { %5712 = vmatpush.msrb.mxu2 %v9941_v48  ;;  %5732 = vmatpush.msrb.mxu3 %v9941_v48 }
 0xab2   :  { %5671 = vmatpush.msrb.mxu0 %v9941_v48  ;;  %5691 = vmatpush.msrb.mxu1 %v9941_v48  ;;  %v4796_v12 = vpop.f32.mrf.mxu1 }
 0xab3   :  { %5781 = vmatpush.msra.mxu2 %v9941_v48  ;;  %5801 = vmatpush.msra.mxu3 %v9941_v48 }
 0xab4   :  { %5672 = vmatpush.msrb.mxu0 %v9941_v48  ;;  %5692 = vmatpush.msrb.mxu1 %v9941_v48 }
 0xab5   :  { %5782 = vmatpush.msra.mxu2 %v9941_v48  ;;  %5802 = vmatpush.msra.mxu3 %v9941_v48 }
 0xab6   :  { %5741 = vmatpush.msra.mxu0 %v9941_v48  ;;  %5761 = vmatpush.msra.mxu1 %v9941_v48 }
 0xab7   :  { %5783 = vmatpush.msra.mxu2 %v9941_v48  ;;  %5803 = vmatpush.msra.mxu3 %v9941_v48 }
 0xab8   :  { %5742 = vmatpush.msra.mxu0 %v9941_v48  ;;  %5762 = vmatpush.msra.mxu1 %v9941_v48 }
 0xab9   :  { %5784 = vmatpush.msra.mxu2 %v9941_v48  ;;  %5804 = vmatpush.msra.mxu3 %v9941_v48 }
 0xaba   :  { %5743 = vmatpush.msra.mxu0 %v9941_v48  ;;  %5763 = vmatpush.msra.mxu1 %v9941_v48  ;;  %v4879_v16 = vpop.f32.mrf.mxu1 }
 0xabb   :  { %5785 = vmatpush.msra.mxu2 %v9941_v48  ;;  %5805 = vmatpush.msra.mxu3 %v9941_v48  ;;  %v4880_v44 = vadd.f32 %v4879_v16, %v4796_v12 }
 0xabc   :  { %5744 = vmatpush.msra.mxu0 %v9941_v48  ;;  %5764 = vmatpush.msra.mxu1 %v9941_v48 }
 0xabd   :  { %5786 = vmatpush.msra.mxu2 %v9941_v48  ;;  %5806 = vmatpush.msra.mxu3 %v9941_v48 }
 0xabe   :  { %5745 = vmatpush.msra.mxu0 %v9941_v48  ;;  %5765 = vmatpush.msra.mxu1 %v9941_v48 }
 0xabf   :  { %5787 = vmatpush.msra.mxu2 %v9941_v48  ;;  %5807 = vmatpush.msra.mxu3 %v9941_v48 }
 0xac0   :  { %5746 = vmatpush.msra.mxu0 %v9941_v48  ;;  %5766 = vmatpush.msra.mxu1 %v9941_v48 }
 0xac1   :  { %5788 = vmatpush.msra.mxu2 %v9941_v48  ;;  %5808 = vmatpush.msra.mxu3 %v9941_v48 }
 0xac2   :  { %5747 = vmatpush.msra.mxu0 %v9941_v48  ;;  %5767 = vmatpush.msra.mxu1 %v9941_v48 }
 0xac3   :  { %5789 = vmatpush.msra.mxu2 %v9941_v48  ;;  %5809 = vmatpush.msra.mxu3 %v9941_v48 }
 0xac4   :  { %5748 = vmatpush.msra.mxu0 %v9941_v48  ;;  %5768 = vmatpush.msra.mxu1 %v9941_v48 }
 0xac5   :  { %5790 = vmatpush.msra.mxu2 %v9941_v48  ;;  %5810 = vmatpush.msra.mxu3 %v9941_v48  ;;  %v4776_v59 = vpop.f32.mrf.mxu0 }
 0xac6   :  { %5749 = vmatpush.msra.mxu0 %v9941_v48  ;;  %5769 = vmatpush.msra.mxu1 %v9941_v48 }
 0xac7   :  { %5791 = vmatpush.msra.mxu2 %v9941_v48  ;;  %5811 = vmatpush.msra.mxu3 %v9941_v48 }
 0xac8   :  { %5750 = vmatpush.msra.mxu0 %v9941_v48  ;;  %5770 = vmatpush.msra.mxu1 %v9941_v48 }
 0xac9   :  { %v4816_v21 = vpop.f32.mrf.mxu2  ;;  %v4836_v27 = vpop.f32.mrf.mxu3  ;;  %5792 = vmatpush.msra.mxu2 %v9941_v48  ;;  %5812 = vmatpush.msra.mxu3 %v9941_v48 }
 0xaca   :  { %5751 = vmatpush.msra.mxu0 %v9941_v48  ;;  %5771 = vmatpush.msra.mxu1 %v9941_v48 }
 0xacb   :  { %5793 = vmatpush.msra.mxu2 %v9941_v48  ;;  %5813 = vmatpush.msra.mxu3 %v9941_v48 }
 0xacc   :  { %5752 = vmatpush.msra.mxu0 %v9941_v48  ;;  %5772 = vmatpush.msra.mxu1 %v9941_v48  ;;  %v4980_v28 = vpop.f32.mrf.mxu1 }
 0xacd   :  { %5794 = vmatpush.msra.mxu2 %v9941_v48  ;;  %5814 = vmatpush.msra.mxu3 %v9941_v48  ;;  %v4859_v31 = vpop.f32.mrf.mxu0  ;;  %v5024_v19 = vadd.f32 %v4980_v28, %v4880_v44 }
 0xace   :  { %5753 = vmatpush.msra.mxu0 %v9941_v48  ;;  %5773 = vmatpush.msra.mxu1 %v9941_v48  ;;  %v4860_v50 = vadd.f32 %v4859_v31, %v4776_v59 }
 0xacf   :  { %5795 = vmatpush.msra.mxu2 %v9941_v48  ;;  %5815 = vmatpush.msra.mxu3 %v9941_v48 }
 0xad0   :  { %5754 = vmatpush.msra.mxu0 %v9941_v48  ;;  %5774 = vmatpush.msra.mxu1 %v9941_v48 }
 0xad1   :  { %v4899_v8 = vpop.f32.mrf.mxu2  ;;  %v4919_v15 = vpop.f32.mrf.mxu3  ;;  %5796 = vmatpush.msra.mxu2 %v9941_v48  ;;  %5816 = vmatpush.msra.mxu3 %v9941_v48 }
 0xad2   :  { %5755 = vmatpush.msra.mxu0 %v9941_v48  ;;  %5775 = vmatpush.msra.mxu1 %v9941_v48  ;;  %v4900_v17 = vadd.f32 %v4899_v8, %v4816_v21  ;;  %v4920_v23 = vadd.f32 %v4919_v15, %v4836_v27 }
 0xad4   :  { %5756 = vmatpush.msra.mxu0 %v9941_v48  ;;  %5776 = vmatpush.msra.mxu1 %v9941_v48 }
 0xad5   :  { %v4960_v60 = vpop.f32.mrf.mxu0 }
 0xad6   :  { %v5023_v47 = vadd.f32 %v4960_v60, %v4860_v50 }
 0xad9   :  { %v5000_v34 = vpop.f32.mrf.mxu2  ;;  %v5020_v32 = vpop.f32.mrf.mxu3 }
 0xada   :  { %v5025_v56 = vadd.f32 %v5000_v34, %v4900_v17  ;;  %v5026_v48 = vadd.f32 %v5020_v32, %v4920_v23 }
 0xae1   :  { %v5105_v53 = vpop.f32.mrf.mxu2  ;;  %v5125_v7 = vpop.f32.mrf.mxu3 }
 0xae2   :  { %v5065_v37 = vpop.f32.mrf.mxu0  ;;  %v5130_v0 = vadd.f32 %v5105_v53, %v5025_v56  ;;  %v5131_v11 = vadd.f32 %v5125_v7, %v5026_v48 }
 0xae3   :  { %v5085_v61 = vpop.f32.mrf.mxu1  ;;  %v5128_v43 = vadd.f32 %v5065_v37, %v5023_v47 }
 0xae4   :  { %v5129_v45 = vadd.f32 %v5085_v61, %v5024_v19 }
 0xae9   :  { %v5210_v6 = vpop.f32.mrf.mxu2 }
 0xaea   :  { %v5230_v55 = vpop.f32.mrf.mxu3  ;;  %v5235_v58 = vadd.f32 %v5210_v6, %v5130_v0 }
 0xaeb   :  { %v5170_v33 = vpop.f32.mrf.mxu0  ;;  %v5190_v36 = vpop.f32.mrf.mxu1  ;;  %v5236_v26 = vadd.f32 %v5230_v55, %v5131_v11 }
 0xaec   :  { %v5233_v35 = vadd.f32 %v5170_v33, %v5128_v43  ;;  %v5234_v9 = vadd.f32 %v5190_v36, %v5129_v45 }
 0xaf3   :  { %v5315_v41 = vpop.f32.mrf.mxu2  ;;  %v5335_v42 = vpop.f32.mrf.mxu3 }
 0xaf4   :  { %v5275_v57 = vpop.f32.mrf.mxu0  ;;  %v5295_v30 = vpop.f32.mrf.mxu1  ;;  %v5340_v59 = vadd.f32 %v5315_v41, %v5235_v58  ;;  %v5341_v12 = vadd.f32 %v5335_v42, %v5236_v26 }
 0xaf5   :  { %v5338_v21 = vadd.f32 %v5275_v57, %v5233_v35  ;;  %v5339_v27 = vadd.f32 %v5295_v30, %v5234_v9 }
 0xafb   :  { %v5420_v39 = vpop.f32.mrf.mxu2 }
 0xafc   :  { %v5445_v17 = vadd.f32 %v5420_v39, %v5340_v59  ;;  %v7268_v59 = vld [vmem:[%s9810_s2 + $0x20] sm:$0xff] }
 0xb00   :  { %v5440_v49 = vpop.f32.mrf.mxu3 }
 0xb01   :  { %v5446_v23 = vadd.f32 %v5440_v49, %v5341_v12 }
 0xb02   :  { %v5380_v20 = vpop.f32.mrf.mxu0 }
 0xb03   :  { %v5400_v25 = vpop.f32.mrf.mxu1  ;;  %v5525_v1 = vpop.f32.mrf.mxu2  ;;  %v5443_v8 = vadd.f32 %v5380_v20, %v5338_v21 }
 0xb04   :  { %v5444_v15 = vadd.f32 %v5400_v25, %v5339_v27  ;;  %v5550_v56 = vadd.f32 %v5525_v1, %v5445_v17  ;;  %v7269_v17 = vld [vmem:[%s9811_s3 + $0x20] sm:$0xff] }
 0xb09   :  { %v5545_v18 = vpop.f32.mrf.mxu3 }
 0xb0a   :  { %v5551_v48 = vadd.f32 %v5545_v18, %v5446_v23 }
 0xb0b   :  { %v5485_v38 = vpop.f32.mrf.mxu0  ;;  %v5505_v46 = vpop.f32.mrf.mxu1 }
 0xb0c   :  { %v5548_v31 = vadd.f32 %v5485_v38, %v5443_v8  ;;  %v5549_v47 = vadd.f32 %v5505_v46, %v5444_v15 }
 0xb12   :  { %v5630_v19 = vpop.f32.mrf.mxu2  ;;  %v5650_v16 = vpop.f32.mrf.mxu3 }
 0xb13   :  { %v5655_v0 = vadd.f32 %v5630_v19, %v5550_v56  ;;  %v5656_v11 = vadd.f32 %v5650_v16, %v5551_v48 }
 0xb14   :  { %v5590_v34 = vpop.f32.mrf.mxu0  ;;  %v5610_v32 = vpop.f32.mrf.mxu1 }
 0xb15   :  { %v5653_v43 = vadd.f32 %v5590_v34, %v5548_v31  ;;  %v5654_v45 = vadd.f32 %v5610_v32, %v5549_v47  ;;  %5713 = vmatmul.f32.vlgmr.msrb.gmra.mxu2 %v5655_v0  ;;  %5733 = vmatmul.f32.vlgmr.msrb.gmra.mxu3 %v5656_v11  ;;  %v5739_v35 = vmul.f32 %v5655_v0, %v5655_v0 }
 0xb16   :  { %v5740_v9 = vmul.f32 %v5656_v11, %v5656_v11 }
 0xb17   :  { %5673 = vmatmul.f32.vlgmr.msrb.gmra.mxu0 %v5653_v43  ;;  %5693 = vmatmul.f32.vlgmr.msrb.gmra.mxu1 %v5654_v45  ;;  %v5737_v58 = vmul.f32 %v5653_v43, %v5653_v43  ;;  %v5738_v26 = vmul.f32 %v5654_v45, %v5654_v45 }
 0xb1d   :  { %5797 = vmatmul.f32.vlgmr.msra.gmra.mxu2 %v5739_v35  ;;  %5817 = vmatmul.f32.vlgmr.msra.gmra.mxu3 %v5740_v9 }
 0xb1f   :  { %5757 = vmatmul.f32.vlgmr.msra.gmra.mxu0 %v5737_v58  ;;  %5777 = vmatmul.f32.vlgmr.msra.gmra.mxu1 %v5738_v26 }
 0xb94   :  { %v5674_v38 = vpop.f32.mrf.mxu0  ;;  %v5694_v1 = vpop.f32.mrf.mxu1 }
 0xb95   :  { %v5695_v46 = vadd.f32 %v5694_v1, %v5674_v38 }
 0xb98   :  { %v5714_v18 = vpop.f32.mrf.mxu2  ;;  %v5734_v60 = vpop.f32.mrf.mxu3 }
 0xb99   :  { %v5715_v28 = vadd.f32 %v5714_v18, %v5695_v46 }
 0xb9b   :  { %v5735_v37 = vadd.f32 %v5734_v60, %v5715_v28 }
 0xb9c   :  { %v5758_v53 = vpop.f32.mrf.mxu0  ;;  %v5778_v7 = vpop.f32.mrf.mxu1 }
 0xb9d   :  { %v5779_v61 = vadd.f32 %v5778_v7, %v5758_v53  ;;  %v5821_v55 = vmul.f32 0.001953125, %v5735_v37 }
 0xb9f   :  { %v5823_v42 = vmul.f32 %v5821_v55, %v5821_v55 }
 0xba0   :  { %v5798_v6 = vpop.f32.mrf.mxu2  ;;  %v5818_v36 = vpop.f32.mrf.mxu3 }
 0xba1   :  { %v5799_v33 = vadd.f32 %v5798_v6, %v5779_v61 }
 0xba3   :  { %v5819_v41 = vadd.f32 %v5818_v36, %v5799_v33 }
 0xba5   :  { %v5822_v57 = vmul.f32 0.001953125, %v5819_v41 }
 0xba7   :  { %v5824_v30 = vsub.f32 %v5822_v57, %v5823_v42 }
 0xba9   :  { %v5827_v39 = vadd.f32 1e-05, %v5824_v30 }
 0xbab   :  { %7341 = vrsqrt.f32 %v5827_v39  ;;  %vm5834_vm15 = vweird.f32 %v5827_v39 }
 0xbb1   :  { %v7342_v49 = vpop.eup %7341 }
 0xbb2   :  { %v5829_v20 = vmul.f32 %v7342_v49, %v5827_v39  ;;  %vm5835_vm14 = vweird.f32 %v7342_v49 }
 0xbb3   :  { %vm5836_vm9 = vmor %vm5834_vm15, %vm5835_vm14 }
 0xbb4   :  { %v5830_v25 = vmul.f32 %v7342_v49, %v5829_v20 }
 0xbb6   :  { %v5831_v50 = vmul.f32 0.5, %v5830_v25 }
 0xbb8   :  { %v5832_v44 = vsub.f32 1.5, %v5831_v50 }
 0xbba   :  { %v5833_v12 = vmul.f32 %v7342_v49, %v5832_v44  ;;  %v7280_v44 = vld [vmem:[%s9809_s1 + $0x170] sm:$0xff] }
 0xbbc   :  { %v5837_v21 = vsel %vm5836_vm9, %v7342_v49, %v5833_v12  ;;  %v7270_v49 = vld [vmem:[%s9809_s1 + $0x188] sm:$0xff] }
 0xbbd   :  { %v5838_v27 = vmul.f32 %v7268_v59, %v5837_v21 }
 0xbbf   :  { %5845 = vperm.xlu1 %7332, %v5838_v27   ;;  %v5841_v23 = vmul.f32 %v5838_v27, %v5821_v55  ;;  %v7271_v55 = vld [vmem:[%s9809_s1 + $0x168] sm:$0xff] }
 0xbc1   :  { %v5842_v8 = vsub.f32 %v7269_v17, %v5841_v23 }
 0xbc3   :  { %5854 = vperm.xlu2 %7330, %v5842_v8  }
 0xc1d   :  { %v5855_v47 = vpop.permute.xlu2 %5854 }
 0xc31   :  { %v5846_v15 = vpop.permute.xlu1 %5845 }
 0xc32   :  { %v5849_v56 = vmul.f32 %v5846_v15, %v5654_v45  ;;  %v5850_v48 = vmul.f32 %v5846_v15, %v5655_v0  ;;  %v5851_v31 = vmul.f32 %v5846_v15, %v5656_v11  ;;  %v5848_v19 = vmul.f32 %v5846_v15, %v5653_v43  ;;  %v7285_v15 = vld [vmem:[%s9809_s1 + $0x178] sm:$0xff] }
 0xc34   :  { %v5858_v16 = vadd.f32 %v5855_v47, %v5849_v56  ;;  %v5859_v34 = vadd.f32 %v5855_v47, %v5850_v48  ;;  %v5860_v32 = vadd.f32 %v5855_v47, %v5851_v31  ;;  %v5857_v26 = vadd.f32 %v5855_v47, %v5848_v19 }
 0xc36   :  { %v5862_v35 = vmul.f32 0.1, %v5858_v16  ;;  %v5863_v9 = vmul.f32 0.1, %v5859_v34  ;;  %v5864_v58 = vmul.f32 0.1, %v5860_v32 }
 0xc37   :  { %v5861_v0 = vmul.f32 0.1, %v5857_v26 }
 0xc38   :  { %v9465_v38 = vmax.f32 %v5858_v16, %v5862_v35  ;;  %v5867_v1 = vmax.f32 %v5859_v34, %v5863_v9  ;;  %v5868_v46 = vmax.f32 %v5860_v32, %v5864_v58 }
 0xc39   :  { %v5865_v11 = vmax.f32 %v5857_v26, %v5861_v0  ;;  %v9944_v26 = vld [vmem:[#allocation5_spill] sm:$0xff]  ;;  %v7295_v0 = vld [vmem:[%s9809_s1 + $0x190] sm:$0xff] }
 0xc3a   :  { %5875 = vrot.lane.b32.xlu1 %v5867_v1, %s7371_s22  ;;  %5873 = vrot.lane.b32.xlu0 %v9465_v38, %s7371_s22 }
 0xc3b   :  { %5877 = vrot.lane.b32.xlu2 %v5868_v46, %s7371_s22 }
 0xc42   :  { %6057 = vrot.lane.b32.xlu1 %v9465_v38, %s7372_s23  ;;  %5871 = vrot.lane.b32.xlu0 %v5865_v11, %s7371_s22 }
 0xc43   :  { %6059 = vrot.lane.b32.xlu2 %v5867_v1, %s7372_s23 }
 0xc4a   :  { %6162 = vrot.lane.b32.xlu1 %v9465_v38, %s7373_s28  ;;  %6061 = vrot.lane.b32.xlu0 %v5868_v46, %s7372_s23 }
 0xc4b   :  { %6164 = vrot.lane.b32.xlu2 %v5867_v1, %s7373_s28 }
 0xc52   :  { %6166 = vrot.lane.b32.xlu1 %v5868_v46, %s7373_s28  ;;  %6055 = vrot.lane.b32.xlu0 %v5865_v11, %s7372_s23 }
 0xc53   :  { %6267 = vrot.lane.b32.xlu2 %v9465_v38, %s7374_s0 }
 0xc5a   :  { %6160 = vrot.lane.b32.xlu1 %v5865_v11, %s7373_s28  ;;  %6269 = vrot.lane.b32.xlu0 %v5867_v1, %s7374_s0 }
 0xc5b   :  { %6271 = vrot.lane.b32.xlu2 %v5868_v46, %s7374_s0 }
 0xc62   :  { %6376 = vrot.lane.b32.xlu1 %v5868_v46, %s7375_s29  ;;  %6374 = vrot.lane.b32.xlu0 %v5867_v1, %s7375_s29 }
 0xc63   :  { %6265 = vrot.lane.b32.xlu2 %v5865_v11, %s7374_s0 }
 0xc6a   :  { %6479 = vrot.lane.b32.xlu1 %v5867_v1, %s7376_s30  ;;  %6370 = vrot.lane.b32.xlu0 %v5865_v11, %s7375_s29 }
 0xc6b   :  { %6481 = vrot.lane.b32.xlu2 %v5868_v46, %s7376_s30 }
 0xc72   :  { %6475 = vrot.lane.b32.xlu1 %v5865_v11, %s7376_s30  ;;  %6372 = vrot.lane.b32.xlu0 %v9465_v38, %s7375_s29 }
 0xc73   :  { %6584 = vrot.lane.b32.xlu2 %v5867_v1, %s7377_s6 }
 0xc7a   :  { %6477 = vrot.lane.b32.xlu1 %v9465_v38, %s7376_s30  ;;  %6586 = vrot.lane.b32.xlu0 %v5868_v46, %s7377_s6 }
 0xc7b   :  { %6580 = vrot.lane.b32.xlu2 %v5865_v11, %s7377_s6 }
 0xc82   :  { %6691 = vrot.lane.b32.xlu1 %v5868_v46, %s7378_s7  ;;  %6689 = vrot.lane.b32.xlu0 %v5867_v1, %s7378_s7 }
 0xc83   :  { %6582 = vrot.lane.b32.xlu2 %v9465_v38, %s7377_s6 }
 0xc8a   :  { %6687 = vrot.lane.b32.xlu1 %v9465_v38, %s7378_s7  ;;  %6685 = vrot.lane.b32.xlu0 %v5865_v11, %s7378_s7 }
 0xc95   :  { %v5878_v43 = vpop.permute.xlu2 %5877 }
 0xc9d   :  { %v6060_v45 = vpop.permute.xlu2 %6059 }
 0xca5   :  { %v6165_v18 = vpop.permute.xlu2 %6164 }
 0xcac   :  { %v5876_v60 = vpop.permute.xlu1 %5875  ;;  %v5874_v28 = vpop.permute.xlu0 %5873 }
 0xcad   :  { %v5879_v53 = vsel %vm38_vm0, %v5876_v60, %v5878_v43  ;;  %v9509_v7 = vpop.permute.xlu2 %6267  ;;  %v5880_v37 = vsel %vm38_vm0, %v5874_v28, %v5876_v60  ;;  %v9946_v60 = vld [vmem:[#allocation7_spill] sm:$0xff] }
 0xcae   :  { %v5886_v61 = vmul.f32 %v5879_v53, %v8726_v63  ;;  %v5885_v6 = vmul.f32 %v5880_v37, %v8724_v62  ;;  %v9947_v53 = vld [vmem:[#allocation6_spill] sm:$0xff] }
 0xcb0   :  { %5947 = vmatpush.msrb.mxu2 %v5885_v6  ;;  %5967 = vmatpush.msrb.mxu3 %v5886_v61  ;;  %v7300_v61 = vld [vmem:[%s9809_s1 + $0x198] sm:$0xff] }
 0xcb1   :  { %7274 = vmatmul.msk.f32.vlgmr.msrb.gmra.mxu2 %vm57_vm2, %v7271_v55  ;;  %7275 = vmatmul.msk.f32.vlgmr.msrb.gmra.mxu3 %vm57_vm2, %v7271_v55 }
 0xcb2   :  { %6030 = vmatpush.msra.mxu2 %v5867_v1  ;;  %6050 = vmatpush.msra.mxu3 %v5868_v46  ;;  %v7290_v1 = vld [vmem:[%s9809_s1 + $0x180] sm:$0xff] }
 0xcb4   :  { %v6058_v33 = vpop.permute.xlu1 %6057  ;;  %v5872_v36 = vpop.permute.xlu0 %5871 }
 0xcb5   :  { %v6064_v41 = vsel %vm234_vm1, %v6058_v33, %v6060_v45  ;;  %v5881_v62 = vsel %vm38_vm0, %v5872_v36, %v5874_v28  ;;  %v5882_v63 = vsel %vm38_vm0, %v5878_v43, %v5872_v36  ;;  %v6272_v39 = vpop.permute.xlu2 %6271 }
 0xcb6   :  { %v6069_v42 = vmul.f32 %v6064_v41, %v8744_v52  ;;  %v5883_v57 = vmul.f32 %v5882_v63, %v8742_v51  ;;  %v5884_v30 = vmul.f32 %v5881_v62, %v8746_v5  ;;  %v9948_v62 = vld [vmem:[#allocation11_spill] sm:$0xff] }
 0xcb8   :  { %5907 = vmatpush.msrb.mxu0 %v5883_v57  ;;  %5927 = vmatpush.msrb.mxu1 %v5884_v30  ;;  %v9950_v30 = vld [vmem:[#allocation9_spill] sm:$0xff] }
 0xcb9   :  { %6131 = vmatpush.msrb.mxu2 %v6069_v42  ;;  %7272 = vmatmul.msk.f32.vlgmr.msrb.gmra.mxu0 %vm57_vm2, %v7271_v55  ;;  %v9949_v42 = vld [vmem:[#allocation12_spill] sm:$0xff] }
 0xcba   :  { %7273 = vmatmul.msk.f32.vlgmr.msrb.gmra.mxu1 %vm57_vm2, %v7271_v55  ;;  %5990 = vmatpush.msra.mxu0 %v5865_v11 }
 0xcbb   :  { %6010 = vmatpush.msra.mxu1 %v9465_v38  ;;  %7278 = vmatmul.msk.f32.vlgmr.msra.gmra.mxu2 %vm57_vm2, %v7270_v49 }
 0xcbc   :  { %7279 = vmatmul.msk.f32.vlgmr.msra.gmra.mxu3 %vm57_vm2, %v7270_v49  ;;  %v6163_v51 = vpop.permute.xlu1 %6162  ;;  %v6062_v52 = vpop.permute.xlu0 %6061 }
 0xcbd   :  { %v6169_v5 = vsel %vm351_vm3, %v6163_v51, %v6165_v18  ;;  %v6063_v20 = vsel %vm234_vm1, %v6060_v45, %v6062_v52  ;;  %v6266_v59 = vpop.permute.xlu2 %6265 }
 0xcbe   :  { %v6174_v25 = vmul.f32 %v6169_v5, %v8770_v13  ;;  %v6070_v50 = vmul.f32 %v6063_v20, %v8766_v54 }
 0xcc0   :  { %6151 = vmatpush.msrb.mxu3 %v6070_v50  ;;  %6236 = vmatpush.msra.mxu2 %v6174_v25 }
 0xcc1   :  { %7276 = vmatmul.msk.f32.vlgmr.msra.gmra.mxu0 %vm57_vm2, %v7270_v49 }
 0xcc2   :  { %7277 = vmatmul.msk.f32.vlgmr.msra.gmra.mxu1 %vm57_vm2, %v7270_v49 }
 0xcc3   :  { %7283 = vmatmul.msk.f32.vlgmr.msrb.gmra.mxu2 %vm57_vm2, %v7280_v44 }
 0xcc4   :  { %7284 = vmatmul.msk.f32.vlgmr.msrb.gmra.mxu3 %vm57_vm2, %v7280_v44  ;;  %v6167_v12 = vpop.permute.xlu1 %6166  ;;  %v6056_v21 = vpop.permute.xlu0 %6055 }
 0xcc5   :  { %v6168_v54 = vsel %vm351_vm3, %v6165_v18, %v6167_v12  ;;  %v6065_v13 = vsel %vm234_vm1, %v6056_v21, %v6058_v33  ;;  %v6066_v27 = vsel %vm234_vm1, %v6062_v52, %v6056_v21  ;;  %v6482_v56 = vpop.permute.xlu2 %6481 }
 0xcc6   :  { %v6175_v17 = vmul.f32 %v6168_v54, %v8772_v14  ;;  %v6067_v23 = vmul.f32 %v6066_v27, %v8793_v24  ;;  %v6068_v8 = vmul.f32 %v6065_v13, %v8795_v22  ;;  %v6275_v14 = vsel %vm468_vm4, %v6266_v59, %v9509_v7  ;;  %v9952_v54 = vld [vmem:[#allocation14_spill] sm:$0xff]  ;;  %v9953_v27 = vld [vmem:[#allocation13_spill] sm:$0xff] }
 0xcc7   :  { %v6276_v24 = vsel %vm468_vm4, %v6272_v39, %v6266_v59  ;;  %v6278_v38 = vmul.f32 %v6275_v14, %v9944_v26  ;;  %v9956_v14 = vld [vmem:[#allocation16_spill] sm:$0xff] }
 0xcc8   :  { %6091 = vmatpush.msrb.mxu0 %v6067_v23  ;;  %6111 = vmatpush.msrb.mxu1 %v6068_v8  ;;  %v6277_v58 = vmul.f32 %v6276_v24, %v8845_v2  ;;  %v9945_v2 = vld [vmem:[#allocation8_spill] sm:$0xff]  ;;  %v9954_v23 = vld [vmem:[#allocation15_spill] sm:$0xff] }
 0xcc9   :  { %6256 = vmatpush.msra.mxu3 %v6175_v17  ;;  %7281 = vmatmul.msk.f32.vlgmr.msrb.gmra.mxu0 %vm57_vm2, %v7280_v44 }
 0xcca   :  { %7282 = vmatmul.msk.f32.vlgmr.msrb.gmra.mxu1 %vm57_vm2, %v7280_v44 }
 0xccb   :  { %7288 = vmatmul.msk.f32.vlgmr.msra.gmra.mxu2 %vm57_vm2, %v7285_v15 }
 0xccc   :  { %7289 = vmatmul.msk.f32.vlgmr.msra.gmra.mxu3 %vm57_vm2, %v7285_v15  ;;  %v6161_v22 = vpop.permute.xlu1 %6160  ;;  %v6270_v48 = vpop.permute.xlu0 %6269 }
 0xccd   :  { %v6170_v31 = vsel %vm351_vm3, %v6161_v22, %v6163_v51  ;;  %v6171_v47 = vsel %vm351_vm3, %v6167_v12, %v6161_v22  ;;  %v6273_v19 = vsel %vm468_vm4, %v6270_v48, %v6272_v39  ;;  %v6274_v16 = vsel %vm468_vm4, %v9509_v7, %v6270_v48  ;;  %v9951_v12 = vld [vmem:[#allocation10_spill] sm:$0xff]  ;;  %v7305_v22 = vld [vmem:[%s9809_s1 + $0x1a0] sm:$0xff] }
 0xcce   :  { %v6172_v34 = vmul.f32 %v6171_v47, %v8797_v4  ;;  %v6173_v32 = vmul.f32 %v6170_v31, %v8799_v3  ;;  %v6279_v35 = vmul.f32 %v6274_v16, %v8825_v40  ;;  %v6280_v9 = vmul.f32 %v6273_v19, %v8827_v29  ;;  %v6585_v40 = vpop.permute.xlu2 %6584  ;;  %v9957_v19 = vld [vmem:[#allocation18_spill] sm:$0xff] }
 0xcd0   :  { %6196 = vmatpush.msra.mxu0 %v6172_v34  ;;  %6216 = vmatpush.msra.mxu1 %v6173_v32  ;;  %v7310_v34 = vld [vmem:[%s9809_s1 + $0x1a8] sm:$0xff]  ;;  %v9958_v32 = vmov 1.0  }
 0xcd1   :  { %6341 = vmatpush.msrb.mxu2 %v6279_v35  ;;  %6361 = vmatpush.msrb.mxu3 %v6280_v9 }
 0xcd2   :  { %7286 = vmatmul.msk.f32.vlgmr.msra.gmra.mxu0 %vm57_vm2, %v7285_v15  ;;  %7287 = vmatmul.msk.f32.vlgmr.msra.gmra.mxu1 %vm57_vm2, %v7285_v15  ;;  %v9955_v15 = vld [vmem:[#allocation17_spill] sm:$0xff] }
 0xcd3   :  { %6301 = vmatpush.msrb.mxu0 %v6277_v58  ;;  %6321 = vmatpush.msrb.mxu1 %v6278_v38 }
 0xcd4   :  { %7293 = vmatmul.msk.f32.vlgmr.msrb.gmra.mxu2 %vm57_vm2, %v7290_v1  ;;  %7294 = vmatmul.msk.f32.vlgmr.msrb.gmra.mxu3 %vm57_vm2, %v7290_v1  ;;  %v6377_v4 = vpop.permute.xlu1 %6376  ;;  %v6375_v3 = vpop.permute.xlu0 %6374 }
 0xcd5   :  { %v6378_v29 = vsel %vm585_vm5, %v6375_v3, %v6377_v4 }
 0xcd6   :  { %v6384_v46 = vmul.f32 %v6378_v29, %v9945_v2  ;;  %v6581_v37 = vpop.permute.xlu2 %6580  ;;  %v9961_v29 = vld [vmem:[#allocation21_spill] sm:$0xff] }
 0xcd8   :  { %6446 = vmatpush.msra.mxu2 %v6384_v46 }
 0xcda   :  { %7291 = vmatmul.msk.f32.vlgmr.msrb.gmra.mxu0 %vm57_vm2, %v7290_v1  ;;  %7292 = vmatmul.msk.f32.vlgmr.msrb.gmra.mxu1 %vm57_vm2, %v7290_v1  ;;  %v9959_v1 = vld [vmem:[#allocation19_spill] sm:$0xff] }
 0xcdc   :  { %7298 = vmatmul.msk.f32.vlgmr.msra.gmra.mxu2 %vm57_vm2, %v7295_v0  ;;  %v6480_v11 = vpop.permute.xlu1 %6479  ;;  %v6371_v43 = vpop.permute.xlu0 %6370 }
 0xcdd   :  { %v6483_v45 = vsel %vm702_vm6, %v6480_v11, %v6482_v56  ;;  %v6381_v18 = vsel %vm585_vm5, %v6377_v4, %v6371_v43 }
 0xcde   :  { %v6489_v28 = vmul.f32 %v6483_v45, %v9946_v60  ;;  %v6385_v7 = vmul.f32 %v6381_v18, %v9947_v53  ;;  %v6583_v49 = vpop.permute.xlu2 %6582 }
 0xcdf   :  { %v6589_v51 = vsel %vm819_vm7, %v6583_v49, %v6585_v40  ;;  %v6590_v52 = vsel %vm819_vm7, %v6581_v37, %v6583_v49 }
 0xce0   :  { %6466 = vmatpush.msra.mxu3 %v6385_v7  ;;  %6551 = vmatpush.msrb.mxu2 %v6489_v28  ;;  %v6593_v24 = vmul.f32 %v6589_v51, %v9956_v14 }
 0xce1   :  { %7299 = vmatmul.msk.f32.vlgmr.msra.gmra.mxu3 %vm57_vm2, %v7295_v0 }
 0xce4   :  { %7303 = vmatmul.msk.f32.vlgmr.msrb.gmra.mxu2 %vm57_vm2, %v7300_v61  ;;  %v6476_v6 = vpop.permute.xlu1 %6475  ;;  %v6373_v55 = vpop.permute.xlu0 %6372 }
 0xce5   :  { %v6486_v33 = vsel %vm702_vm6, %v6482_v56, %v6476_v6  ;;  %v6379_v36 = vsel %vm585_vm5, %v6373_v55, %v6375_v3  ;;  %v6380_v41 = vsel %vm585_vm5, %v6371_v43, %v6373_v55  ;;  %v6592_v56 = vmul.f32 %v6590_v52, %v9955_v15  ;;  %v9960_v3 = vld [vmem:[#allocation20_spill] sm:$0xff] }
 0xce6   :  { %v6490_v63 = vmul.f32 %v6486_v33, %v9948_v62  ;;  %v6382_v57 = vmul.f32 %v6380_v41, %v9949_v42  ;;  %v6383_v39 = vmul.f32 %v6379_v36, %v9950_v30 }
 0xce8   :  { %6406 = vmatpush.msra.mxu0 %v6382_v57  ;;  %6426 = vmatpush.msra.mxu1 %v6383_v39 }
 0xce9   :  { %6571 = vmatpush.msrb.mxu3 %v6490_v63  ;;  %7296 = vmatmul.msk.f32.vlgmr.msra.gmra.mxu0 %vm57_vm2, %v7295_v0 }
 0xcea   :  { %7297 = vmatmul.msk.f32.vlgmr.msra.gmra.mxu1 %vm57_vm2, %v7295_v0  ;;  %7304 = vmatmul.msk.f32.vlgmr.msrb.gmra.mxu3 %vm57_vm2, %v7300_v61 }
 0xcec   :  { %v6478_v5 = vpop.permute.xlu1 %6477  ;;  %v6587_v20 = vpop.permute.xlu0 %6586 }
 0xced   :  { %v6484_v25 = vsel %vm702_vm6, %v6478_v5, %v6480_v11  ;;  %v6485_v50 = vsel %vm702_vm6, %v6476_v6, %v6478_v5  ;;  %v6588_v44 = vsel %vm819_vm7, %v6585_v40, %v6587_v20  ;;  %v6591_v59 = vsel %vm819_vm7, %v6587_v20, %v6581_v37 }
 0xcee   :  { %v6487_v21 = vmul.f32 %v6485_v50, %v9951_v12  ;;  %v6488_v13 = vmul.f32 %v6484_v25, %v9952_v54  ;;  %v6594_v17 = vmul.f32 %v6588_v44, %v9953_v27  ;;  %v6595_v8 = vmul.f32 %v6591_v59, %v9954_v23 }
 0xcf0   :  { %6511 = vmatpush.msrb.mxu0 %v6487_v21  ;;  %6531 = vmatpush.msrb.mxu1 %v6488_v13 }
 0xcf1   :  { %6656 = vmatpush.msra.mxu2 %v6594_v17  ;;  %6676 = vmatpush.msra.mxu3 %v6595_v8 }
 0xcf2   :  { %7301 = vmatmul.msk.f32.vlgmr.msrb.gmra.mxu0 %vm57_vm2, %v7300_v61  ;;  %7302 = vmatmul.msk.f32.vlgmr.msrb.gmra.mxu1 %vm57_vm2, %v7300_v61 }
 0xcf3   :  { %6616 = vmatpush.msra.mxu0 %v6592_v56  ;;  %6636 = vmatpush.msra.mxu1 %v6593_v24 }
 0xcf4   :  { %7308 = vmatmul.msk.f32.vlgmr.msra.gmra.mxu2 %vm57_vm2, %v7305_v22  ;;  %7309 = vmatmul.msk.f32.vlgmr.msra.gmra.mxu3 %vm57_vm2, %v7305_v22  ;;  %v6692_v48 = vpop.permute.xlu1 %6691  ;;  %v6690_v31 = vpop.permute.xlu0 %6689 }
 0xcf5   :  { %v6693_v47 = vsel %vm936_vm8, %v6690_v31, %v6692_v48 }
 0xcf6   :  { %v6699_v16 = vmul.f32 %v6693_v47, %v9957_v19 }
 0xcf8   :  { %6761 = vmatpush.msrb.mxu2 %v6699_v16 }
 0xcfa   :  { %6830 = vmatpush.msra.mxu2 %v9958_v32  ;;  %7306 = vmatmul.msk.f32.vlgmr.msra.gmra.mxu0 %vm57_vm2, %v7305_v22 }
 0xcfb   :  { %7307 = vmatmul.msk.f32.vlgmr.msra.gmra.mxu1 %vm57_vm2, %v7305_v22 }
 0xcfc   :  { %6831 = vmatpush.msra.mxu2 %v9958_v32  ;;  %v6688_v35 = vpop.permute.xlu1 %6687  ;;  %v6686_v9 = vpop.permute.xlu0 %6685 }
 0xcfd   :  { %7313 = vmatmul.msk.f32.vlgmr.msrb.gmra.mxu2 %vm57_vm2, %v7310_v34  ;;  %v6694_v58 = vsel %vm936_vm8, %v6688_v35, %v6690_v31  ;;  %v6695_v26 = vsel %vm936_vm8, %v6686_v9, %v6688_v35  ;;  %v6696_v38 = vsel %vm936_vm8, %v6692_v48, %v6686_v9 }
 0xcfe   :  { %6832 = vmatpush.msra.mxu2 %v9958_v32  ;;  %v6698_v4 = vmul.f32 %v6694_v58, %v9959_v1  ;;  %v6697_v40 = vmul.f32 %v6695_v26, %v9960_v3  ;;  %v6700_v2 = vmul.f32 %v6696_v38, %v9961_v29 }
 0xd00   :  { %6833 = vmatpush.msra.mxu2 %v9958_v32  ;;  %6721 = vmatpush.msrb.mxu0 %v6697_v40 }
 0xd01   :  { %6741 = vmatpush.msrb.mxu1 %v6698_v4  ;;  %6781 = vmatpush.msrb.mxu3 %v6700_v2 }
 0xd02   :  { %6790 = vmatpush.msra.mxu0 %v9958_v32  ;;  %7314 = vmatmul.msk.f32.vlgmr.msrb.gmra.mxu3 %vm57_vm2, %v7310_v34 }
 0xd03   :  { %7311 = vmatmul.msk.f32.vlgmr.msrb.gmra.mxu0 %vm57_vm2, %v7310_v34  ;;  %7312 = vmatmul.msk.f32.vlgmr.msrb.gmra.mxu1 %vm57_vm2, %v7310_v34 }
 0xd04   :  { %6810 = vmatpush.msra.mxu1 %v9958_v32  ;;  %6791 = vmatpush.msra.mxu0 %v9958_v32 }
 0xd05   :  { %6834 = vmatpush.msra.mxu2 %v9958_v32  ;;  %6850 = vmatpush.msra.mxu3 %v9958_v32 }
 0xd06   :  { %6811 = vmatpush.msra.mxu1 %v9958_v32  ;;  %6792 = vmatpush.msra.mxu0 %v9958_v32 }
 0xd07   :  { %6835 = vmatpush.msra.mxu2 %v9958_v32  ;;  %6851 = vmatpush.msra.mxu3 %v9958_v32 }
 0xd08   :  { %6812 = vmatpush.msra.mxu1 %v9958_v32  ;;  %6793 = vmatpush.msra.mxu0 %v9958_v32 }
 0xd09   :  { %6836 = vmatpush.msra.mxu2 %v9958_v32  ;;  %6852 = vmatpush.msra.mxu3 %v9958_v32 }
 0xd0a   :  { %6813 = vmatpush.msra.mxu1 %v9958_v32  ;;  %6794 = vmatpush.msra.mxu0 %v9958_v32 }
 0xd0b   :  { %6837 = vmatpush.msra.mxu2 %v9958_v32  ;;  %6853 = vmatpush.msra.mxu3 %v9958_v32 }
 0xd0c   :  { %6814 = vmatpush.msra.mxu1 %v9958_v32  ;;  %6795 = vmatpush.msra.mxu0 %v9958_v32 }
 0xd0d   :  { %6838 = vmatpush.msra.mxu2 %v9958_v32  ;;  %6854 = vmatpush.msra.mxu3 %v9958_v32 }
 0xd0e   :  { %6815 = vmatpush.msra.mxu1 %v9958_v32  ;;  %6796 = vmatpush.msra.mxu0 %v9958_v32 }
 0xd0f   :  { %6839 = vmatpush.msra.mxu2 %v9958_v32  ;;  %6855 = vmatpush.msra.mxu3 %v9958_v32 }
 0xd10   :  { %6816 = vmatpush.msra.mxu1 %v9958_v32  ;;  %6797 = vmatpush.msra.mxu0 %v9958_v32 }
 0xd11   :  { %6840 = vmatpush.msra.mxu2 %v9958_v32  ;;  %6856 = vmatpush.msra.mxu3 %v9958_v32 }
 0xd12   :  { %6817 = vmatpush.msra.mxu1 %v9958_v32  ;;  %6798 = vmatpush.msra.mxu0 %v9958_v32 }
 0xd13   :  { %6841 = vmatpush.msra.mxu2 %v9958_v32  ;;  %6857 = vmatpush.msra.mxu3 %v9958_v32 }
 0xd14   :  { %6818 = vmatpush.msra.mxu1 %v9958_v32  ;;  %6799 = vmatpush.msra.mxu0 %v9958_v32 }
 0xd15   :  { %6842 = vmatpush.msra.mxu2 %v9958_v32  ;;  %6858 = vmatpush.msra.mxu3 %v9958_v32 }
 0xd16   :  { %6819 = vmatpush.msra.mxu1 %v9958_v32  ;;  %6800 = vmatpush.msra.mxu0 %v9958_v32 }
 0xd17   :  { %6843 = vmatpush.msra.mxu2 %v9958_v32  ;;  %6859 = vmatpush.msra.mxu3 %v9958_v32 }
 0xd18   :  { %6820 = vmatpush.msra.mxu1 %v9958_v32  ;;  %6801 = vmatpush.msra.mxu0 %v9958_v32 }
 0xd19   :  { %6844 = vmatpush.msra.mxu2 %v9958_v32  ;;  %6860 = vmatpush.msra.mxu3 %v9958_v32 }
 0xd1a   :  { %6821 = vmatpush.msra.mxu1 %v9958_v32  ;;  %6802 = vmatpush.msra.mxu0 %v9958_v32 }
 0xd1b   :  { %6845 = vmatpush.msra.mxu2 %v9958_v32  ;;  %6861 = vmatpush.msra.mxu3 %v9958_v32 }
 0xd1c   :  { %6822 = vmatpush.msra.mxu1 %v9958_v32  ;;  %6803 = vmatpush.msra.mxu0 %v9958_v32 }
 0xd1d   :  { %6914 = vmatpush.msrb.mxu2 %v9958_v32  ;;  %6862 = vmatpush.msra.mxu3 %v9958_v32 }
 0xd1e   :  { %6823 = vmatpush.msra.mxu1 %v9958_v32  ;;  %6804 = vmatpush.msra.mxu0 %v9958_v32 }
 0xd1f   :  { %6915 = vmatpush.msrb.mxu2 %v9958_v32  ;;  %6863 = vmatpush.msra.mxu3 %v9958_v32 }
 0xd20   :  { %6824 = vmatpush.msra.mxu1 %v9958_v32  ;;  %6805 = vmatpush.msra.mxu0 %v9958_v32 }
 0xd21   :  { %6916 = vmatpush.msrb.mxu2 %v9958_v32  ;;  %6864 = vmatpush.msra.mxu3 %v9958_v32 }
 0xd22   :  { %6825 = vmatpush.msra.mxu1 %v9958_v32  ;;  %6874 = vmatpush.msrb.mxu0 %v9958_v32 }
 0xd23   :  { %6917 = vmatpush.msrb.mxu2 %v9958_v32  ;;  %6865 = vmatpush.msra.mxu3 %v9958_v32 }
 0xd24   :  { %6894 = vmatpush.msrb.mxu1 %v9958_v32  ;;  %6875 = vmatpush.msrb.mxu0 %v9958_v32 }
 0xd25   :  { %6918 = vmatpush.msrb.mxu2 %v9958_v32  ;;  %6934 = vmatpush.msrb.mxu3 %v9958_v32 }
 0xd26   :  { %6895 = vmatpush.msrb.mxu1 %v9958_v32  ;;  %6876 = vmatpush.msrb.mxu0 %v9958_v32 }
 0xd27   :  { %6919 = vmatpush.msrb.mxu2 %v9958_v32  ;;  %6935 = vmatpush.msrb.mxu3 %v9958_v32 }
 0xd28   :  { %6896 = vmatpush.msrb.mxu1 %v9958_v32  ;;  %6877 = vmatpush.msrb.mxu0 %v9958_v32 }
 0xd29   :  { %6920 = vmatpush.msrb.mxu2 %v9958_v32  ;;  %6936 = vmatpush.msrb.mxu3 %v9958_v32 }
 0xd2a   :  { %6897 = vmatpush.msrb.mxu1 %v9958_v32  ;;  %6878 = vmatpush.msrb.mxu0 %v9958_v32 }
 0xd2b   :  { %6921 = vmatpush.msrb.mxu2 %v9958_v32  ;;  %6937 = vmatpush.msrb.mxu3 %v9958_v32 }
 0xd2c   :  { %6898 = vmatpush.msrb.mxu1 %v9958_v32  ;;  %6879 = vmatpush.msrb.mxu0 %v9958_v32 }
 0xd2d   :  { %6922 = vmatpush.msrb.mxu2 %v9958_v32  ;;  %6938 = vmatpush.msrb.mxu3 %v9958_v32 }
 0xd2e   :  { %6899 = vmatpush.msrb.mxu1 %v9958_v32  ;;  %6880 = vmatpush.msrb.mxu0 %v9958_v32 }
 0xd2f   :  { %6923 = vmatpush.msrb.mxu2 %v9958_v32  ;;  %6939 = vmatpush.msrb.mxu3 %v9958_v32 }
 0xd30   :  { %6900 = vmatpush.msrb.mxu1 %v9958_v32  ;;  %6881 = vmatpush.msrb.mxu0 %v9958_v32 }
 0xd31   :  { %6924 = vmatpush.msrb.mxu2 %v9958_v32  ;;  %6940 = vmatpush.msrb.mxu3 %v9958_v32 }
 0xd32   :  { %6901 = vmatpush.msrb.mxu1 %v9958_v32  ;;  %6882 = vmatpush.msrb.mxu0 %v9958_v32 }
 0xd33   :  { %6925 = vmatpush.msrb.mxu2 %v9958_v32  ;;  %6941 = vmatpush.msrb.mxu3 %v9958_v32 }
 0xd34   :  { %6902 = vmatpush.msrb.mxu1 %v9958_v32  ;;  %6883 = vmatpush.msrb.mxu0 %v9958_v32  ;;  %v5949_v10 = vpop.f32.mrf.mxu2  ;;  %v5969_v11 = vpop.f32.mrf.mxu3 }
 0xd35   :  { %6926 = vmatpush.msrb.mxu2 %v9958_v32  ;;  %6942 = vmatpush.msrb.mxu3 %v9958_v32 }
 0xd36   :  { %6903 = vmatpush.msrb.mxu1 %v9958_v32  ;;  %6884 = vmatpush.msrb.mxu0 %v9958_v32  ;;  %v5909_v46 = vpop.f32.mrf.mxu0 }
 0xd37   :  { %v5929_v0 = vpop.f32.mrf.mxu1  ;;  %6927 = vmatpush.msrb.mxu2 %v9958_v32  ;;  %6943 = vmatpush.msrb.mxu3 %v9958_v32 }
 0xd38   :  { %6904 = vmatpush.msrb.mxu1 %v9958_v32  ;;  %6885 = vmatpush.msrb.mxu0 %v9958_v32 }
 0xd39   :  { %6928 = vmatpush.msrb.mxu2 %v9958_v32  ;;  %6944 = vmatpush.msrb.mxu3 %v9958_v32 }
 0xd3a   :  { %6905 = vmatpush.msrb.mxu1 %v9958_v32  ;;  %6886 = vmatpush.msrb.mxu0 %v9958_v32 }
 0xd3b   :  { %6929 = vmatpush.msrb.mxu2 %v9958_v32  ;;  %6945 = vmatpush.msrb.mxu3 %v9958_v32 }
 0xd3c   :  { %6906 = vmatpush.msrb.mxu1 %v9958_v32  ;;  %6887 = vmatpush.msrb.mxu0 %v9958_v32 }
 0xd3d   :  { %6946 = vmatpush.msrb.mxu3 %v9958_v32 }
 0xd3e   :  { %6907 = vmatpush.msrb.mxu1 %v9958_v32  ;;  %6888 = vmatpush.msrb.mxu0 %v9958_v32  ;;  %v6032_v43 = vpop.f32.mrf.mxu2  ;;  %v5992_v45 = vpop.f32.mrf.mxu0 }
 0xd3f   :  { %6947 = vmatpush.msrb.mxu3 %v9958_v32  ;;  %v6012_v18 = vpop.f32.mrf.mxu1  ;;  %v6052_v60 = vpop.f32.mrf.mxu3  ;;  %v6033_v5 = vadd.f32 %v6032_v43, %v5949_v10  ;;  %v5993_v20 = vadd.f32 %v5992_v45, %v5909_v46 }
 0xd40   :  { %6908 = vmatpush.msrb.mxu1 %v9958_v32  ;;  %6889 = vmatpush.msrb.mxu0 %v9958_v32  ;;  %v6013_v25 = vadd.f32 %v6012_v18, %v5929_v0  ;;  %v6053_v54 = vadd.f32 %v6052_v60, %v5969_v11 }
 0xd41   :  { %6948 = vmatpush.msrb.mxu3 %v9958_v32 }
 0xd42   :  { %6909 = vmatpush.msrb.mxu1 %v9958_v32 }
 0xd43   :  { %6949 = vmatpush.msrb.mxu3 %v9958_v32 }
 0xd46   :  { %v6133_v28 = vpop.f32.mrf.mxu2  ;;  %v6093_v53 = vpop.f32.mrf.mxu0 }
 0xd47   :  { %v6113_v7 = vpop.f32.mrf.mxu1  ;;  %v6153_v37 = vpop.f32.mrf.mxu3  ;;  %v6158_v50 = vadd.f32 %v6133_v28, %v6033_v5  ;;  %v6156_v59 = vadd.f32 %v6093_v53, %v5993_v20 }
 0xd48   :  { %v6157_v12 = vadd.f32 %v6113_v7, %v6013_v25  ;;  %v6159_v22 = vadd.f32 %v6153_v37, %v6053_v54 }
 0xd4e   :  { %v6238_v61 = vpop.f32.mrf.mxu2 }
 0xd4f   :  { %v6198_v6 = vpop.f32.mrf.mxu0  ;;  %v6218_v55 = vpop.f32.mrf.mxu1  ;;  %v6263_v21 = vadd.f32 %v6238_v61, %v6158_v50 }
 0xd50   :  { %v6258_v33 = vpop.f32.mrf.mxu3  ;;  %v6261_v13 = vadd.f32 %v6198_v6, %v6156_v59  ;;  %v6262_v27 = vadd.f32 %v6218_v55, %v6157_v12  ;;  %v7315_v59 = vld [vmem:[%s9810_s2 + $0x28] sm:$0xff]  ;;  %s7381_s2 = smov [#allocation2]  }
 0xd51   :  { %v6264_v19 = vadd.f32 %v6258_v33, %v6159_v22 }
 0xd57   :  { %v6343_v36 = vpop.f32.mrf.mxu2  ;;  %v6303_v41 = vpop.f32.mrf.mxu0 }
 0xd58   :  { %v6323_v62 = vpop.f32.mrf.mxu1  ;;  %v6363_v63 = vpop.f32.mrf.mxu3  ;;  %v6368_v23 = vadd.f32 %v6343_v36, %v6263_v21  ;;  %v6366_v56 = vadd.f32 %v6303_v41, %v6261_v13  ;;  %v7316_v13 = vld [vmem:[%s9811_s3 + $0x28] sm:$0xff]  ;;  %s7010_s3 = sshll.u32 %s7381_s2, 4  ;;  %s7011_s3 = int_to_ptr.vmem [resolvable:$true] %s7010_s3 }
 0xd59   :  { %v6367_v14 = vadd.f32 %v6323_v62, %v6262_v27  ;;  %v6369_v9 = vadd.f32 %v6363_v63, %v6264_v19 }
 0xd5f   :  { %v6448_v42 = vpop.f32.mrf.mxu2 }
 0xd60   :  { %v6473_v24 = vadd.f32 %v6448_v42, %v6368_v23 }
 0xd64   :  { %v6468_v39 = vpop.f32.mrf.mxu3 }
 0xd65   :  { %v6474_v40 = vadd.f32 %v6468_v39, %v6369_v9 }
 0xd66   :  { %v6408_v57 = vpop.f32.mrf.mxu0 }
 0xd67   :  { %v6428_v30 = vpop.f32.mrf.mxu1  ;;  %v6553_v49 = vpop.f32.mrf.mxu2  ;;  %v6471_v48 = vadd.f32 %v6408_v57, %v6366_v56 }
 0xd68   :  { %v6472_v31 = vadd.f32 %v6428_v30, %v6367_v14  ;;  %v6578_v47 = vadd.f32 %v6553_v49, %v6473_v24 }
 0xd6d   :  { %v6573_v44 = vpop.f32.mrf.mxu3 }
 0xd6e   :  { %v6579_v10 = vadd.f32 %v6573_v44, %v6474_v40 }
 0xd6f   :  { %v6513_v51 = vpop.f32.mrf.mxu0  ;;  %v6533_v52 = vpop.f32.mrf.mxu1 }
 0xd70   :  { %v6576_v16 = vadd.f32 %v6513_v51, %v6471_v48  ;;  %v6577_v34 = vadd.f32 %v6533_v52, %v6472_v31 }
 0xd77   :  { %v6658_v17 = vpop.f32.mrf.mxu2  ;;  %v6618_v8 = vpop.f32.mrf.mxu0 }
 0xd78   :  { %v6638_v15 = vpop.f32.mrf.mxu1  ;;  %v6683_v32 = vadd.f32 %v6658_v17, %v6578_v47  ;;  %v6678_v35 = vpop.f32.mrf.mxu3  ;;  %v6681_v58 = vadd.f32 %v6618_v8, %v6576_v16 }
 0xd79   :  { %v6682_v26 = vadd.f32 %v6638_v15, %v6577_v34  ;;  %v6684_v46 = vadd.f32 %v6678_v35, %v6579_v10 }
 0xd80   :  { %v6763_v38 = vpop.f32.mrf.mxu2  ;;  %v6723_v4 = vpop.f32.mrf.mxu0 }
 0xd81   :  { %v6788_v1 = vadd.f32 %v6763_v38, %v6683_v32  ;;  %v6743_v3 = vpop.f32.mrf.mxu1  ;;  %v6786_v29 = vadd.f32 %v6723_v4, %v6681_v58 }
 0xd82   :  { %v6787_v2 = vadd.f32 %v6743_v3, %v6682_v26 }
 0xd83   :  { %6846 = vmatmul.f32.vlgmr.msra.gmra.mxu2 %v6788_v1  ;;  %6806 = vmatmul.f32.vlgmr.msra.gmra.mxu0 %v6786_v29  ;;  %v6872_v43 = vmul.f32 %v6788_v1, %v6788_v1  ;;  %v6870_v45 = vmul.f32 %v6786_v29, %v6786_v29 }
 0xd84   :  { %6826 = vmatmul.f32.vlgmr.msra.gmra.mxu1 %v6787_v2  ;;  %v6871_v18 = vmul.f32 %v6787_v2, %v6787_v2 }
 0xd85   :  { %v6783_v0 = vpop.f32.mrf.mxu3 }
 0xd86   :  { %v6789_v11 = vadd.f32 %v6783_v0, %v6684_v46 }
 0xd88   :  { %6866 = vmatmul.f32.vlgmr.msra.gmra.mxu3 %v6789_v11  ;;  %v6873_v60 = vmul.f32 %v6789_v11, %v6789_v11 }
 0xd8b   :  { %6930 = vmatmul.f32.vlgmr.msrb.gmra.mxu2 %v6872_v43  ;;  %6890 = vmatmul.f32.vlgmr.msrb.gmra.mxu0 %v6870_v45 }
 0xd8c   :  { %6910 = vmatmul.f32.vlgmr.msrb.gmra.mxu1 %v6871_v18 }
 0xd90   :  { %6950 = vmatmul.f32.vlgmr.msrb.gmra.mxu3 %v6873_v60 }
 0xe00   :  { %v6807_v28 = vpop.f32.mrf.mxu0 }
 0xe01   :  { %v6827_v53 = vpop.f32.mrf.mxu1 }
 0xe02   :  { %v6828_v37 = vadd.f32 %v6827_v53, %v6807_v28 }
 0xe06   :  { %v6847_v7 = vpop.f32.mrf.mxu2 }
 0xe07   :  { %v6848_v6 = vadd.f32 %v6847_v7, %v6828_v37 }
 0xe08   :  { %v6891_v55 = vpop.f32.mrf.mxu0 }
 0xe09   :  { %v6911_v33 = vpop.f32.mrf.mxu1 }
 0xe0a   :  { %v6912_v62 = vadd.f32 %v6911_v33, %v6891_v55 }
 0xe0b   :  { %v6867_v61 = vpop.f32.mrf.mxu3 }
 0xe0c   :  { %v6868_v36 = vadd.f32 %v6867_v61, %v6848_v6 }
 0xe0e   :  { %v6931_v41 = vpop.f32.mrf.mxu2  ;;  %v6954_v63 = vmul.f32 0.001953125, %v6868_v36 }
 0xe0f   :  { %v6932_v42 = vadd.f32 %v6931_v41, %v6912_v62 }
 0xe10   :  { %v6956_v39 = vmul.f32 %v6954_v63, %v6954_v63 }
 0xe13   :  { %v6951_v57 = vpop.f32.mrf.mxu3 }
 0xe14   :  { %v6952_v30 = vadd.f32 %v6951_v57, %v6932_v42 }
 0xe16   :  { %v6955_v49 = vmul.f32 0.001953125, %v6952_v30 }
 0xe18   :  { %v6957_v51 = vsub.f32 %v6955_v49, %v6956_v39 }
 0xe1a   :  { %v6960_v52 = vadd.f32 1e-05, %v6957_v51 }
 0xe1c   :  { %7343 = vrsqrt.f32 %v6960_v52  ;;  %vm6967_vm1 = vweird.f32 %v6960_v52 }
 0xe22   :  { %v7344_v5 = vpop.eup %7343 }
 0xe23   :  { %v6962_v20 = vmul.f32 %v7344_v5, %v6960_v52  ;;  %vm6968_vm0 = vweird.f32 %v7344_v5 }
 0xe24   :  { %vm6969_vm2 = vmor %vm6967_vm1, %vm6968_vm0 }
 0xe25   :  { %v6963_v25 = vmul.f32 %v7344_v5, %v6962_v20 }
 0xe27   :  { %v6964_v50 = vmul.f32 0.5, %v6963_v25 }
 0xe29   :  { %v6965_v44 = vsub.f32 1.5, %v6964_v50 }
 0xe2b   :  { %v6966_v12 = vmul.f32 %v7344_v5, %v6965_v44 }
 0xe2d   :  { %v6970_v21 = vsel %vm6969_vm2, %v7344_v5, %v6966_v12 }
 0xe2e   :  { %v6971_v54 = vmul.f32 %v7315_v59, %v6970_v21 }
 0xe30   :  { %6978 = vperm.xlu2 %7330, %v6971_v54   ;;  %v6974_v27 = vmul.f32 %v6971_v54, %v6954_v63 }
 0xe32   :  { %v6975_v17 = vsub.f32 %v7316_v13, %v6974_v27 }
 0xe34   :  { %6987 = vperm.xlu0 %7331, %v6975_v17  }
 0xe8a   :  { %v6979_v23 = vpop.permute.xlu2 %6978 }
 0xe8b   :  { %v6981_v8 = vmul.f32 %v6979_v23, %v6786_v29  ;;  %v6982_v15 = vmul.f32 %v6979_v23, %v6787_v2  ;;  %v6983_v56 = vmul.f32 %v6979_v23, %v6788_v1  ;;  %v6984_v14 = vmul.f32 %v6979_v23, %v6789_v11 }
 0xea6   :  { %v6988_v24 = vpop.permute.xlu0 %6987 }
 0xea7   :  { %v6990_v22 = vadd.f32 %v6988_v24, %v6981_v8  ;;  %v6991_v48 = vadd.f32 %v6988_v24, %v6982_v15  ;;  %v6992_v31 = vadd.f32 %v6988_v24, %v6983_v56  ;;  %v6993_v47 = vadd.f32 %v6988_v24, %v6984_v14 }
 0xea9   :  { %v6994_v19 = vmul.f32 0.1, %v6990_v22  ;;  %v6995_v16 = vmul.f32 0.1, %v6991_v48  ;;  %v6996_v34 = vmul.f32 0.1, %v6992_v31 }
 0xeaa   :  { %v6997_v32 = vmul.f32 0.1, %v6993_v47 }
 0xeab   :  { %v6998_v35 = vmax.f32 %v6990_v22, %v6994_v19  ;;  %v6999_v9 = vmax.f32 %v6991_v48, %v6995_v16  ;;  %v7000_v58 = vmax.f32 %v6992_v31, %v6996_v34 }
 0xeac   :  { %v7001_v26 = vmax.f32 %v6993_v47, %v6997_v32 }
 0xead   :  { %7002 = vst [vmem:[#allocation2 + $0x20] sm:$0xff] %v6998_v35 }
 0xeae   :  { %7003 = vst [vmem:[#allocation2 + $0x28] sm:$0xff] %v6999_v9 }
 0xeaf   :  { %7004 = vst [vmem:[#allocation2 + $0x30] sm:$0xff] %v7000_v58 }
 0xeb0   :  { %7005 = vst [vmem:[#allocation2 + $0x38] sm:$0xff] %v7001_v26 }
 0xeb1   :  { %7018 = dma.vmem_to_hbm [thread:$0]  %s7011_s3, 1024, %s7013_s18, [#allocation3], %s7382_s19, %s7382_s19, %s7383_s20  }
 0xeb2   :  { %7369 = dma.done.wait [#allocation3], 1024  }
 0xeb3   :  { %7370 = vsyncadd [#allocation3], 4294966272 }
 0xeb4   :  { %7023 = vsyncpa [#allocation3], 1 }

</bundles_post_ra>
